<compile_context>
chip_gen: v7x
topology: tpu7x:2x2x1
jax: 0.10.0
libtpu: 0.0.40
codegen_flags: <defaults>
</compile_context>

<pallas_src>
import functools

import numpy as np
import jax
import jax.numpy as jnp
from jax import lax
from jax.experimental import pallas as pl
from jax.experimental.pallas import tpu as pltpu


def _round_up(n, m):
    return ((n + m - 1) // m) * m


def _fmnet_kernel(F, K, T, x_ref, o_ref, xt_ref, pk_ref):
    """One batch block.

    x_ref : (TB, F*K)    input rows, features flat along lanes (torch memory order)
    o_ref : (TB, T)      packed lower-triangular output, T = F*(F+1)//2
    xt_ref: (F*K, TB)    f32 scratch: batch rides the 128-lane axis
    pk_ref: (T_pad, TB)  f32 scratch: packed-transposed accumulator
    """
    TB = x_ref.shape[0]

    # ---- Phase 1: one on-chip transpose + one-time cast to f32 --------------
    # Afterwards every MAC below is a full-lane VPU op.  Chunked in <=128-row
    # slabs; the XLU work mostly hides under the block's input DMA.
    for c0 in range(0, TB, 128):
        c1 = min(c0 + 128, TB)
        xt_ref[:, c0:c1] = x_ref[c0:c1, :].astype(jnp.float32).T

    # ---- Phase 2: out[b, i, j] = sum_k xf[b, i*K+k] * xf[b, k*F+j] ----------
    # (the second factor is the memory-order reshape x.reshape(B, K, F)).
    # Per output row i, accumulate an (F, TB) slab in vregs, then store only
    # the rows j <= i directly at their final packed offset in pk_ref
    # (sublane-row stores; no per-i transpose, no lane-sparse output stores).
    for i in range(F):
        def mac(k, acc):
            a_row = xt_ref[pl.ds(i * K + k, 1), :]        # x[:, i, k]   -> (1, TB)
            b0 = pl.multiple_of(k * F, 8)                  # aligned sublane group
            b_grp = xt_ref[pl.ds(b0, F), :]                # xr[:, k, :]  -> (F, TB)
            return acc + a_row * b_grp

        # fori_loop (not an unrolled Python loop) keeps the 16 MAC stages'
        # live ranges bounded so vregs never spill even at TB = 1024.
        acc = lax.fori_loop(0, K, mac, jnp.zeros((F, TB), jnp.float32),
                            unroll=True)
        off = i * (i + 1) // 2
        pk_ref[off:off + i + 1, :] = acc[:i + 1, :]

    # ---- Phase 3: single chunked transpose + one store per 128-lane slab ----
    for c0 in range(0, TB, 128):
        c1 = min(c0 + 128, TB)
        o_ref[c0:c1, :] = pk_ref[:, c0:c1].T[:, :T].astype(o_ref.dtype)


def fmnet_forward(x, *, tb_target=1024):
    """x: (B, F, K) -> (B, F*(F+1)//2); same semantics as the PyTorch FMNet."""
    B, F, K = x.shape
    FK = F * K
    T = F * (F + 1) // 2
    T_pad = _round_up(T, 8)

    x_flat = x.reshape(B, FK)            # free; matches torch memory order

    # Batch block: multiple of 8 sublanes, capped at tb_target.  1024 sits at
    # the measured HBM-roofline plateau while the per-k working set stays well
    # under the 64-vreg budget (raising TB further would need lane strip-mining
    # inside the kernel).  Force >= 2 grid steps for mid-size batches so both
    # v7x TensorCores get work.
    TB = min(tb_target, _round_up(B, 8))
    if B >= 256 and pl.cdiv(B, TB) < 2:
        TB = _round_up(pl.cdiv(B, 2), 8)
    nsteps = pl.cdiv(B, TB)

    # Only tiny batches (B < one block) are padded; for larger batches the
    # ragged last block is handled by Pallas out-of-bounds masking (compute is
    # purely row-wise, so garbage tail rows never contaminate valid rows and
    # their output writes are dropped) -- no extra HBM pass over x.
    if B < TB:
        x_flat = jnp.pad(x_flat, ((0, TB - B), (0, 0)))
    B_out = max(B, TB)

    out = pl.pallas_call(
        functools.partial(_fmnet_kernel, F, K, T),
        out_shape=jax.ShapeDtypeStruct((B_out, T), x.dtype),
        grid_spec=pltpu.PrefetchScalarGridSpec(
            num_scalar_prefetch=0,
            grid=(nsteps,),
            in_specs=[pl.BlockSpec((TB, FK), lambda b: (b, 0))],
            out_specs=pl.BlockSpec((TB, T), lambda b: (b, 0)),
            scratch_shapes=[
                pltpu.VMEM((FK, TB), jnp.float32),      # transposed input
                pltpu.VMEM((T_pad, TB), jnp.float32),   # packed accumulator
            ],
        ),
        compiler_params=pltpu.CompilerParams(
            dimension_semantics=("parallel",),
        ),
    )(x_flat)

    if B_out != B:
        out = out[:B]
    return out


def fmnet_reference(x):
    """Pure-JAX reference mirroring the PyTorch module."""
    B, F, K = x.shape
    out = jnp.einsum("bfk,bkj->bfj", x, x.reshape(B, K, F))
    mask = np.tril(np.ones((F, F), dtype=bool)).reshape(-1)
    idx = np.nonzero(mask)[0]
    return out.reshape(B, F * F)[:, idx]


if __name__ == "__main__":
    # Small shapes consistent with the module: batch=2, F=8 fields, K=16 embed dim.
    B, F, K = 2, 8, 16
    key = jax.random.PRNGKey(0)
    k1, k2, k3 = jax.random.split(key, 3)
    x = jax.random.normal(k1, (B, F, K), dtype=jnp.float32)

    y = jax.block_until_ready(fmnet_forward(x))
    y_ref = fmnet_reference(x)
    assert y.shape == (B, F * (F + 1) // 2), y.shape
    np.testing.assert_allclose(np.asarray(y), np.asarray(y_ref), rtol=1e-5, atol=1e-5)

    # Multi-block grid with a ragged (masked) last block: B=300 -> 2 steps of 152.
    B2 = 300
    x2 = jax.random.normal(k2, (B2, F, K), dtype=jnp.float32)
    y2 = jax.block_until_ready(fmnet_forward(x2))
    np.testing.assert_allclose(
        np.asarray(y2), np.asarray(fmnet_reference(x2)), rtol=1e-5, atol=1e-5
    )

    # Exactly divisible multi-block path (3 full blocks of 128).
    B3 = 384
    x3 = jax.random.normal(k3, (B3, F, K), dtype=jnp.float32)
    y3 = jax.block_until_ready(fmnet_forward(x3, tb_target=128))
    np.testing.assert_allclose(
        np.asarray(y3), np.asarray(fmnet_reference(x3)), rtol=1e-5, atol=1e-5
    )

    print("KERNEL_OK")
</pallas_src>

<mosaic_0001>
module attributes {stable_mosaic.version = 11 : i64} {
  func.func @_fmnet_kernel(%arg0: i32, %arg1: memref<8x128xf32, #tpu.memory_space<vmem>>, %arg2: memref<8x36xf32, #tpu.memory_space<vmem>>, %arg3: memref<128x8xf32, #tpu.memory_space<vmem>>, %arg4: memref<40x8xf32, #tpu.memory_space<vmem>>) attributes {dimension_semantics = [#tpu.dimension_semantics<parallel>], iteration_bounds = array<i64: 1>, scalar_prefetch = 0 : i64, scratch_operands = 2 : i64, tpu.core_type = #tpu.core_type<tc>, window_params = [{transform_indices = @transform_0, window_bounds = array<i64: 8, 128>}, {transform_indices = @transform_1, window_bounds = array<i64: 8, 36>}]} {
    %c0 = arith.constant 0 : index
    %c0_0 = arith.constant 0 : index
    %0 = vector.load %arg1[%c0, %c0_0] : memref<8x128xf32, #tpu.memory_space<vmem>>, vector<8x128xf32>
    %1 = tpu.transpose %0, [1, 0] : vector<8x128xf32> -> vector<128x8xf32>
    %c0_1 = arith.constant 0 : index
    %c0_2 = arith.constant 0 : index
    %2 = vector.load %arg3[%c0_1, %c0_2] : memref<128x8xf32, #tpu.memory_space<vmem>>, vector<128x8xf32>
    tpu.vector_store %arg3[%c0_1, %c0_2], %1 {strides = array<i32>} : memref<128x8xf32, #tpu.memory_space<vmem>>, vector<128x8xf32>,
    %cst = arith.constant 0.000000e+00 : f32
    %3 = vector.broadcast %cst : f32 to vector<8x8xf32>
    %c0_i32 = arith.constant 0 : i32
    %c0_i32_3 = arith.constant 0 : i32
    %4 = arith.addi %c0_i32_3, %c0_i32 : i32
    %5 = arith.index_cast %4 : i32 to index
    %c0_4 = arith.constant 0 : index
    %6 = vector.load %arg3[%5, %c0_4] : memref<128x8xf32, #tpu.memory_space<vmem>>, vector<1x8xf32>
    %c8_i32 = arith.constant 8 : i32
    %7 = arith.muli %c0_i32, %c8_i32 : i32
    %8 = tpu.assume_multiple %7, 8 : i32
    %9 = arith.index_cast %8 : i32 to index
    %c0_5 = arith.constant 0 : index
    %10 = vector.load %arg3[%9, %c0_5] : memref<128x8xf32, #tpu.memory_space<vmem>>, vector<8x8xf32>
    %11 = vector.broadcast %6 : vector<1x8xf32> to vector<8x8xf32>
    %12 = arith.mulf %11, %10 : vector<8x8xf32>
    %13 = arith.addf %3, %12 : vector<8x8xf32>
    %c1_i32 = arith.constant 1 : i32
    %c0_i32_6 = arith.constant 0 : i32
    %14 = arith.addi %c0_i32_6, %c1_i32 : i32
    %15 = arith.index_cast %14 : i32 to index
    %c0_7 = arith.constant 0 : index
    %16 = vector.load %arg3[%15, %c0_7] : memref<128x8xf32, #tpu.memory_space<vmem>>, vector<1x8xf32>
    %c8_i32_8 = arith.constant 8 : i32
    %17 = arith.muli %c1_i32, %c8_i32_8 : i32
    %18 = tpu.assume_multiple %17, 8 : i32
    %19 = arith.index_cast %18 : i32 to index
    %c0_9 = arith.constant 0 : index
    %20 = vector.load %arg3[%19, %c0_9] : memref<128x8xf32, #tpu.memory_space<vmem>>, vector<8x8xf32>
    %21 = vector.broadcast %16 : vector<1x8xf32> to vector<8x8xf32>
    %22 = arith.mulf %21, %20 : vector<8x8xf32>
    %23 = arith.addf %13, %22 : vector<8x8xf32>
    %c2_i32 = arith.constant 2 : i32
    %c0_i32_10 = arith.constant 0 : i32
    %24 = arith.addi %c0_i32_10, %c2_i32 : i32
    %25 = arith.index_cast %24 : i32 to index
    %c0_11 = arith.constant 0 : index
    %26 = vector.load %arg3[%25, %c0_11] : memref<128x8xf32, #tpu.memory_space<vmem>>, vector<1x8xf32>
    %c8_i32_12 = arith.constant 8 : i32
    %27 = arith.muli %c2_i32, %c8_i32_12 : i32
    %28 = tpu.assume_multiple %27, 8 : i32
    %29 = arith.index_cast %28 : i32 to index
    %c0_13 = arith.constant 0 : index
    %30 = vector.load %arg3[%29, %c0_13] : memref<128x8xf32, #tpu.memory_space<vmem>>, vector<8x8xf32>
    %31 = vector.broadcast %26 : vector<1x8xf32> to vector<8x8xf32>
    %32 = arith.mulf %31, %30 : vector<8x8xf32>
    %33 = arith.addf %23, %32 : vector<8x8xf32>
    %c3_i32 = arith.constant 3 : i32
    %c0_i32_14 = arith.constant 0 : i32
    %34 = arith.addi %c0_i32_14, %c3_i32 : i32
    %35 = arith.index_cast %34 : i32 to index
    %c0_15 = arith.constant 0 : index
    %36 = vector.load %arg3[%35, %c0_15] : memref<128x8xf32, #tpu.memory_space<vmem>>, vector<1x8xf32>
    %c8_i32_16 = arith.constant 8 : i32
    %37 = arith.muli %c3_i32, %c8_i32_16 : i32
    %38 = tpu.assume_multiple %37, 8 : i32
    %39 = arith.index_cast %38 : i32 to index
    %c0_17 = arith.constant 0 : index
    %40 = vector.load %arg3[%39, %c0_17] : memref<128x8xf32, #tpu.memory_space<vmem>>, vector<8x8xf32>
    %41 = vector.broadcast %36 : vector<1x8xf32> to vector<8x8xf32>
    %42 = arith.mulf %41, %40 : vector<8x8xf32>
    %43 = arith.addf %33, %42 : vector<8x8xf32>
    %c4_i32 = arith.constant 4 : i32
    %c0_i32_18 = arith.constant 0 : i32
    %44 = arith.addi %c0_i32_18, %c4_i32 : i32
    %45 = arith.index_cast %44 : i32 to index
    %c0_19 = arith.constant 0 : index
    %46 = vector.load %arg3[%45, %c0_19] : memref<128x8xf32, #tpu.memory_space<vmem>>, vector<1x8xf32>
    %c8_i32_20 = arith.constant 8 : i32
    %47 = arith.muli %c4_i32, %c8_i32_20 : i32
    %48 = tpu.assume_multiple %47, 8 : i32
    %49 = arith.index_cast %48 : i32 to index
    %c0_21 = arith.constant 0 : index
    %50 = vector.load %arg3[%49, %c0_21] : memref<128x8xf32, #tpu.memory_space<vmem>>, vector<8x8xf32>
    %51 = vector.broadcast %46 : vector<1x8xf32> to vector<8x8xf32>
    %52 = arith.mulf %51, %50 : vector<8x8xf32>
    %53 = arith.addf %43, %52 : vector<8x8xf32>
    %c5_i32 = arith.constant 5 : i32
    %c0_i32_22 = arith.constant 0 : i32
    %54 = arith.addi %c0_i32_22, %c5_i32 : i32
    %55 = arith.index_cast %54 : i32 to index
    %c0_23 = arith.constant 0 : index
    %56 = vector.load %arg3[%55, %c0_23] : memref<128x8xf32, #tpu.memory_space<vmem>>, vector<1x8xf32>
    %c8_i32_24 = arith.constant 8 : i32
    %57 = arith.muli %c5_i32, %c8_i32_24 : i32
    %58 = tpu.assume_multiple %57, 8 : i32
    %59 = arith.index_cast %58 : i32 to index
    %c0_25 = arith.constant 0 : index
    %60 = vector.load %arg3[%59, %c0_25] : memref<128x8xf32, #tpu.memory_space<vmem>>, vector<8x8xf32>
    %61 = vector.broadcast %56 : vector<1x8xf32> to vector<8x8xf32>
    %62 = arith.mulf %61, %60 : vector<8x8xf32>
    %63 = arith.addf %53, %62 : vector<8x8xf32>
    %c6_i32 = arith.constant 6 : i32
    %c0_i32_26 = arith.constant 0 : i32
    %64 = arith.addi %c0_i32_26, %c6_i32 : i32
    %65 = arith.index_cast %64 : i32 to index
    %c0_27 = arith.constant 0 : index
    %66 = vector.load %arg3[%65, %c0_27] : memref<128x8xf32, #tpu.memory_space<vmem>>, vector<1x8xf32>
    %c8_i32_28 = arith.constant 8 : i32
    %67 = arith.muli %c6_i32, %c8_i32_28 : i32
    %68 = tpu.assume_multiple %67, 8 : i32
    %69 = arith.index_cast %68 : i32 to index
    %c0_29 = arith.constant 0 : index
    %70 = vector.load %arg3[%69, %c0_29] : memref<128x8xf32, #tpu.memory_space<vmem>>, vector<8x8xf32>
    %71 = vector.broadcast %66 : vector<1x8xf32> to vector<8x8xf32>
    %72 = arith.mulf %71, %70 : vector<8x8xf32>
    %73 = arith.addf %63, %72 : vector<8x8xf32>
    %c7_i32 = arith.constant 7 : i32
    %c0_i32_30 = arith.constant 0 : i32
    %74 = arith.addi %c0_i32_30, %c7_i32 : i32
    %75 = arith.index_cast %74 : i32 to index
    %c0_31 = arith.constant 0 : index
    %76 = vector.load %arg3[%75, %c0_31] : memref<128x8xf32, #tpu.memory_space<vmem>>, vector<1x8xf32>
    %c8_i32_32 = arith.constant 8 : i32
    %77 = arith.muli %c7_i32, %c8_i32_32 : i32
    %78 = tpu.assume_multiple %77, 8 : i32
    %79 = arith.index_cast %78 : i32 to index
    %c0_33 = arith.constant 0 : index
    %80 = vector.load %arg3[%79, %c0_33] : memref<128x8xf32, #tpu.memory_space<vmem>>, vector<8x8xf32>
    %81 = vector.broadcast %76 : vector<1x8xf32> to vector<8x8xf32>
    %82 = arith.mulf %81, %80 : vector<8x8xf32>
    %83 = arith.addf %73, %82 : vector<8x8xf32>
    %c8_i32_34 = arith.constant 8 : i32
    %c0_i32_35 = arith.constant 0 : i32
    %84 = arith.addi %c0_i32_35, %c8_i32_34 : i32
    %85 = arith.index_cast %84 : i32 to index
    %c0_36 = arith.constant 0 : index
    %86 = vector.load %arg3[%85, %c0_36] : memref<128x8xf32, #tpu.memory_space<vmem>>, vector<1x8xf32>
    %c8_i32_37 = arith.constant 8 : i32
    %87 = arith.muli %c8_i32_34, %c8_i32_37 : i32
    %88 = tpu.assume_multiple %87, 8 : i32
    %89 = arith.index_cast %88 : i32 to index
    %c0_38 = arith.constant 0 : index
    %90 = vector.load %arg3[%89, %c0_38] : memref<128x8xf32, #tpu.memory_space<vmem>>, vector<8x8xf32>
    %91 = vector.broadcast %86 : vector<1x8xf32> to vector<8x8xf32>
    %92 = arith.mulf %91, %90 : vector<8x8xf32>
    %93 = arith.addf %83, %92 : vector<8x8xf32>
    %c9_i32 = arith.constant 9 : i32
    %c0_i32_39 = arith.constant 0 : i32
    %94 = arith.addi %c0_i32_39, %c9_i32 : i32
    %95 = arith.index_cast %94 : i32 to index
    %c0_40 = arith.constant 0 : index
    %96 = vector.load %arg3[%95, %c0_40] : memref<128x8xf32, #tpu.memory_space<vmem>>, vector<1x8xf32>
    %c8_i32_41 = arith.constant 8 : i32
    %97 = arith.muli %c9_i32, %c8_i32_41 : i32
    %98 = tpu.assume_multiple %97, 8 : i32
    %99 = arith.index_cast %98 : i32 to index
    %c0_42 = arith.constant 0 : index
    %100 = vector.load %arg3[%99, %c0_42] : memref<128x8xf32, #tpu.memory_space<vmem>>, vector<8x8xf32>
    %101 = vector.broadcast %96 : vector<1x8xf32> to vector<8x8xf32>
    %102 = arith.mulf %101, %100 : vector<8x8xf32>
    %103 = arith.addf %93, %102 : vector<8x8xf32>
    %c10_i32 = arith.constant 10 : i32
    %c0_i32_43 = arith.constant 0 : i32
    %104 = arith.addi %c0_i32_43, %c10_i32 : i32
    %105 = arith.index_cast %104 : i32 to index
    %c0_44 = arith.constant 0 : index
    %106 = vector.load %arg3[%105, %c0_44] : memref<128x8xf32, #tpu.memory_space<vmem>>, vector<1x8xf32>
    %c8_i32_45 = arith.constant 8 : i32
    %107 = arith.muli %c10_i32, %c8_i32_45 : i32
    %108 = tpu.assume_multiple %107, 8 : i32
    %109 = arith.index_cast %108 : i32 to index
    %c0_46 = arith.constant 0 : index
    %110 = vector.load %arg3[%109, %c0_46] : memref<128x8xf32, #tpu.memory_space<vmem>>, vector<8x8xf32>
    %111 = vector.broadcast %106 : vector<1x8xf32> to vector<8x8xf32>
    %112 = arith.mulf %111, %110 : vector<8x8xf32>
    %113 = arith.addf %103, %112 : vector<8x8xf32>
    %c11_i32 = arith.constant 11 : i32
    %c0_i32_47 = arith.constant 0 : i32
    %114 = arith.addi %c0_i32_47, %c11_i32 : i32
    %115 = arith.index_cast %114 : i32 to index
    %c0_48 = arith.constant 0 : index
    %116 = vector.load %arg3[%115, %c0_48] : memref<128x8xf32, #tpu.memory_space<vmem>>, vector<1x8xf32>
    %c8_i32_49 = arith.constant 8 : i32
    %117 = arith.muli %c11_i32, %c8_i32_49 : i32
    %118 = tpu.assume_multiple %117, 8 : i32
    %119 = arith.index_cast %118 : i32 to index
    %c0_50 = arith.constant 0 : index
    %120 = vector.load %arg3[%119, %c0_50] : memref<128x8xf32, #tpu.memory_space<vmem>>, vector<8x8xf32>
    %121 = vector.broadcast %116 : vector<1x8xf32> to vector<8x8xf32>
    %122 = arith.mulf %121, %120 : vector<8x8xf32>
    %123 = arith.addf %113, %122 : vector<8x8xf32>
    %c12_i32 = arith.constant 12 : i32
    %c0_i32_51 = arith.constant 0 : i32
    %124 = arith.addi %c0_i32_51, %c12_i32 : i32
    %125 = arith.index_cast %124 : i32 to index
    %c0_52 = arith.constant 0 : index
    %126 = vector.load %arg3[%125, %c0_52] : memref<128x8xf32, #tpu.memory_space<vmem>>, vector<1x8xf32>
    %c8_i32_53 = arith.constant 8 : i32
    %127 = arith.muli %c12_i32, %c8_i32_53 : i32
    %128 = tpu.assume_multiple %127, 8 : i32
    %129 = arith.index_cast %128 : i32 to index
    %c0_54 = arith.constant 0 : index
    %130 = vector.load %arg3[%129, %c0_54] : memref<128x8xf32, #tpu.memory_space<vmem>>, vector<8x8xf32>
    %131 = vector.broadcast %126 : vector<1x8xf32> to vector<8x8xf32>
    %132 = arith.mulf %131, %130 : vector<8x8xf32>
    %133 = arith.addf %123, %132 : vector<8x8xf32>
    %c13_i32 = arith.constant 13 : i32
    %c0_i32_55 = arith.constant 0 : i32
    %134 = arith.addi %c0_i32_55, %c13_i32 : i32
    %135 = arith.index_cast %134 : i32 to index
    %c0_56 = arith.constant 0 : index
    %136 = vector.load %arg3[%135, %c0_56] : memref<128x8xf32, #tpu.memory_space<vmem>>, vector<1x8xf32>
    %c8_i32_57 = arith.constant 8 : i32
    %137 = arith.muli %c13_i32, %c8_i32_57 : i32
    %138 = tpu.assume_multiple %137, 8 : i32
    %139 = arith.index_cast %138 : i32 to index
    %c0_58 = arith.constant 0 : index
    %140 = vector.load %arg3[%139, %c0_58] : memref<128x8xf32, #tpu.memory_space<vmem>>, vector<8x8xf32>
    %141 = vector.broadcast %136 : vector<1x8xf32> to vector<8x8xf32>
    %142 = arith.mulf %141, %140 : vector<8x8xf32>
    %143 = arith.addf %133, %142 : vector<8x8xf32>
    %c14_i32 = arith.constant 14 : i32
    %c0_i32_59 = arith.constant 0 : i32
    %144 = arith.addi %c0_i32_59, %c14_i32 : i32
    %145 = arith.index_cast %144 : i32 to index
    %c0_60 = arith.constant 0 : index
    %146 = vector.load %arg3[%145, %c0_60] : memref<128x8xf32, #tpu.memory_space<vmem>>, vector<1x8xf32>
    %c8_i32_61 = arith.constant 8 : i32
    %147 = arith.muli %c14_i32, %c8_i32_61 : i32
    %148 = tpu.assume_multiple %147, 8 : i32
    %149 = arith.index_cast %148 : i32 to index
    %c0_62 = arith.constant 0 : index
    %150 = vector.load %arg3[%149, %c0_62] : memref<128x8xf32, #tpu.memory_space<vmem>>, vector<8x8xf32>
    %151 = vector.broadcast %146 : vector<1x8xf32> to vector<8x8xf32>
    %152 = arith.mulf %151, %150 : vector<8x8xf32>
    %153 = arith.addf %143, %152 : vector<8x8xf32>
    %c15_i32 = arith.constant 15 : i32
    %c0_i32_63 = arith.constant 0 : i32
    %154 = arith.addi %c0_i32_63, %c15_i32 : i32
    %155 = arith.index_cast %154 : i32 to index
    %c0_64 = arith.constant 0 : index
    %156 = vector.load %arg3[%155, %c0_64] : memref<128x8xf32, #tpu.memory_space<vmem>>, vector<1x8xf32>
    %c8_i32_65 = arith.constant 8 : i32
    %157 = arith.muli %c15_i32, %c8_i32_65 : i32
    %158 = tpu.assume_multiple %157, 8 : i32
    %159 = arith.index_cast %158 : i32 to index
    %c0_66 = arith.constant 0 : index
    %160 = vector.load %arg3[%159, %c0_66] : memref<128x8xf32, #tpu.memory_space<vmem>>, vector<8x8xf32>
    %161 = vector.broadcast %156 : vector<1x8xf32> to vector<8x8xf32>
    %162 = arith.mulf %161, %160 : vector<8x8xf32>
    %163 = arith.addf %153, %162 : vector<8x8xf32>
    %c16_i32 = arith.constant 16 : i32
    %164 = vector.extract_strided_slice %163 {offsets = [0, 0], sizes = [1, 8], strides = [1, 1]} : vector<8x8xf32> to vector<1x8xf32>
    %c0_67 = arith.constant 0 : index
    %c0_68 = arith.constant 0 : index
    %165 = vector.load %arg4[%c0_67, %c0_68] : memref<40x8xf32, #tpu.memory_space<vmem>>, vector<1x8xf32>
    tpu.vector_store %arg4[%c0_67, %c0_68], %164 {strides = array<i32>} : memref<40x8xf32, #tpu.memory_space<vmem>>, vector<1x8xf32>,
    %cst_69 = arith.constant 0.000000e+00 : f32
    %166 = vector.broadcast %cst_69 : f32 to vector<8x8xf32>
    %c0_i32_70 = arith.constant 0 : i32
    %c16_i32_71 = arith.constant 16 : i32
    %167 = arith.addi %c16_i32_71, %c0_i32_70 : i32
    %168 = arith.index_cast %167 : i32 to index
    %c0_72 = arith.constant 0 : index
    %169 = vector.load %arg3[%168, %c0_72] : memref<128x8xf32, #tpu.memory_space<vmem>>, vector<1x8xf32>
    %c8_i32_73 = arith.constant 8 : i32
    %170 = arith.muli %c0_i32_70, %c8_i32_73 : i32
    %171 = tpu.assume_multiple %170, 8 : i32
    %172 = arith.index_cast %171 : i32 to index
    %c0_74 = arith.constant 0 : index
    %173 = vector.load %arg3[%172, %c0_74] : memref<128x8xf32, #tpu.memory_space<vmem>>, vector<8x8xf32>
    %174 = vector.broadcast %169 : vector<1x8xf32> to vector<8x8xf32>
    %175 = arith.mulf %174, %173 : vector<8x8xf32>
    %176 = arith.addf %166, %175 : vector<8x8xf32>
    %c1_i32_75 = arith.constant 1 : i32
    %c16_i32_76 = arith.constant 16 : i32
    %177 = arith.addi %c16_i32_76, %c1_i32_75 : i32
    %178 = arith.index_cast %177 : i32 to index
    %c0_77 = arith.constant 0 : index
    %179 = vector.load %arg3[%178, %c0_77] : memref<128x8xf32, #tpu.memory_space<vmem>>, vector<1x8xf32>
    %c8_i32_78 = arith.constant 8 : i32
    %180 = arith.muli %c1_i32_75, %c8_i32_78 : i32
    %181 = tpu.assume_multiple %180, 8 : i32
    %182 = arith.index_cast %181 : i32 to index
    %c0_79 = arith.constant 0 : index
    %183 = vector.load %arg3[%182, %c0_79] : memref<128x8xf32, #tpu.memory_space<vmem>>, vector<8x8xf32>
    %184 = vector.broadcast %179 : vector<1x8xf32> to vector<8x8xf32>
    %185 = arith.mulf %184, %183 : vector<8x8xf32>
    %186 = arith.addf %176, %185 : vector<8x8xf32>
    %c2_i32_80 = arith.constant 2 : i32
    %c16_i32_81 = arith.constant 16 : i32
    %187 = arith.addi %c16_i32_81, %c2_i32_80 : i32
    %188 = arith.index_cast %187 : i32 to index
    %c0_82 = arith.constant 0 : index
    %189 = vector.load %arg3[%188, %c0_82] : memref<128x8xf32, #tpu.memory_space<vmem>>, vector<1x8xf32>
    %c8_i32_83 = arith.constant 8 : i32
    %190 = arith.muli %c2_i32_80, %c8_i32_83 : i32
    %191 = tpu.assume_multiple %190, 8 : i32
    %192 = arith.index_cast %191 : i32 to index
    %c0_84 = arith.constant 0 : index
    %193 = vector.load %arg3[%192, %c0_84] : memref<128x8xf32, #tpu.memory_space<vmem>>, vector<8x8xf32>
    %194 = vector.broadcast %189 : vector<1x8xf32> to vector<8x8xf32>
    %195 = arith.mulf %194, %193 : vector<8x8xf32>
    %196 = arith.addf %186, %195 : vector<8x8xf32>
    %c3_i32_85 = arith.constant 3 : i32
    %c16_i32_86 = arith.constant 16 : i32
    %197 = arith.addi %c16_i32_86, %c3_i32_85 : i32
    %198 = arith.index_cast %197 : i32 to index
    %c0_87 = arith.constant 0 : index
    %199 = vector.load %arg3[%198, %c0_87] : memref<128x8xf32, #tpu.memory_space<vmem>>, vector<1x8xf32>
    %c8_i32_88 = arith.constant 8 : i32
    %200 = arith.muli %c3_i32_85, %c8_i32_88 : i32
    %201 = tpu.assume_multiple %200, 8 : i32
    %202 = arith.index_cast %201 : i32 to index
    %c0_89 = arith.constant 0 : index
    %203 = vector.load %arg3[%202, %c0_89] : memref<128x8xf32, #tpu.memory_space<vmem>>, vector<8x8xf32>
    %204 = vector.broadcast %199 : vector<1x8xf32> to vector<8x8xf32>
    %205 = arith.mulf %204, %203 : vector<8x8xf32>
    %206 = arith.addf %196, %205 : vector<8x8xf32>
    %c4_i32_90 = arith.constant 4 : i32
    %c16_i32_91 = arith.constant 16 : i32
    %207 = arith.addi %c16_i32_91, %c4_i32_90 : i32
    %208 = arith.index_cast %207 : i32 to index
    %c0_92 = arith.constant 0 : index
    %209 = vector.load %arg3[%208, %c0_92] : memref<128x8xf32, #tpu.memory_space<vmem>>, vector<1x8xf32>
    %c8_i32_93 = arith.constant 8 : i32
    %210 = arith.muli %c4_i32_90, %c8_i32_93 : i32
    %211 = tpu.assume_multiple %210, 8 : i32
    %212 = arith.index_cast %211 : i32 to index
    %c0_94 = arith.constant 0 : index
    %213 = vector.load %arg3[%212, %c0_94] : memref<128x8xf32, #tpu.memory_space<vmem>>, vector<8x8xf32>
    %214 = vector.broadcast %209 : vector<1x8xf32> to vector<8x8xf32>
    %215 = arith.mulf %214, %213 : vector<8x8xf32>
    %216 = arith.addf %206, %215 : vector<8x8xf32>
    %c5_i32_95 = arith.constant 5 : i32
    %c16_i32_96 = arith.constant 16 : i32
    %217 = arith.addi %c16_i32_96, %c5_i32_95 : i32
    %218 = arith.index_cast %217 : i32 to index
    %c0_97 = arith.constant 0 : index
    %219 = vector.load %arg3[%218, %c0_97] : memref<128x8xf32, #tpu.memory_space<vmem>>, vector<1x8xf32>
    %c8_i32_98 = arith.constant 8 : i32
    %220 = arith.muli %c5_i32_95, %c8_i32_98 : i32
    %221 = tpu.assume_multiple %220, 8 : i32
    %222 = arith.index_cast %221 : i32 to index
    %c0_99 = arith.constant 0 : index
    %223 = vector.load %arg3[%222, %c0_99] : memref<128x8xf32, #tpu.memory_space<vmem>>, vector<8x8xf32>
    %224 = vector.broadcast %219 : vector<1x8xf32> to vector<8x8xf32>
    %225 = arith.mulf %224, %223 : vector<8x8xf32>
    %226 = arith.addf %216, %225 : vector<8x8xf32>
    %c6_i32_100 = arith.constant 6 : i32
    %c16_i32_101 = arith.constant 16 : i32
    %227 = arith.addi %c16_i32_101, %c6_i32_100 : i32
    %228 = arith.index_cast %227 : i32 to index
    %c0_102 = arith.constant 0 : index
    %229 = vector.load %arg3[%228, %c0_102] : memref<128x8xf32, #tpu.memory_space<vmem>>, vector<1x8xf32>
    %c8_i32_103 = arith.constant 8 : i32
    %230 = arith.muli %c6_i32_100, %c8_i32_103 : i32
    %231 = tpu.assume_multiple %230, 8 : i32
    %232 = arith.index_cast %231 : i32 to index
    %c0_104 = arith.constant 0 : index
    %233 = vector.load %arg3[%232, %c0_104] : memref<128x8xf32, #tpu.memory_space<vmem>>, vector<8x8xf32>
    %234 = vector.broadcast %229 : vector<1x8xf32> to vector<8x8xf32>
    %235 = arith.mulf %234, %233 : vector<8x8xf32>
    %236 = arith.addf %226, %235 : vector<8x8xf32>
    %c7_i32_105 = arith.constant 7 : i32
    %c16_i32_106 = arith.constant 16 : i32
    %237 = arith.addi %c16_i32_106, %c7_i32_105 : i32
    %238 = arith.index_cast %237 : i32 to index
    %c0_107 = arith.constant 0 : index
    %239 = vector.load %arg3[%238, %c0_107] : memref<128x8xf32, #tpu.memory_space<vmem>>, vector<1x8xf32>
    %c8_i32_108 = arith.constant 8 : i32
    %240 = arith.muli %c7_i32_105, %c8_i32_108 : i32
    %241 = tpu.assume_multiple %240, 8 : i32
    %242 = arith.index_cast %241 : i32 to index
    %c0_109 = arith.constant 0 : index
    %243 = vector.load %arg3[%242, %c0_109] : memref<128x8xf32, #tpu.memory_space<vmem>>, vector<8x8xf32>
    %244 = vector.broadcast %239 : vector<1x8xf32> to vector<8x8xf32>
    %245 = arith.mulf %244, %243 : vector<8x8xf32>
    %246 = arith.addf %236, %245 : vector<8x8xf32>
    %c8_i32_110 = arith.constant 8 : i32
    %c16_i32_111 = arith.constant 16 : i32
    %247 = arith.addi %c16_i32_111, %c8_i32_110 : i32
    %248 = arith.index_cast %247 : i32 to index
    %c0_112 = arith.constant 0 : index
    %249 = vector.load %arg3[%248, %c0_112] : memref<128x8xf32, #tpu.memory_space<vmem>>, vector<1x8xf32>
    %c8_i32_113 = arith.constant 8 : i32
    %250 = arith.muli %c8_i32_110, %c8_i32_113 : i32
    %251 = tpu.assume_multiple %250, 8 : i32
    %252 = arith.index_cast %251 : i32 to index
    %c0_114 = arith.constant 0 : index
    %253 = vector.load %arg3[%252, %c0_114] : memref<128x8xf32, #tpu.memory_space<vmem>>, vector<8x8xf32>
    %254 = vector.broadcast %249 : vector<1x8xf32> to vector<8x8xf32>
    %255 = arith.mulf %254, %253 : vector<8x8xf32>
    %256 = arith.addf %246, %255 : vector<8x8xf32>
    %c9_i32_115 = arith.constant 9 : i32
    %c16_i32_116 = arith.constant 16 : i32
    %257 = arith.addi %c16_i32_116, %c9_i32_115 : i32
    %258 = arith.index_cast %257 : i32 to index
    %c0_117 = arith.constant 0 : index
    %259 = vector.load %arg3[%258, %c0_117] : memref<128x8xf32, #tpu.memory_space<vmem>>, vector<1x8xf32>
    %c8_i32_118 = arith.constant 8 : i32
    %260 = arith.muli %c9_i32_115, %c8_i32_118 : i32
    %261 = tpu.assume_multiple %260, 8 : i32
    %262 = arith.index_cast %261 : i32 to index
    %c0_119 = arith.constant 0 : index
    %263 = vector.load %arg3[%262, %c0_119] : memref<128x8xf32, #tpu.memory_space<vmem>>, vector<8x8xf32>
    %264 = vector.broadcast %259 : vector<1x8xf32> to vector<8x8xf32>
    %265 = arith.mulf %264, %263 : vector<8x8xf32>
    %266 = arith.addf %256, %265 : vector<8x8xf32>
    %c10_i32_120 = arith.constant 10 : i32
    %c16_i32_121 = arith.constant 16 : i32
    %267 = arith.addi %c16_i32_121, %c10_i32_120 : i32
    %268 = arith.index_cast %267 : i32 to index
    %c0_122 = arith.constant 0 : index
    %269 = vector.load %arg3[%268, %c0_122] : memref<128x8xf32, #tpu.memory_space<vmem>>, vector<1x8xf32>
    %c8_i32_123 = arith.constant 8 : i32
    %270 = arith.muli %c10_i32_120, %c8_i32_123 : i32
    %271 = tpu.assume_multiple %270, 8 : i32
    %272 = arith.index_cast %271 : i32 to index
    %c0_124 = arith.constant 0 : index
    %273 = vector.load %arg3[%272, %c0_124] : memref<128x8xf32, #tpu.memory_space<vmem>>, vector<8x8xf32>
    %274 = vector.broadcast %269 : vector<1x8xf32> to vector<8x8xf32>
    %275 = arith.mulf %274, %273 : vector<8x8xf32>
    %276 = arith.addf %266, %275 : vector<8x8xf32>
    %c11_i32_125 = arith.constant 11 : i32
    %c16_i32_126 = arith.constant 16 : i32
    %277 = arith.addi %c16_i32_126, %c11_i32_125 : i32
    %278 = arith.index_cast %277 : i32 to index
    %c0_127 = arith.constant 0 : index
    %279 = vector.load %arg3[%278, %c0_127] : memref<128x8xf32, #tpu.memory_space<vmem>>, vector<1x8xf32>
    %c8_i32_128 = arith.constant 8 : i32
    %280 = arith.muli %c11_i32_125, %c8_i32_128 : i32
    %281 = tpu.assume_multiple %280, 8 : i32
    %282 = arith.index_cast %281 : i32 to index
    %c0_129 = arith.constant 0 : index
    %283 = vector.load %arg3[%282, %c0_129] : memref<128x8xf32, #tpu.memory_space<vmem>>, vector<8x8xf32>
    %284 = vector.broadcast %279 : vector<1x8xf32> to vector<8x8xf32>
    %285 = arith.mulf %284, %283 : vector<8x8xf32>
    %286 = arith.addf %276, %285 : vector<8x8xf32>
    %c12_i32_130 = arith.constant 12 : i32
    %c16_i32_131 = arith.constant 16 : i32
    %287 = arith.addi %c16_i32_131, %c12_i32_130 : i32
    %288 = arith.index_cast %287 : i32 to index
    %c0_132 = arith.constant 0 : index
    %289 = vector.load %arg3[%288, %c0_132] : memref<128x8xf32, #tpu.memory_space<vmem>>, vector<1x8xf32>
    %c8_i32_133 = arith.constant 8 : i32
    %290 = arith.muli %c12_i32_130, %c8_i32_133 : i32
    %291 = tpu.assume_multiple %290, 8 : i32
    %292 = arith.index_cast %291 : i32 to index
    %c0_134 = arith.constant 0 : index
    %293 = vector.load %arg3[%292, %c0_134] : memref<128x8xf32, #tpu.memory_space<vmem>>, vector<8x8xf32>
    %294 = vector.broadcast %289 : vector<1x8xf32> to vector<8x8xf32>
    %295 = arith.mulf %294, %293 : vector<8x8xf32>
    %296 = arith.addf %286, %295 : vector<8x8xf32>
    %c13_i32_135 = arith.constant 13 : i32
    %c16_i32_136 = arith.constant 16 : i32
    %297 = arith.addi %c16_i32_136, %c13_i32_135 : i32
    %298 = arith.index_cast %297 : i32 to index
    %c0_137 = arith.constant 0 : index
    %299 = vector.load %arg3[%298, %c0_137] : memref<128x8xf32, #tpu.memory_space<vmem>>, vector<1x8xf32>
    %c8_i32_138 = arith.constant 8 : i32
    %300 = arith.muli %c13_i32_135, %c8_i32_138 : i32
    %301 = tpu.assume_multiple %300, 8 : i32
    %302 = arith.index_cast %301 : i32 to index
    %c0_139 = arith.constant 0 : index
    %303 = vector.load %arg3[%302, %c0_139] : memref<128x8xf32, #tpu.memory_space<vmem>>, vector<8x8xf32>
    %304 = vector.broadcast %299 : vector<1x8xf32> to vector<8x8xf32>
    %305 = arith.mulf %304, %303 : vector<8x8xf32>
    %306 = arith.addf %296, %305 : vector<8x8xf32>
    %c14_i32_140 = arith.constant 14 : i32
    %c16_i32_141 = arith.constant 16 : i32
    %307 = arith.addi %c16_i32_141, %c14_i32_140 : i32
    %308 = arith.index_cast %307 : i32 to index
    %c0_142 = arith.constant 0 : index
    %309 = vector.load %arg3[%308, %c0_142] : memref<128x8xf32, #tpu.memory_space<vmem>>, vector<1x8xf32>
    %c8_i32_143 = arith.constant 8 : i32
    %310 = arith.muli %c14_i32_140, %c8_i32_143 : i32
    %311 = tpu.assume_multiple %310, 8 : i32
    %312 = arith.index_cast %311 : i32 to index
    %c0_144 = arith.constant 0 : index
    %313 = vector.load %arg3[%312, %c0_144] : memref<128x8xf32, #tpu.memory_space<vmem>>, vector<8x8xf32>
    %314 = vector.broadcast %309 : vector<1x8xf32> to vector<8x8xf32>
    %315 = arith.mulf %314, %313 : vector<8x8xf32>
    %316 = arith.addf %306, %315 : vector<8x8xf32>
    %c15_i32_145 = arith.constant 15 : i32
    %c16_i32_146 = arith.constant 16 : i32
    %317 = arith.addi %c16_i32_146, %c15_i32_145 : i32
    %318 = arith.index_cast %317 : i32 to index
    %c0_147 = arith.constant 0 : index
    %319 = vector.load %arg3[%318, %c0_147] : memref<128x8xf32, #tpu.memory_space<vmem>>, vector<1x8xf32>
    %c8_i32_148 = arith.constant 8 : i32
    %320 = arith.muli %c15_i32_145, %c8_i32_148 : i32
    %321 = tpu.assume_multiple %320, 8 : i32
    %322 = arith.index_cast %321 : i32 to index
    %c0_149 = arith.constant 0 : index
    %323 = vector.load %arg3[%322, %c0_149] : memref<128x8xf32, #tpu.memory_space<vmem>>, vector<8x8xf32>
    %324 = vector.broadcast %319 : vector<1x8xf32> to vector<8x8xf32>
    %325 = arith.mulf %324, %323 : vector<8x8xf32>
    %326 = arith.addf %316, %325 : vector<8x8xf32>
    %c16_i32_150 = arith.constant 16 : i32
    %327 = vector.extract_strided_slice %326 {offsets = [0, 0], sizes = [2, 8], strides = [1, 1]} : vector<8x8xf32> to vector<2x8xf32>
    %c1 = arith.constant 1 : index
    %c0_151 = arith.constant 0 : index
    %328 = vector.load %arg4[%c1, %c0_151] : memref<40x8xf32, #tpu.memory_space<vmem>>, vector<2x8xf32>
    tpu.vector_store %arg4[%c1, %c0_151], %327 {strides = array<i32>} : memref<40x8xf32, #tpu.memory_space<vmem>>, vector<2x8xf32>,
    %cst_152 = arith.constant 0.000000e+00 : f32
    %329 = vector.broadcast %cst_152 : f32 to vector<8x8xf32>
    %c0_i32_153 = arith.constant 0 : i32
    %c32_i32 = arith.constant 32 : i32
    %330 = arith.addi %c32_i32, %c0_i32_153 : i32
    %331 = arith.index_cast %330 : i32 to index
    %c0_154 = arith.constant 0 : index
    %332 = vector.load %arg3[%331, %c0_154] : memref<128x8xf32, #tpu.memory_space<vmem>>, vector<1x8xf32>
    %c8_i32_155 = arith.constant 8 : i32
    %333 = arith.muli %c0_i32_153, %c8_i32_155 : i32
    %334 = tpu.assume_multiple %333, 8 : i32
    %335 = arith.index_cast %334 : i32 to index
    %c0_156 = arith.constant 0 : index
    %336 = vector.load %arg3[%335, %c0_156] : memref<128x8xf32, #tpu.memory_space<vmem>>, vector<8x8xf32>
    %337 = vector.broadcast %332 : vector<1x8xf32> to vector<8x8xf32>
    %338 = arith.mulf %337, %336 : vector<8x8xf32>
    %339 = arith.addf %329, %338 : vector<8x8xf32>
    %c1_i32_157 = arith.constant 1 : i32
    %c32_i32_158 = arith.constant 32 : i32
    %340 = arith.addi %c32_i32_158, %c1_i32_157 : i32
    %341 = arith.index_cast %340 : i32 to index
    %c0_159 = arith.constant 0 : index
    %342 = vector.load %arg3[%341, %c0_159] : memref<128x8xf32, #tpu.memory_space<vmem>>, vector<1x8xf32>
    %c8_i32_160 = arith.constant 8 : i32
    %343 = arith.muli %c1_i32_157, %c8_i32_160 : i32
    %344 = tpu.assume_multiple %343, 8 : i32
    %345 = arith.index_cast %344 : i32 to index
    %c0_161 = arith.constant 0 : index
    %346 = vector.load %arg3[%345, %c0_161] : memref<128x8xf32, #tpu.memory_space<vmem>>, vector<8x8xf32>
    %347 = vector.broadcast %342 : vector<1x8xf32> to vector<8x8xf32>
    %348 = arith.mulf %347, %346 : vector<8x8xf32>
    %349 = arith.addf %339, %348 : vector<8x8xf32>
    %c2_i32_162 = arith.constant 2 : i32
    %c32_i32_163 = arith.constant 32 : i32
    %350 = arith.addi %c32_i32_163, %c2_i32_162 : i32
    %351 = arith.index_cast %350 : i32 to index
    %c0_164 = arith.constant 0 : index
    %352 = vector.load %arg3[%351, %c0_164] : memref<128x8xf32, #tpu.memory_space<vmem>>, vector<1x8xf32>
    %c8_i32_165 = arith.constant 8 : i32
    %353 = arith.muli %c2_i32_162, %c8_i32_165 : i32
    %354 = tpu.assume_multiple %353, 8 : i32
    %355 = arith.index_cast %354 : i32 to index
    %c0_166 = arith.constant 0 : index
    %356 = vector.load %arg3[%355, %c0_166] : memref<128x8xf32, #tpu.memory_space<vmem>>, vector<8x8xf32>
    %357 = vector.broadcast %352 : vector<1x8xf32> to vector<8x8xf32>
    %358 = arith.mulf %357, %356 : vector<8x8xf32>
    %359 = arith.addf %349, %358 : vector<8x8xf32>
    %c3_i32_167 = arith.constant 3 : i32
    %c32_i32_168 = arith.constant 32 : i32
    %360 = arith.addi %c32_i32_168, %c3_i32_167 : i32
    %361 = arith.index_cast %360 : i32 to index
    %c0_169 = arith.constant 0 : index
    %362 = vector.load %arg3[%361, %c0_169] : memref<128x8xf32, #tpu.memory_space<vmem>>, vector<1x8xf32>
    %c8_i32_170 = arith.constant 8 : i32
    %363 = arith.muli %c3_i32_167, %c8_i32_170 : i32
    %364 = tpu.assume_multiple %363, 8 : i32
    %365 = arith.index_cast %364 : i32 to index
    %c0_171 = arith.constant 0 : index
    %366 = vector.load %arg3[%365, %c0_171] : memref<128x8xf32, #tpu.memory_space<vmem>>, vector<8x8xf32>
    %367 = vector.broadcast %362 : vector<1x8xf32> to vector<8x8xf32>
    %368 = arith.mulf %367, %366 : vector<8x8xf32>
    %369 = arith.addf %359, %368 : vector<8x8xf32>
    %c4_i32_172 = arith.constant 4 : i32
    %c32_i32_173 = arith.constant 32 : i32
    %370 = arith.addi %c32_i32_173, %c4_i32_172 : i32
    %371 = arith.index_cast %370 : i32 to index
    %c0_174 = arith.constant 0 : index
    %372 = vector.load %arg3[%371, %c0_174] : memref<128x8xf32, #tpu.memory_space<vmem>>, vector<1x8xf32>
    %c8_i32_175 = arith.constant 8 : i32
    %373 = arith.muli %c4_i32_172, %c8_i32_175 : i32
    %374 = tpu.assume_multiple %373, 8 : i32
    %375 = arith.index_cast %374 : i32 to index
    %c0_176 = arith.constant 0 : index
    %376 = vector.load %arg3[%375, %c0_176] : memref<128x8xf32, #tpu.memory_space<vmem>>, vector<8x8xf32>
    %377 = vector.broadcast %372 : vector<1x8xf32> to vector<8x8xf32>
    %378 = arith.mulf %377, %376 : vector<8x8xf32>
    %379 = arith.addf %369, %378 : vector<8x8xf32>
    %c5_i32_177 = arith.constant 5 : i32
    %c32_i32_178 = arith.constant 32 : i32
    %380 = arith.addi %c32_i32_178, %c5_i32_177 : i32
    %381 = arith.index_cast %380 : i32 to index
    %c0_179 = arith.constant 0 : index
    %382 = vector.load %arg3[%381, %c0_179] : memref<128x8xf32, #tpu.memory_space<vmem>>, vector<1x8xf32>
    %c8_i32_180 = arith.constant 8 : i32
    %383 = arith.muli %c5_i32_177, %c8_i32_180 : i32
    %384 = tpu.assume_multiple %383, 8 : i32
    %385 = arith.index_cast %384 : i32 to index
    %c0_181 = arith.constant 0 : index
    %386 = vector.load %arg3[%385, %c0_181] : memref<128x8xf32, #tpu.memory_space<vmem>>, vector<8x8xf32>
    %387 = vector.broadcast %382 : vector<1x8xf32> to vector<8x8xf32>
    %388 = arith.mulf %387, %386 : vector<8x8xf32>
    %389 = arith.addf %379, %388 : vector<8x8xf32>
    %c6_i32_182 = arith.constant 6 : i32
    %c32_i32_183 = arith.constant 32 : i32
    %390 = arith.addi %c32_i32_183, %c6_i32_182 : i32
    %391 = arith.index_cast %390 : i32 to index
    %c0_184 = arith.constant 0 : index
    %392 = vector.load %arg3[%391, %c0_184] : memref<128x8xf32, #tpu.memory_space<vmem>>, vector<1x8xf32>
    %c8_i32_185 = arith.constant 8 : i32
    %393 = arith.muli %c6_i32_182, %c8_i32_185 : i32
    %394 = tpu.assume_multiple %393, 8 : i32
    %395 = arith.index_cast %394 : i32 to index
    %c0_186 = arith.constant 0 : index
    %396 = vector.load %arg3[%395, %c0_186] : memref<128x8xf32, #tpu.memory_space<vmem>>, vector<8x8xf32>
    %397 = vector.broadcast %392 : vector<1x8xf32> to vector<8x8xf32>
    %398 = arith.mulf %397, %396 : vector<8x8xf32>
    %399 = arith.addf %389, %398 : vector<8x8xf32>
    %c7_i32_187 = arith.constant 7 : i32
    %c32_i32_188 = arith.constant 32 : i32
    %400 = arith.addi %c32_i32_188, %c7_i32_187 : i32
    %401 = arith.index_cast %400 : i32 to index
    %c0_189 = arith.constant 0 : index
    %402 = vector.load %arg3[%401, %c0_189] : memref<128x8xf32, #tpu.memory_space<vmem>>, vector<1x8xf32>
    %c8_i32_190 = arith.constant 8 : i32
    %403 = arith.muli %c7_i32_187, %c8_i32_190 : i32
    %404 = tpu.assume_multiple %403, 8 : i32
    %405 = arith.index_cast %404 : i32 to index
    %c0_191 = arith.constant 0 : index
    %406 = vector.load %arg3[%405, %c0_191] : memref<128x8xf32, #tpu.memory_space<vmem>>, vector<8x8xf32>
    %407 = vector.broadcast %402 : vector<1x8xf32> to vector<8x8xf32>
    %408 = arith.mulf %407, %406 : vector<8x8xf32>
    %409 = arith.addf %399, %408 : vector<8x8xf32>
    %c8_i32_192 = arith.constant 8 : i32
    %c32_i32_193 = arith.constant 32 : i32
    %410 = arith.addi %c32_i32_193, %c8_i32_192 : i32
    %411 = arith.index_cast %410 : i32 to index
    %c0_194 = arith.constant 0 : index
    %412 = vector.load %arg3[%411, %c0_194] : memref<128x8xf32, #tpu.memory_space<vmem>>, vector<1x8xf32>
    %c8_i32_195 = arith.constant 8 : i32
    %413 = arith.muli %c8_i32_192, %c8_i32_195 : i32
    %414 = tpu.assume_multiple %413, 8 : i32
    %415 = arith.index_cast %414 : i32 to index
    %c0_196 = arith.constant 0 : index
    %416 = vector.load %arg3[%415, %c0_196] : memref<128x8xf32, #tpu.memory_space<vmem>>, vector<8x8xf32>
    %417 = vector.broadcast %412 : vector<1x8xf32> to vector<8x8xf32>
    %418 = arith.mulf %417, %416 : vector<8x8xf32>
    %419 = arith.addf %409, %418 : vector<8x8xf32>
    %c9_i32_197 = arith.constant 9 : i32
    %c32_i32_198 = arith.constant 32 : i32
    %420 = arith.addi %c32_i32_198, %c9_i32_197 : i32
    %421 = arith.index_cast %420 : i32 to index
    %c0_199 = arith.constant 0 : index
    %422 = vector.load %arg3[%421, %c0_199] : memref<128x8xf32, #tpu.memory_space<vmem>>, vector<1x8xf32>
    %c8_i32_200 = arith.constant 8 : i32
    %423 = arith.muli %c9_i32_197, %c8_i32_200 : i32
    %424 = tpu.assume_multiple %423, 8 : i32
    %425 = arith.index_cast %424 : i32 to index
    %c0_201 = arith.constant 0 : index
    %426 = vector.load %arg3[%425, %c0_201] : memref<128x8xf32, #tpu.memory_space<vmem>>, vector<8x8xf32>
    %427 = vector.broadcast %422 : vector<1x8xf32> to vector<8x8xf32>
    %428 = arith.mulf %427, %426 : vector<8x8xf32>
    %429 = arith.addf %419, %428 : vector<8x8xf32>
    %c10_i32_202 = arith.constant 10 : i32
    %c32_i32_203 = arith.constant 32 : i32
    %430 = arith.addi %c32_i32_203, %c10_i32_202 : i32
    %431 = arith.index_cast %430 : i32 to index
    %c0_204 = arith.constant 0 : index
    %432 = vector.load %arg3[%431, %c0_204] : memref<128x8xf32, #tpu.memory_space<vmem>>, vector<1x8xf32>
    %c8_i32_205 = arith.constant 8 : i32
    %433 = arith.muli %c10_i32_202, %c8_i32_205 : i32
    %434 = tpu.assume_multiple %433, 8 : i32
    %435 = arith.index_cast %434 : i32 to index
    %c0_206 = arith.constant 0 : index
    %436 = vector.load %arg3[%435, %c0_206] : memref<128x8xf32, #tpu.memory_space<vmem>>, vector<8x8xf32>
    %437 = vector.broadcast %432 : vector<1x8xf32> to vector<8x8xf32>
    %438 = arith.mulf %437, %436 : vector<8x8xf32>
    %439 = arith.addf %429, %438 : vector<8x8xf32>
    %c11_i32_207 = arith.constant 11 : i32
    %c32_i32_208 = arith.constant 32 : i32
    %440 = arith.addi %c32_i32_208, %c11_i32_207 : i32
    %441 = arith.index_cast %440 : i32 to index
    %c0_209 = arith.constant 0 : index
    %442 = vector.load %arg3[%441, %c0_209] : memref<128x8xf32, #tpu.memory_space<vmem>>, vector<1x8xf32>
    %c8_i32_210 = arith.constant 8 : i32
    %443 = arith.muli %c11_i32_207, %c8_i32_210 : i32
    %444 = tpu.assume_multiple %443, 8 : i32
    %445 = arith.index_cast %444 : i32 to index
    %c0_211 = arith.constant 0 : index
    %446 = vector.load %arg3[%445, %c0_211] : memref<128x8xf32, #tpu.memory_space<vmem>>, vector<8x8xf32>
    %447 = vector.broadcast %442 : vector<1x8xf32> to vector<8x8xf32>
    %448 = arith.mulf %447, %446 : vector<8x8xf32>
    %449 = arith.addf %439, %448 : vector<8x8xf32>
    %c12_i32_212 = arith.constant 12 : i32
    %c32_i32_213 = arith.constant 32 : i32
    %450 = arith.addi %c32_i32_213, %c12_i32_212 : i32
    %451 = arith.index_cast %450 : i32 to index
    %c0_214 = arith.constant 0 : index
    %452 = vector.load %arg3[%451, %c0_214] : memref<128x8xf32, #tpu.memory_space<vmem>>, vector<1x8xf32>
    %c8_i32_215 = arith.constant 8 : i32
    %453 = arith.muli %c12_i32_212, %c8_i32_215 : i32
    %454 = tpu.assume_multiple %453, 8 : i32
    %455 = arith.index_cast %454 : i32 to index
    %c0_216 = arith.constant 0 : index
    %456 = vector.load %arg3[%455, %c0_216] : memref<128x8xf32, #tpu.memory_space<vmem>>, vector<8x8xf32>
    %457 = vector.broadcast %452 : vector<1x8xf32> to vector<8x8xf32>
    %458 = arith.mulf %457, %456 : vector<8x8xf32>
    %459 = arith.addf %449, %458 : vector<8x8xf32>
    %c13_i32_217 = arith.constant 13 : i32
    %c32_i32_218 = arith.constant 32 : i32
    %460 = arith.addi %c32_i32_218, %c13_i32_217 : i32
    %461 = arith.index_cast %460 : i32 to index
    %c0_219 = arith.constant 0 : index
    %462 = vector.load %arg3[%461, %c0_219] : memref<128x8xf32, #tpu.memory_space<vmem>>, vector<1x8xf32>
    %c8_i32_220 = arith.constant 8 : i32
    %463 = arith.muli %c13_i32_217, %c8_i32_220 : i32
    %464 = tpu.assume_multiple %463, 8 : i32
    %465 = arith.index_cast %464 : i32 to index
    %c0_221 = arith.constant 0 : index
    %466 = vector.load %arg3[%465, %c0_221] : memref<128x8xf32, #tpu.memory_space<vmem>>, vector<8x8xf32>
    %467 = vector.broadcast %462 : vector<1x8xf32> to vector<8x8xf32>
    %468 = arith.mulf %467, %466 : vector<8x8xf32>
    %469 = arith.addf %459, %468 : vector<8x8xf32>
    %c14_i32_222 = arith.constant 14 : i32
    %c32_i32_223 = arith.constant 32 : i32
    %470 = arith.addi %c32_i32_223, %c14_i32_222 : i32
    %471 = arith.index_cast %470 : i32 to index
    %c0_224 = arith.constant 0 : index
    %472 = vector.load %arg3[%471, %c0_224] : memref<128x8xf32, #tpu.memory_space<vmem>>, vector<1x8xf32>
    %c8_i32_225 = arith.constant 8 : i32
    %473 = arith.muli %c14_i32_222, %c8_i32_225 : i32
    %474 = tpu.assume_multiple %473, 8 : i32
    %475 = arith.index_cast %474 : i32 to index
    %c0_226 = arith.constant 0 : index
    %476 = vector.load %arg3[%475, %c0_226] : memref<128x8xf32, #tpu.memory_space<vmem>>, vector<8x8xf32>
    %477 = vector.broadcast %472 : vector<1x8xf32> to vector<8x8xf32>
    %478 = arith.mulf %477, %476 : vector<8x8xf32>
    %479 = arith.addf %469, %478 : vector<8x8xf32>
    %c15_i32_227 = arith.constant 15 : i32
    %c32_i32_228 = arith.constant 32 : i32
    %480 = arith.addi %c32_i32_228, %c15_i32_227 : i32
    %481 = arith.index_cast %480 : i32 to index
    %c0_229 = arith.constant 0 : index
    %482 = vector.load %arg3[%481, %c0_229] : memref<128x8xf32, #tpu.memory_space<vmem>>, vector<1x8xf32>
    %c8_i32_230 = arith.constant 8 : i32
    %483 = arith.muli %c15_i32_227, %c8_i32_230 : i32
    %484 = tpu.assume_multiple %483, 8 : i32
    %485 = arith.index_cast %484 : i32 to index
    %c0_231 = arith.constant 0 : index
    %486 = vector.load %arg3[%485, %c0_231] : memref<128x8xf32, #tpu.memory_space<vmem>>, vector<8x8xf32>
    %487 = vector.broadcast %482 : vector<1x8xf32> to vector<8x8xf32>
    %488 = arith.mulf %487, %486 : vector<8x8xf32>
    %489 = arith.addf %479, %488 : vector<8x8xf32>
    %c16_i32_232 = arith.constant 16 : i32
    %490 = vector.extract_strided_slice %489 {offsets = [0, 0], sizes = [3, 8], strides = [1, 1]} : vector<8x8xf32> to vector<3x8xf32>
    %c3 = arith.constant 3 : index
    %c0_233 = arith.constant 0 : index
    %491 = vector.load %arg4[%c3, %c0_233] : memref<40x8xf32, #tpu.memory_space<vmem>>, vector<3x8xf32>
    tpu.vector_store %arg4[%c3, %c0_233], %490 {strides = array<i32>} : memref<40x8xf32, #tpu.memory_space<vmem>>, vector<3x8xf32>,
    %cst_234 = arith.constant 0.000000e+00 : f32
    %492 = vector.broadcast %cst_234 : f32 to vector<8x8xf32>
    %c0_i32_235 = arith.constant 0 : i32
    %c48_i32 = arith.constant 48 : i32
    %493 = arith.addi %c48_i32, %c0_i32_235 : i32
    %494 = arith.index_cast %493 : i32 to index
    %c0_236 = arith.constant 0 : index
    %495 = vector.load %arg3[%494, %c0_236] : memref<128x8xf32, #tpu.memory_space<vmem>>, vector<1x8xf32>
    %c8_i32_237 = arith.constant 8 : i32
    %496 = arith.muli %c0_i32_235, %c8_i32_237 : i32
    %497 = tpu.assume_multiple %496, 8 : i32
    %498 = arith.index_cast %497 : i32 to index
    %c0_238 = arith.constant 0 : index
    %499 = vector.load %arg3[%498, %c0_238] : memref<128x8xf32, #tpu.memory_space<vmem>>, vector<8x8xf32>
    %500 = vector.broadcast %495 : vector<1x8xf32> to vector<8x8xf32>
    %501 = arith.mulf %500, %499 : vector<8x8xf32>
    %502 = arith.addf %492, %501 : vector<8x8xf32>
    %c1_i32_239 = arith.constant 1 : i32
    %c48_i32_240 = arith.constant 48 : i32
    %503 = arith.addi %c48_i32_240, %c1_i32_239 : i32
    %504 = arith.index_cast %503 : i32 to index
    %c0_241 = arith.constant 0 : index
    %505 = vector.load %arg3[%504, %c0_241] : memref<128x8xf32, #tpu.memory_space<vmem>>, vector<1x8xf32>
    %c8_i32_242 = arith.constant 8 : i32
    %506 = arith.muli %c1_i32_239, %c8_i32_242 : i32
    %507 = tpu.assume_multiple %506, 8 : i32
    %508 = arith.index_cast %507 : i32 to index
    %c0_243 = arith.constant 0 : index
    %509 = vector.load %arg3[%508, %c0_243] : memref<128x8xf32, #tpu.memory_space<vmem>>, vector<8x8xf32>
    %510 = vector.broadcast %505 : vector<1x8xf32> to vector<8x8xf32>
    %511 = arith.mulf %510, %509 : vector<8x8xf32>
    %512 = arith.addf %502, %511 : vector<8x8xf32>
    %c2_i32_244 = arith.constant 2 : i32
    %c48_i32_245 = arith.constant 48 : i32
    %513 = arith.addi %c48_i32_245, %c2_i32_244 : i32
    %514 = arith.index_cast %513 : i32 to index
    %c0_246 = arith.constant 0 : index
    %515 = vector.load %arg3[%514, %c0_246] : memref<128x8xf32, #tpu.memory_space<vmem>>, vector<1x8xf32>
    %c8_i32_247 = arith.constant 8 : i32
    %516 = arith.muli %c2_i32_244, %c8_i32_247 : i32
    %517 = tpu.assume_multiple %516, 8 : i32
    %518 = arith.index_cast %517 : i32 to index
    %c0_248 = arith.constant 0 : index
    %519 = vector.load %arg3[%518, %c0_248] : memref<128x8xf32, #tpu.memory_space<vmem>>, vector<8x8xf32>
    %520 = vector.broadcast %515 : vector<1x8xf32> to vector<8x8xf32>
    %521 = arith.mulf %520, %519 : vector<8x8xf32>
    %522 = arith.addf %512, %521 : vector<8x8xf32>
    %c3_i32_249 = arith.constant 3 : i32
    %c48_i32_250 = arith.constant 48 : i32
    %523 = arith.addi %c48_i32_250, %c3_i32_249 : i32
    %524 = arith.index_cast %523 : i32 to index
    %c0_251 = arith.constant 0 : index
    %525 = vector.load %arg3[%524, %c0_251] : memref<128x8xf32, #tpu.memory_space<vmem>>, vector<1x8xf32>
    %c8_i32_252 = arith.constant 8 : i32
    %526 = arith.muli %c3_i32_249, %c8_i32_252 : i32
    %527 = tpu.assume_multiple %526, 8 : i32
    %528 = arith.index_cast %527 : i32 to index
    %c0_253 = arith.constant 0 : index
    %529 = vector.load %arg3[%528, %c0_253] : memref<128x8xf32, #tpu.memory_space<vmem>>, vector<8x8xf32>
    %530 = vector.broadcast %525 : vector<1x8xf32> to vector<8x8xf32>
    %531 = arith.mulf %530, %529 : vector<8x8xf32>
    %532 = arith.addf %522, %531 : vector<8x8xf32>
    %c4_i32_254 = arith.constant 4 : i32
    %c48_i32_255 = arith.constant 48 : i32
    %533 = arith.addi %c48_i32_255, %c4_i32_254 : i32
    %534 = arith.index_cast %533 : i32 to index
    %c0_256 = arith.constant 0 : index
    %535 = vector.load %arg3[%534, %c0_256] : memref<128x8xf32, #tpu.memory_space<vmem>>, vector<1x8xf32>
    %c8_i32_257 = arith.constant 8 : i32
    %536 = arith.muli %c4_i32_254, %c8_i32_257 : i32
    %537 = tpu.assume_multiple %536, 8 : i32
    %538 = arith.index_cast %537 : i32 to index
    %c0_258 = arith.constant 0 : index
    %539 = vector.load %arg3[%538, %c0_258] : memref<128x8xf32, #tpu.memory_space<vmem>>, vector<8x8xf32>
    %540 = vector.broadcast %535 : vector<1x8xf32> to vector<8x8xf32>
    %541 = arith.mulf %540, %539 : vector<8x8xf32>
    %542 = arith.addf %532, %541 : vector<8x8xf32>
    %c5_i32_259 = arith.constant 5 : i32
    %c48_i32_260 = arith.constant 48 : i32
    %543 = arith.addi %c48_i32_260, %c5_i32_259 : i32
    %544 = arith.index_cast %543 : i32 to index
    %c0_261 = arith.constant 0 : index
    %545 = vector.load %arg3[%544, %c0_261] : memref<128x8xf32, #tpu.memory_space<vmem>>, vector<1x8xf32>
    %c8_i32_262 = arith.constant 8 : i32
    %546 = arith.muli %c5_i32_259, %c8_i32_262 : i32
    %547 = tpu.assume_multiple %546, 8 : i32
    %548 = arith.index_cast %547 : i32 to index
    %c0_263 = arith.constant 0 : index
    %549 = vector.load %arg3[%548, %c0_263] : memref<128x8xf32, #tpu.memory_space<vmem>>, vector<8x8xf32>
    %550 = vector.broadcast %545 : vector<1x8xf32> to vector<8x8xf32>
    %551 = arith.mulf %550, %549 : vector<8x8xf32>
    %552 = arith.addf %542, %551 : vector<8x8xf32>
    %c6_i32_264 = arith.constant 6 : i32
    %c48_i32_265 = arith.constant 48 : i32
    %553 = arith.addi %c48_i32_265, %c6_i32_264 : i32
    %554 = arith.index_cast %553 : i32 to index
    %c0_266 = arith.constant 0 : index
    %555 = vector.load %arg3[%554, %c0_266] : memref<128x8xf32, #tpu.memory_space<vmem>>, vector<1x8xf32>
    %c8_i32_267 = arith.constant 8 : i32
    %556 = arith.muli %c6_i32_264, %c8_i32_267 : i32
    %557 = tpu.assume_multiple %556, 8 : i32
    %558 = arith.index_cast %557 : i32 to index
    %c0_268 = arith.constant 0 : index
    %559 = vector.load %arg3[%558, %c0_268] : memref<128x8xf32, #tpu.memory_space<vmem>>, vector<8x8xf32>
    %560 = vector.broadcast %555 : vector<1x8xf32> to vector<8x8xf32>
    %561 = arith.mulf %560, %559 : vector<8x8xf32>
    %562 = arith.addf %552, %561 : vector<8x8xf32>
    %c7_i32_269 = arith.constant 7 : i32
    %c48_i32_270 = arith.constant 48 : i32
    %563 = arith.addi %c48_i32_270, %c7_i32_269 : i32
    %564 = arith.index_cast %563 : i32 to index
    %c0_271 = arith.constant 0 : index
    %565 = vector.load %arg3[%564, %c0_271] : memref<128x8xf32, #tpu.memory_space<vmem>>, vector<1x8xf32>
    %c8_i32_272 = arith.constant 8 : i32
    %566 = arith.muli %c7_i32_269, %c8_i32_272 : i32
    %567 = tpu.assume_multiple %566, 8 : i32
    %568 = arith.index_cast %567 : i32 to index
    %c0_273 = arith.constant 0 : index
    %569 = vector.load %arg3[%568, %c0_273] : memref<128x8xf32, #tpu.memory_space<vmem>>, vector<8x8xf32>
    %570 = vector.broadcast %565 : vector<1x8xf32> to vector<8x8xf32>
    %571 = arith.mulf %570, %569 : vector<8x8xf32>
    %572 = arith.addf %562, %571 : vector<8x8xf32>
    %c8_i32_274 = arith.constant 8 : i32
    %c48_i32_275 = arith.constant 48 : i32
    %573 = arith.addi %c48_i32_275, %c8_i32_274 : i32
    %574 = arith.index_cast %573 : i32 to index
    %c0_276 = arith.constant 0 : index
    %575 = vector.load %arg3[%574, %c0_276] : memref<128x8xf32, #tpu.memory_space<vmem>>, vector<1x8xf32>
    %c8_i32_277 = arith.constant 8 : i32
    %576 = arith.muli %c8_i32_274, %c8_i32_277 : i32
    %577 = tpu.assume_multiple %576, 8 : i32
    %578 = arith.index_cast %577 : i32 to index
    %c0_278 = arith.constant 0 : index
    %579 = vector.load %arg3[%578, %c0_278] : memref<128x8xf32, #tpu.memory_space<vmem>>, vector<8x8xf32>
    %580 = vector.broadcast %575 : vector<1x8xf32> to vector<8x8xf32>
    %581 = arith.mulf %580, %579 : vector<8x8xf32>
    %582 = arith.addf %572, %581 : vector<8x8xf32>
    %c9_i32_279 = arith.constant 9 : i32
    %c48_i32_280 = arith.constant 48 : i32
    %583 = arith.addi %c48_i32_280, %c9_i32_279 : i32
    %584 = arith.index_cast %583 : i32 to index
    %c0_281 = arith.constant 0 : index
    %585 = vector.load %arg3[%584, %c0_281] : memref<128x8xf32, #tpu.memory_space<vmem>>, vector<1x8xf32>
    %c8_i32_282 = arith.constant 8 : i32
    %586 = arith.muli %c9_i32_279, %c8_i32_282 : i32
    %587 = tpu.assume_multiple %586, 8 : i32
    %588 = arith.index_cast %587 : i32 to index
    %c0_283 = arith.constant 0 : index
    %589 = vector.load %arg3[%588, %c0_283] : memref<128x8xf32, #tpu.memory_space<vmem>>, vector<8x8xf32>
    %590 = vector.broadcast %585 : vector<1x8xf32> to vector<8x8xf32>
    %591 = arith.mulf %590, %589 : vector<8x8xf32>
    %592 = arith.addf %582, %591 : vector<8x8xf32>
    %c10_i32_284 = arith.constant 10 : i32
    %c48_i32_285 = arith.constant 48 : i32
    %593 = arith.addi %c48_i32_285, %c10_i32_284 : i32
    %594 = arith.index_cast %593 : i32 to index
    %c0_286 = arith.constant 0 : index
    %595 = vector.load %arg3[%594, %c0_286] : memref<128x8xf32, #tpu.memory_space<vmem>>, vector<1x8xf32>
    %c8_i32_287 = arith.constant 8 : i32
    %596 = arith.muli %c10_i32_284, %c8_i32_287 : i32
    %597 = tpu.assume_multiple %596, 8 : i32
    %598 = arith.index_cast %597 : i32 to index
    %c0_288 = arith.constant 0 : index
    %599 = vector.load %arg3[%598, %c0_288] : memref<128x8xf32, #tpu.memory_space<vmem>>, vector<8x8xf32>
    %600 = vector.broadcast %595 : vector<1x8xf32> to vector<8x8xf32>
    %601 = arith.mulf %600, %599 : vector<8x8xf32>
    %602 = arith.addf %592, %601 : vector<8x8xf32>
    %c11_i32_289 = arith.constant 11 : i32
    %c48_i32_290 = arith.constant 48 : i32
    %603 = arith.addi %c48_i32_290, %c11_i32_289 : i32
    %604 = arith.index_cast %603 : i32 to index
    %c0_291 = arith.constant 0 : index
    %605 = vector.load %arg3[%604, %c0_291] : memref<128x8xf32, #tpu.memory_space<vmem>>, vector<1x8xf32>
    %c8_i32_292 = arith.constant 8 : i32
    %606 = arith.muli %c11_i32_289, %c8_i32_292 : i32
    %607 = tpu.assume_multiple %606, 8 : i32
    %608 = arith.index_cast %607 : i32 to index
    %c0_293 = arith.constant 0 : index
    %609 = vector.load %arg3[%608, %c0_293] : memref<128x8xf32, #tpu.memory_space<vmem>>, vector<8x8xf32>
    %610 = vector.broadcast %605 : vector<1x8xf32> to vector<8x8xf32>
    %611 = arith.mulf %610, %609 : vector<8x8xf32>
    %612 = arith.addf %602, %611 : vector<8x8xf32>
    %c12_i32_294 = arith.constant 12 : i32
    %c48_i32_295 = arith.constant 48 : i32
    %613 = arith.addi %c48_i32_295, %c12_i32_294 : i32
    %614 = arith.index_cast %613 : i32 to index
    %c0_296 = arith.constant 0 : index
    %615 = vector.load %arg3[%614, %c0_296] : memref<128x8xf32, #tpu.memory_space<vmem>>, vector<1x8xf32>
    %c8_i32_297 = arith.constant 8 : i32
    %616 = arith.muli %c12_i32_294, %c8_i32_297 : i32
    %617 = tpu.assume_multiple %616, 8 : i32
    %618 = arith.index_cast %617 : i32 to index
    %c0_298 = arith.constant 0 : index
    %619 = vector.load %arg3[%618, %c0_298] : memref<128x8xf32, #tpu.memory_space<vmem>>, vector<8x8xf32>
    %620 = vector.broadcast %615 : vector<1x8xf32> to vector<8x8xf32>
    %621 = arith.mulf %620, %619 : vector<8x8xf32>
    %622 = arith.addf %612, %621 : vector<8x8xf32>
    %c13_i32_299 = arith.constant 13 : i32
    %c48_i32_300 = arith.constant 48 : i32
    %623 = arith.addi %c48_i32_300, %c13_i32_299 : i32
    %624 = arith.index_cast %623 : i32 to index
    %c0_301 = arith.constant 0 : index
    %625 = vector.load %arg3[%624, %c0_301] : memref<128x8xf32, #tpu.memory_space<vmem>>, vector<1x8xf32>
    %c8_i32_302 = arith.constant 8 : i32
    %626 = arith.muli %c13_i32_299, %c8_i32_302 : i32
    %627 = tpu.assume_multiple %626, 8 : i32
    %628 = arith.index_cast %627 : i32 to index
    %c0_303 = arith.constant 0 : index
    %629 = vector.load %arg3[%628, %c0_303] : memref<128x8xf32, #tpu.memory_space<vmem>>, vector<8x8xf32>
    %630 = vector.broadcast %625 : vector<1x8xf32> to vector<8x8xf32>
    %631 = arith.mulf %630, %629 : vector<8x8xf32>
    %632 = arith.addf %622, %631 : vector<8x8xf32>
    %c14_i32_304 = arith.constant 14 : i32
    %c48_i32_305 = arith.constant 48 : i32
    %633 = arith.addi %c48_i32_305, %c14_i32_304 : i32
    %634 = arith.index_cast %633 : i32 to index
    %c0_306 = arith.constant 0 : index
    %635 = vector.load %arg3[%634, %c0_306] : memref<128x8xf32, #tpu.memory_space<vmem>>, vector<1x8xf32>
    %c8_i32_307 = arith.constant 8 : i32
    %636 = arith.muli %c14_i32_304, %c8_i32_307 : i32
    %637 = tpu.assume_multiple %636, 8 : i32
    %638 = arith.index_cast %637 : i32 to index
    %c0_308 = arith.constant 0 : index
    %639 = vector.load %arg3[%638, %c0_308] : memref<128x8xf32, #tpu.memory_space<vmem>>, vector<8x8xf32>
    %640 = vector.broadcast %635 : vector<1x8xf32> to vector<8x8xf32>
    %641 = arith.mulf %640, %639 : vector<8x8xf32>
    %642 = arith.addf %632, %641 : vector<8x8xf32>
    %c15_i32_309 = arith.constant 15 : i32
    %c48_i32_310 = arith.constant 48 : i32
    %643 = arith.addi %c48_i32_310, %c15_i32_309 : i32
    %644 = arith.index_cast %643 : i32 to index
    %c0_311 = arith.constant 0 : index
    %645 = vector.load %arg3[%644, %c0_311] : memref<128x8xf32, #tpu.memory_space<vmem>>, vector<1x8xf32>
    %c8_i32_312 = arith.constant 8 : i32
    %646 = arith.muli %c15_i32_309, %c8_i32_312 : i32
    %647 = tpu.assume_multiple %646, 8 : i32
    %648 = arith.index_cast %647 : i32 to index
    %c0_313 = arith.constant 0 : index
    %649 = vector.load %arg3[%648, %c0_313] : memref<128x8xf32, #tpu.memory_space<vmem>>, vector<8x8xf32>
    %650 = vector.broadcast %645 : vector<1x8xf32> to vector<8x8xf32>
    %651 = arith.mulf %650, %649 : vector<8x8xf32>
    %652 = arith.addf %642, %651 : vector<8x8xf32>
    %c16_i32_314 = arith.constant 16 : i32
    %653 = vector.extract_strided_slice %652 {offsets = [0, 0], sizes = [4, 8], strides = [1, 1]} : vector<8x8xf32> to vector<4x8xf32>
    %c6 = arith.constant 6 : index
    %c0_315 = arith.constant 0 : index
    %654 = vector.load %arg4[%c6, %c0_315] : memref<40x8xf32, #tpu.memory_space<vmem>>, vector<4x8xf32>
    tpu.vector_store %arg4[%c6, %c0_315], %653 {strides = array<i32>} : memref<40x8xf32, #tpu.memory_space<vmem>>, vector<4x8xf32>,
    %cst_316 = arith.constant 0.000000e+00 : f32
    %655 = vector.broadcast %cst_316 : f32 to vector<8x8xf32>
    %c0_i32_317 = arith.constant 0 : i32
    %c64_i32 = arith.constant 64 : i32
    %656 = arith.addi %c64_i32, %c0_i32_317 : i32
    %657 = arith.index_cast %656 : i32 to index
    %c0_318 = arith.constant 0 : index
    %658 = vector.load %arg3[%657, %c0_318] : memref<128x8xf32, #tpu.memory_space<vmem>>, vector<1x8xf32>
    %c8_i32_319 = arith.constant 8 : i32
    %659 = arith.muli %c0_i32_317, %c8_i32_319 : i32
    %660 = tpu.assume_multiple %659, 8 : i32
    %661 = arith.index_cast %660 : i32 to index
    %c0_320 = arith.constant 0 : index
    %662 = vector.load %arg3[%661, %c0_320] : memref<128x8xf32, #tpu.memory_space<vmem>>, vector<8x8xf32>
    %663 = vector.broadcast %658 : vector<1x8xf32> to vector<8x8xf32>
    %664 = arith.mulf %663, %662 : vector<8x8xf32>
    %665 = arith.addf %655, %664 : vector<8x8xf32>
    %c1_i32_321 = arith.constant 1 : i32
    %c64_i32_322 = arith.constant 64 : i32
    %666 = arith.addi %c64_i32_322, %c1_i32_321 : i32
    %667 = arith.index_cast %666 : i32 to index
    %c0_323 = arith.constant 0 : index
    %668 = vector.load %arg3[%667, %c0_323] : memref<128x8xf32, #tpu.memory_space<vmem>>, vector<1x8xf32>
    %c8_i32_324 = arith.constant 8 : i32
    %669 = arith.muli %c1_i32_321, %c8_i32_324 : i32
    %670 = tpu.assume_multiple %669, 8 : i32
    %671 = arith.index_cast %670 : i32 to index
    %c0_325 = arith.constant 0 : index
    %672 = vector.load %arg3[%671, %c0_325] : memref<128x8xf32, #tpu.memory_space<vmem>>, vector<8x8xf32>
    %673 = vector.broadcast %668 : vector<1x8xf32> to vector<8x8xf32>
    %674 = arith.mulf %673, %672 : vector<8x8xf32>
    %675 = arith.addf %665, %674 : vector<8x8xf32>
    %c2_i32_326 = arith.constant 2 : i32
    %c64_i32_327 = arith.constant 64 : i32
    %676 = arith.addi %c64_i32_327, %c2_i32_326 : i32
    %677 = arith.index_cast %676 : i32 to index
    %c0_328 = arith.constant 0 : index
    %678 = vector.load %arg3[%677, %c0_328] : memref<128x8xf32, #tpu.memory_space<vmem>>, vector<1x8xf32>
    %c8_i32_329 = arith.constant 8 : i32
    %679 = arith.muli %c2_i32_326, %c8_i32_329 : i32
    %680 = tpu.assume_multiple %679, 8 : i32
    %681 = arith.index_cast %680 : i32 to index
    %c0_330 = arith.constant 0 : index
    %682 = vector.load %arg3[%681, %c0_330] : memref<128x8xf32, #tpu.memory_space<vmem>>, vector<8x8xf32>
    %683 = vector.broadcast %678 : vector<1x8xf32> to vector<8x8xf32>
    %684 = arith.mulf %683, %682 : vector<8x8xf32>
    %685 = arith.addf %675, %684 : vector<8x8xf32>
    %c3_i32_331 = arith.constant 3 : i32
    %c64_i32_332 = arith.constant 64 : i32
    %686 = arith.addi %c64_i32_332, %c3_i32_331 : i32
    %687 = arith.index_cast %686 : i32 to index
    %c0_333 = arith.constant 0 : index
    %688 = vector.load %arg3[%687, %c0_333] : memref<128x8xf32, #tpu.memory_space<vmem>>, vector<1x8xf32>
    %c8_i32_334 = arith.constant 8 : i32
    %689 = arith.muli %c3_i32_331, %c8_i32_334 : i32
    %690 = tpu.assume_multiple %689, 8 : i32
    %691 = arith.index_cast %690 : i32 to index
    %c0_335 = arith.constant 0 : index
    %692 = vector.load %arg3[%691, %c0_335] : memref<128x8xf32, #tpu.memory_space<vmem>>, vector<8x8xf32>
    %693 = vector.broadcast %688 : vector<1x8xf32> to vector<8x8xf32>
    %694 = arith.mulf %693, %692 : vector<8x8xf32>
    %695 = arith.addf %685, %694 : vector<8x8xf32>
    %c4_i32_336 = arith.constant 4 : i32
    %c64_i32_337 = arith.constant 64 : i32
    %696 = arith.addi %c64_i32_337, %c4_i32_336 : i32
    %697 = arith.index_cast %696 : i32 to index
    %c0_338 = arith.constant 0 : index
    %698 = vector.load %arg3[%697, %c0_338] : memref<128x8xf32, #tpu.memory_space<vmem>>, vector<1x8xf32>
    %c8_i32_339 = arith.constant 8 : i32
    %699 = arith.muli %c4_i32_336, %c8_i32_339 : i32
    %700 = tpu.assume_multiple %699, 8 : i32
    %701 = arith.index_cast %700 : i32 to index
    %c0_340 = arith.constant 0 : index
    %702 = vector.load %arg3[%701, %c0_340] : memref<128x8xf32, #tpu.memory_space<vmem>>, vector<8x8xf32>
    %703 = vector.broadcast %698 : vector<1x8xf32> to vector<8x8xf32>
    %704 = arith.mulf %703, %702 : vector<8x8xf32>
    %705 = arith.addf %695, %704 : vector<8x8xf32>
    %c5_i32_341 = arith.constant 5 : i32
    %c64_i32_342 = arith.constant 64 : i32
    %706 = arith.addi %c64_i32_342, %c5_i32_341 : i32
    %707 = arith.index_cast %706 : i32 to index
    %c0_343 = arith.constant 0 : index
    %708 = vector.load %arg3[%707, %c0_343] : memref<128x8xf32, #tpu.memory_space<vmem>>, vector<1x8xf32>
    %c8_i32_344 = arith.constant 8 : i32
    %709 = arith.muli %c5_i32_341, %c8_i32_344 : i32
    %710 = tpu.assume_multiple %709, 8 : i32
    %711 = arith.index_cast %710 : i32 to index
    %c0_345 = arith.constant 0 : index
    %712 = vector.load %arg3[%711, %c0_345] : memref<128x8xf32, #tpu.memory_space<vmem>>, vector<8x8xf32>
    %713 = vector.broadcast %708 : vector<1x8xf32> to vector<8x8xf32>
    %714 = arith.mulf %713, %712 : vector<8x8xf32>
    %715 = arith.addf %705, %714 : vector<8x8xf32>
    %c6_i32_346 = arith.constant 6 : i32
    %c64_i32_347 = arith.constant 64 : i32
    %716 = arith.addi %c64_i32_347, %c6_i32_346 : i32
    %717 = arith.index_cast %716 : i32 to index
    %c0_348 = arith.constant 0 : index
    %718 = vector.load %arg3[%717, %c0_348] : memref<128x8xf32, #tpu.memory_space<vmem>>, vector<1x8xf32>
    %c8_i32_349 = arith.constant 8 : i32
    %719 = arith.muli %c6_i32_346, %c8_i32_349 : i32
    %720 = tpu.assume_multiple %719, 8 : i32
    %721 = arith.index_cast %720 : i32 to index
    %c0_350 = arith.constant 0 : index
    %722 = vector.load %arg3[%721, %c0_350] : memref<128x8xf32, #tpu.memory_space<vmem>>, vector<8x8xf32>
    %723 = vector.broadcast %718 : vector<1x8xf32> to vector<8x8xf32>
    %724 = arith.mulf %723, %722 : vector<8x8xf32>
    %725 = arith.addf %715, %724 : vector<8x8xf32>
    %c7_i32_351 = arith.constant 7 : i32
    %c64_i32_352 = arith.constant 64 : i32
    %726 = arith.addi %c64_i32_352, %c7_i32_351 : i32
    %727 = arith.index_cast %726 : i32 to index
    %c0_353 = arith.constant 0 : index
    %728 = vector.load %arg3[%727, %c0_353] : memref<128x8xf32, #tpu.memory_space<vmem>>, vector<1x8xf32>
    %c8_i32_354 = arith.constant 8 : i32
    %729 = arith.muli %c7_i32_351, %c8_i32_354 : i32
    %730 = tpu.assume_multiple %729, 8 : i32
    %731 = arith.index_cast %730 : i32 to index
    %c0_355 = arith.constant 0 : index
    %732 = vector.load %arg3[%731, %c0_355] : memref<128x8xf32, #tpu.memory_space<vmem>>, vector<8x8xf32>
    %733 = vector.broadcast %728 : vector<1x8xf32> to vector<8x8xf32>
    %734 = arith.mulf %733, %732 : vector<8x8xf32>
    %735 = arith.addf %725, %734 : vector<8x8xf32>
    %c8_i32_356 = arith.constant 8 : i32
    %c64_i32_357 = arith.constant 64 : i32
    %736 = arith.addi %c64_i32_357, %c8_i32_356 : i32
    %737 = arith.index_cast %736 : i32 to index
    %c0_358 = arith.constant 0 : index
    %738 = vector.load %arg3[%737, %c0_358] : memref<128x8xf32, #tpu.memory_space<vmem>>, vector<1x8xf32>
    %c8_i32_359 = arith.constant 8 : i32
    %739 = arith.muli %c8_i32_356, %c8_i32_359 : i32
    %740 = tpu.assume_multiple %739, 8 : i32
    %741 = arith.index_cast %740 : i32 to index
    %c0_360 = arith.constant 0 : index
    %742 = vector.load %arg3[%741, %c0_360] : memref<128x8xf32, #tpu.memory_space<vmem>>, vector<8x8xf32>
    %743 = vector.broadcast %738 : vector<1x8xf32> to vector<8x8xf32>
    %744 = arith.mulf %743, %742 : vector<8x8xf32>
    %745 = arith.addf %735, %744 : vector<8x8xf32>
    %c9_i32_361 = arith.constant 9 : i32
    %c64_i32_362 = arith.constant 64 : i32
    %746 = arith.addi %c64_i32_362, %c9_i32_361 : i32
    %747 = arith.index_cast %746 : i32 to index
    %c0_363 = arith.constant 0 : index
    %748 = vector.load %arg3[%747, %c0_363] : memref<128x8xf32, #tpu.memory_space<vmem>>, vector<1x8xf32>
    %c8_i32_364 = arith.constant 8 : i32
    %749 = arith.muli %c9_i32_361, %c8_i32_364 : i32
    %750 = tpu.assume_multiple %749, 8 : i32
    %751 = arith.index_cast %750 : i32 to index
    %c0_365 = arith.constant 0 : index
    %752 = vector.load %arg3[%751, %c0_365] : memref<128x8xf32, #tpu.memory_space<vmem>>, vector<8x8xf32>
    %753 = vector.broadcast %748 : vector<1x8xf32> to vector<8x8xf32>
    %754 = arith.mulf %753, %752 : vector<8x8xf32>
    %755 = arith.addf %745, %754 : vector<8x8xf32>
    %c10_i32_366 = arith.constant 10 : i32
    %c64_i32_367 = arith.constant 64 : i32
    %756 = arith.addi %c64_i32_367, %c10_i32_366 : i32
    %757 = arith.index_cast %756 : i32 to index
    %c0_368 = arith.constant 0 : index
    %758 = vector.load %arg3[%757, %c0_368] : memref<128x8xf32, #tpu.memory_space<vmem>>, vector<1x8xf32>
    %c8_i32_369 = arith.constant 8 : i32
    %759 = arith.muli %c10_i32_366, %c8_i32_369 : i32
    %760 = tpu.assume_multiple %759, 8 : i32
    %761 = arith.index_cast %760 : i32 to index
    %c0_370 = arith.constant 0 : index
    %762 = vector.load %arg3[%761, %c0_370] : memref<128x8xf32, #tpu.memory_space<vmem>>, vector<8x8xf32>
    %763 = vector.broadcast %758 : vector<1x8xf32> to vector<8x8xf32>
    %764 = arith.mulf %763, %762 : vector<8x8xf32>
    %765 = arith.addf %755, %764 : vector<8x8xf32>
    %c11_i32_371 = arith.constant 11 : i32
    %c64_i32_372 = arith.constant 64 : i32
    %766 = arith.addi %c64_i32_372, %c11_i32_371 : i32
    %767 = arith.index_cast %766 : i32 to index
    %c0_373 = arith.constant 0 : index
    %768 = vector.load %arg3[%767, %c0_373] : memref<128x8xf32, #tpu.memory_space<vmem>>, vector<1x8xf32>
    %c8_i32_374 = arith.constant 8 : i32
    %769 = arith.muli %c11_i32_371, %c8_i32_374 : i32
    %770 = tpu.assume_multiple %769, 8 : i32
    %771 = arith.index_cast %770 : i32 to index
    %c0_375 = arith.constant 0 : index
    %772 = vector.load %arg3[%771, %c0_375] : memref<128x8xf32, #tpu.memory_space<vmem>>, vector<8x8xf32>
    %773 = vector.broadcast %768 : vector<1x8xf32> to vector<8x8xf32>
    %774 = arith.mulf %773, %772 : vector<8x8xf32>
    %775 = arith.addf %765, %774 : vector<8x8xf32>
    %c12_i32_376 = arith.constant 12 : i32
    %c64_i32_377 = arith.constant 64 : i32
    %776 = arith.addi %c64_i32_377, %c12_i32_376 : i32
    %777 = arith.index_cast %776 : i32 to index
    %c0_378 = arith.constant 0 : index
    %778 = vector.load %arg3[%777, %c0_378] : memref<128x8xf32, #tpu.memory_space<vmem>>, vector<1x8xf32>
    %c8_i32_379 = arith.constant 8 : i32
    %779 = arith.muli %c12_i32_376, %c8_i32_379 : i32
    %780 = tpu.assume_multiple %779, 8 : i32
    %781 = arith.index_cast %780 : i32 to index
    %c0_380 = arith.constant 0 : index
    %782 = vector.load %arg3[%781, %c0_380] : memref<128x8xf32, #tpu.memory_space<vmem>>, vector<8x8xf32>
    %783 = vector.broadcast %778 : vector<1x8xf32> to vector<8x8xf32>
    %784 = arith.mulf %783, %782 : vector<8x8xf32>
    %785 = arith.addf %775, %784 : vector<8x8xf32>
    %c13_i32_381 = arith.constant 13 : i32
    %c64_i32_382 = arith.constant 64 : i32
    %786 = arith.addi %c64_i32_382, %c13_i32_381 : i32
    %787 = arith.index_cast %786 : i32 to index
    %c0_383 = arith.constant 0 : index
    %788 = vector.load %arg3[%787, %c0_383] : memref<128x8xf32, #tpu.memory_space<vmem>>, vector<1x8xf32>
    %c8_i32_384 = arith.constant 8 : i32
    %789 = arith.muli %c13_i32_381, %c8_i32_384 : i32
    %790 = tpu.assume_multiple %789, 8 : i32
    %791 = arith.index_cast %790 : i32 to index
    %c0_385 = arith.constant 0 : index
    %792 = vector.load %arg3[%791, %c0_385] : memref<128x8xf32, #tpu.memory_space<vmem>>, vector<8x8xf32>
    %793 = vector.broadcast %788 : vector<1x8xf32> to vector<8x8xf32>
    %794 = arith.mulf %793, %792 : vector<8x8xf32>
    %795 = arith.addf %785, %794 : vector<8x8xf32>
    %c14_i32_386 = arith.constant 14 : i32
    %c64_i32_387 = arith.constant 64 : i32
    %796 = arith.addi %c64_i32_387, %c14_i32_386 : i32
    %797 = arith.index_cast %796 : i32 to index
    %c0_388 = arith.constant 0 : index
    %798 = vector.load %arg3[%797, %c0_388] : memref<128x8xf32, #tpu.memory_space<vmem>>, vector<1x8xf32>
    %c8_i32_389 = arith.constant 8 : i32
    %799 = arith.muli %c14_i32_386, %c8_i32_389 : i32
    %800 = tpu.assume_multiple %799, 8 : i32
    %801 = arith.index_cast %800 : i32 to index
    %c0_390 = arith.constant 0 : index
    %802 = vector.load %arg3[%801, %c0_390] : memref<128x8xf32, #tpu.memory_space<vmem>>, vector<8x8xf32>
    %803 = vector.broadcast %798 : vector<1x8xf32> to vector<8x8xf32>
    %804 = arith.mulf %803, %802 : vector<8x8xf32>
    %805 = arith.addf %795, %804 : vector<8x8xf32>
    %c15_i32_391 = arith.constant 15 : i32
    %c64_i32_392 = arith.constant 64 : i32
    %806 = arith.addi %c64_i32_392, %c15_i32_391 : i32
    %807 = arith.index_cast %806 : i32 to index
    %c0_393 = arith.constant 0 : index
    %808 = vector.load %arg3[%807, %c0_393] : memref<128x8xf32, #tpu.memory_space<vmem>>, vector<1x8xf32>
    %c8_i32_394 = arith.constant 8 : i32
    %809 = arith.muli %c15_i32_391, %c8_i32_394 : i32
    %810 = tpu.assume_multiple %809, 8 : i32
    %811 = arith.index_cast %810 : i32 to index
    %c0_395 = arith.constant 0 : index
    %812 = vector.load %arg3[%811, %c0_395] : memref<128x8xf32, #tpu.memory_space<vmem>>, vector<8x8xf32>
    %813 = vector.broadcast %808 : vector<1x8xf32> to vector<8x8xf32>
    %814 = arith.mulf %813, %812 : vector<8x8xf32>
    %815 = arith.addf %805, %814 : vector<8x8xf32>
    %c16_i32_396 = arith.constant 16 : i32
    %816 = vector.extract_strided_slice %815 {offsets = [0, 0], sizes = [5, 8], strides = [1, 1]} : vector<8x8xf32> to vector<5x8xf32>
    %c10 = arith.constant 10 : index
    %c0_397 = arith.constant 0 : index
    %817 = vector.load %arg4[%c10, %c0_397] : memref<40x8xf32, #tpu.memory_space<vmem>>, vector<5x8xf32>
    tpu.vector_store %arg4[%c10, %c0_397], %816 {strides = array<i32>} : memref<40x8xf32, #tpu.memory_space<vmem>>, vector<5x8xf32>,
    %cst_398 = arith.constant 0.000000e+00 : f32
    %818 = vector.broadcast %cst_398 : f32 to vector<8x8xf32>
    %c0_i32_399 = arith.constant 0 : i32
    %c80_i32 = arith.constant 80 : i32
    %819 = arith.addi %c80_i32, %c0_i32_399 : i32
    %820 = arith.index_cast %819 : i32 to index
    %c0_400 = arith.constant 0 : index
    %821 = vector.load %arg3[%820, %c0_400] : memref<128x8xf32, #tpu.memory_space<vmem>>, vector<1x8xf32>
    %c8_i32_401 = arith.constant 8 : i32
    %822 = arith.muli %c0_i32_399, %c8_i32_401 : i32
    %823 = tpu.assume_multiple %822, 8 : i32
    %824 = arith.index_cast %823 : i32 to index
    %c0_402 = arith.constant 0 : index
    %825 = vector.load %arg3[%824, %c0_402] : memref<128x8xf32, #tpu.memory_space<vmem>>, vector<8x8xf32>
    %826 = vector.broadcast %821 : vector<1x8xf32> to vector<8x8xf32>
    %827 = arith.mulf %826, %825 : vector<8x8xf32>
    %828 = arith.addf %818, %827 : vector<8x8xf32>
    %c1_i32_403 = arith.constant 1 : i32
    %c80_i32_404 = arith.constant 80 : i32
    %829 = arith.addi %c80_i32_404, %c1_i32_403 : i32
    %830 = arith.index_cast %829 : i32 to index
    %c0_405 = arith.constant 0 : index
    %831 = vector.load %arg3[%830, %c0_405] : memref<128x8xf32, #tpu.memory_space<vmem>>, vector<1x8xf32>
    %c8_i32_406 = arith.constant 8 : i32
    %832 = arith.muli %c1_i32_403, %c8_i32_406 : i32
    %833 = tpu.assume_multiple %832, 8 : i32
    %834 = arith.index_cast %833 : i32 to index
    %c0_407 = arith.constant 0 : index
    %835 = vector.load %arg3[%834, %c0_407] : memref<128x8xf32, #tpu.memory_space<vmem>>, vector<8x8xf32>
    %836 = vector.broadcast %831 : vector<1x8xf32> to vector<8x8xf32>
    %837 = arith.mulf %836, %835 : vector<8x8xf32>
    %838 = arith.addf %828, %837 : vector<8x8xf32>
    %c2_i32_408 = arith.constant 2 : i32
    %c80_i32_409 = arith.constant 80 : i32
    %839 = arith.addi %c80_i32_409, %c2_i32_408 : i32
    %840 = arith.index_cast %839 : i32 to index
    %c0_410 = arith.constant 0 : index
    %841 = vector.load %arg3[%840, %c0_410] : memref<128x8xf32, #tpu.memory_space<vmem>>, vector<1x8xf32>
    %c8_i32_411 = arith.constant 8 : i32
    %842 = arith.muli %c2_i32_408, %c8_i32_411 : i32
    %843 = tpu.assume_multiple %842, 8 : i32
    %844 = arith.index_cast %843 : i32 to index
    %c0_412 = arith.constant 0 : index
    %845 = vector.load %arg3[%844, %c0_412] : memref<128x8xf32, #tpu.memory_space<vmem>>, vector<8x8xf32>
    %846 = vector.broadcast %841 : vector<1x8xf32> to vector<8x8xf32>
    %847 = arith.mulf %846, %845 : vector<8x8xf32>
    %848 = arith.addf %838, %847 : vector<8x8xf32>
    %c3_i32_413 = arith.constant 3 : i32
    %c80_i32_414 = arith.constant 80 : i32
    %849 = arith.addi %c80_i32_414, %c3_i32_413 : i32
    %850 = arith.index_cast %849 : i32 to index
    %c0_415 = arith.constant 0 : index
    %851 = vector.load %arg3[%850, %c0_415] : memref<128x8xf32, #tpu.memory_space<vmem>>, vector<1x8xf32>
    %c8_i32_416 = arith.constant 8 : i32
    %852 = arith.muli %c3_i32_413, %c8_i32_416 : i32
    %853 = tpu.assume_multiple %852, 8 : i32
    %854 = arith.index_cast %853 : i32 to index
    %c0_417 = arith.constant 0 : index
    %855 = vector.load %arg3[%854, %c0_417] : memref<128x8xf32, #tpu.memory_space<vmem>>, vector<8x8xf32>
    %856 = vector.broadcast %851 : vector<1x8xf32> to vector<8x8xf32>
    %857 = arith.mulf %856, %855 : vector<8x8xf32>
    %858 = arith.addf %848, %857 : vector<8x8xf32>
    %c4_i32_418 = arith.constant 4 : i32
    %c80_i32_419 = arith.constant 80 : i32
    %859 = arith.addi %c80_i32_419, %c4_i32_418 : i32
    %860 = arith.index_cast %859 : i32 to index
    %c0_420 = arith.constant 0 : index
    %861 = vector.load %arg3[%860, %c0_420] : memref<128x8xf32, #tpu.memory_space<vmem>>, vector<1x8xf32>
    %c8_i32_421 = arith.constant 8 : i32
    %862 = arith.muli %c4_i32_418, %c8_i32_421 : i32
    %863 = tpu.assume_multiple %862, 8 : i32
    %864 = arith.index_cast %863 : i32 to index
    %c0_422 = arith.constant 0 : index
    %865 = vector.load %arg3[%864, %c0_422] : memref<128x8xf32, #tpu.memory_space<vmem>>, vector<8x8xf32>
    %866 = vector.broadcast %861 : vector<1x8xf32> to vector<8x8xf32>
    %867 = arith.mulf %866, %865 : vector<8x8xf32>
    %868 = arith.addf %858, %867 : vector<8x8xf32>
    %c5_i32_423 = arith.constant 5 : i32
    %c80_i32_424 = arith.constant 80 : i32
    %869 = arith.addi %c80_i32_424, %c5_i32_423 : i32
    %870 = arith.index_cast %869 : i32 to index
    %c0_425 = arith.constant 0 : index
    %871 = vector.load %arg3[%870, %c0_425] : memref<128x8xf32, #tpu.memory_space<vmem>>, vector<1x8xf32>
    %c8_i32_426 = arith.constant 8 : i32
    %872 = arith.muli %c5_i32_423, %c8_i32_426 : i32
    %873 = tpu.assume_multiple %872, 8 : i32
    %874 = arith.index_cast %873 : i32 to index
    %c0_427 = arith.constant 0 : index
    %875 = vector.load %arg3[%874, %c0_427] : memref<128x8xf32, #tpu.memory_space<vmem>>, vector<8x8xf32>
    %876 = vector.broadcast %871 : vector<1x8xf32> to vector<8x8xf32>
    %877 = arith.mulf %876, %875 : vector<8x8xf32>
    %878 = arith.addf %868, %877 : vector<8x8xf32>
    %c6_i32_428 = arith.constant 6 : i32
    %c80_i32_429 = arith.constant 80 : i32
    %879 = arith.addi %c80_i32_429, %c6_i32_428 : i32
    %880 = arith.index_cast %879 : i32 to index
    %c0_430 = arith.constant 0 : index
    %881 = vector.load %arg3[%880, %c0_430] : memref<128x8xf32, #tpu.memory_space<vmem>>, vector<1x8xf32>
    %c8_i32_431 = arith.constant 8 : i32
    %882 = arith.muli %c6_i32_428, %c8_i32_431 : i32
    %883 = tpu.assume_multiple %882, 8 : i32
    %884 = arith.index_cast %883 : i32 to index
    %c0_432 = arith.constant 0 : index
    %885 = vector.load %arg3[%884, %c0_432] : memref<128x8xf32, #tpu.memory_space<vmem>>, vector<8x8xf32>
    %886 = vector.broadcast %881 : vector<1x8xf32> to vector<8x8xf32>
    %887 = arith.mulf %886, %885 : vector<8x8xf32>
    %888 = arith.addf %878, %887 : vector<8x8xf32>
    %c7_i32_433 = arith.constant 7 : i32
    %c80_i32_434 = arith.constant 80 : i32
    %889 = arith.addi %c80_i32_434, %c7_i32_433 : i32
    %890 = arith.index_cast %889 : i32 to index
    %c0_435 = arith.constant 0 : index
    %891 = vector.load %arg3[%890, %c0_435] : memref<128x8xf32, #tpu.memory_space<vmem>>, vector<1x8xf32>
    %c8_i32_436 = arith.constant 8 : i32
    %892 = arith.muli %c7_i32_433, %c8_i32_436 : i32
    %893 = tpu.assume_multiple %892, 8 : i32
    %894 = arith.index_cast %893 : i32 to index
    %c0_437 = arith.constant 0 : index
    %895 = vector.load %arg3[%894, %c0_437] : memref<128x8xf32, #tpu.memory_space<vmem>>, vector<8x8xf32>
    %896 = vector.broadcast %891 : vector<1x8xf32> to vector<8x8xf32>
    %897 = arith.mulf %896, %895 : vector<8x8xf32>
    %898 = arith.addf %888, %897 : vector<8x8xf32>
    %c8_i32_438 = arith.constant 8 : i32
    %c80_i32_439 = arith.constant 80 : i32
    %899 = arith.addi %c80_i32_439, %c8_i32_438 : i32
    %900 = arith.index_cast %899 : i32 to index
    %c0_440 = arith.constant 0 : index
    %901 = vector.load %arg3[%900, %c0_440] : memref<128x8xf32, #tpu.memory_space<vmem>>, vector<1x8xf32>
    %c8_i32_441 = arith.constant 8 : i32
    %902 = arith.muli %c8_i32_438, %c8_i32_441 : i32
    %903 = tpu.assume_multiple %902, 8 : i32
    %904 = arith.index_cast %903 : i32 to index
    %c0_442 = arith.constant 0 : index
    %905 = vector.load %arg3[%904, %c0_442] : memref<128x8xf32, #tpu.memory_space<vmem>>, vector<8x8xf32>
    %906 = vector.broadcast %901 : vector<1x8xf32> to vector<8x8xf32>
    %907 = arith.mulf %906, %905 : vector<8x8xf32>
    %908 = arith.addf %898, %907 : vector<8x8xf32>
    %c9_i32_443 = arith.constant 9 : i32
    %c80_i32_444 = arith.constant 80 : i32
    %909 = arith.addi %c80_i32_444, %c9_i32_443 : i32
    %910 = arith.index_cast %909 : i32 to index
    %c0_445 = arith.constant 0 : index
    %911 = vector.load %arg3[%910, %c0_445] : memref<128x8xf32, #tpu.memory_space<vmem>>, vector<1x8xf32>
    %c8_i32_446 = arith.constant 8 : i32
    %912 = arith.muli %c9_i32_443, %c8_i32_446 : i32
    %913 = tpu.assume_multiple %912, 8 : i32
    %914 = arith.index_cast %913 : i32 to index
    %c0_447 = arith.constant 0 : index
    %915 = vector.load %arg3[%914, %c0_447] : memref<128x8xf32, #tpu.memory_space<vmem>>, vector<8x8xf32>
    %916 = vector.broadcast %911 : vector<1x8xf32> to vector<8x8xf32>
    %917 = arith.mulf %916, %915 : vector<8x8xf32>
    %918 = arith.addf %908, %917 : vector<8x8xf32>
    %c10_i32_448 = arith.constant 10 : i32
    %c80_i32_449 = arith.constant 80 : i32
    %919 = arith.addi %c80_i32_449, %c10_i32_448 : i32
    %920 = arith.index_cast %919 : i32 to index
    %c0_450 = arith.constant 0 : index
    %921 = vector.load %arg3[%920, %c0_450] : memref<128x8xf32, #tpu.memory_space<vmem>>, vector<1x8xf32>
    %c8_i32_451 = arith.constant 8 : i32
    %922 = arith.muli %c10_i32_448, %c8_i32_451 : i32
    %923 = tpu.assume_multiple %922, 8 : i32
    %924 = arith.index_cast %923 : i32 to index
    %c0_452 = arith.constant 0 : index
    %925 = vector.load %arg3[%924, %c0_452] : memref<128x8xf32, #tpu.memory_space<vmem>>, vector<8x8xf32>
    %926 = vector.broadcast %921 : vector<1x8xf32> to vector<8x8xf32>
    %927 = arith.mulf %926, %925 : vector<8x8xf32>
    %928 = arith.addf %918, %927 : vector<8x8xf32>
    %c11_i32_453 = arith.constant 11 : i32
    %c80_i32_454 = arith.constant 80 : i32
    %929 = arith.addi %c80_i32_454, %c11_i32_453 : i32
    %930 = arith.index_cast %929 : i32 to index
    %c0_455 = arith.constant 0 : index
    %931 = vector.load %arg3[%930, %c0_455] : memref<128x8xf32, #tpu.memory_space<vmem>>, vector<1x8xf32>
    %c8_i32_456 = arith.constant 8 : i32
    %932 = arith.muli %c11_i32_453, %c8_i32_456 : i32
    %933 = tpu.assume_multiple %932, 8 : i32
    %934 = arith.index_cast %933 : i32 to index
    %c0_457 = arith.constant 0 : index
    %935 = vector.load %arg3[%934, %c0_457] : memref<128x8xf32, #tpu.memory_space<vmem>>, vector<8x8xf32>
    %936 = vector.broadcast %931 : vector<1x8xf32> to vector<8x8xf32>
    %937 = arith.mulf %936, %935 : vector<8x8xf32>
    %938 = arith.addf %928, %937 : vector<8x8xf32>
    %c12_i32_458 = arith.constant 12 : i32
    %c80_i32_459 = arith.constant 80 : i32
    %939 = arith.addi %c80_i32_459, %c12_i32_458 : i32
    %940 = arith.index_cast %939 : i32 to index
    %c0_460 = arith.constant 0 : index
    %941 = vector.load %arg3[%940, %c0_460] : memref<128x8xf32, #tpu.memory_space<vmem>>, vector<1x8xf32>
    %c8_i32_461 = arith.constant 8 : i32
    %942 = arith.muli %c12_i32_458, %c8_i32_461 : i32
    %943 = tpu.assume_multiple %942, 8 : i32
    %944 = arith.index_cast %943 : i32 to index
    %c0_462 = arith.constant 0 : index
    %945 = vector.load %arg3[%944, %c0_462] : memref<128x8xf32, #tpu.memory_space<vmem>>, vector<8x8xf32>
    %946 = vector.broadcast %941 : vector<1x8xf32> to vector<8x8xf32>
    %947 = arith.mulf %946, %945 : vector<8x8xf32>
    %948 = arith.addf %938, %947 : vector<8x8xf32>
    %c13_i32_463 = arith.constant 13 : i32
    %c80_i32_464 = arith.constant 80 : i32
    %949 = arith.addi %c80_i32_464, %c13_i32_463 : i32
    %950 = arith.index_cast %949 : i32 to index
    %c0_465 = arith.constant 0 : index
    %951 = vector.load %arg3[%950, %c0_465] : memref<128x8xf32, #tpu.memory_space<vmem>>, vector<1x8xf32>
    %c8_i32_466 = arith.constant 8 : i32
    %952 = arith.muli %c13_i32_463, %c8_i32_466 : i32
    %953 = tpu.assume_multiple %952, 8 : i32
    %954 = arith.index_cast %953 : i32 to index
    %c0_467 = arith.constant 0 : index
    %955 = vector.load %arg3[%954, %c0_467] : memref<128x8xf32, #tpu.memory_space<vmem>>, vector<8x8xf32>
    %956 = vector.broadcast %951 : vector<1x8xf32> to vector<8x8xf32>
    %957 = arith.mulf %956, %955 : vector<8x8xf32>
    %958 = arith.addf %948, %957 : vector<8x8xf32>
    %c14_i32_468 = arith.constant 14 : i32
    %c80_i32_469 = arith.constant 80 : i32
    %959 = arith.addi %c80_i32_469, %c14_i32_468 : i32
    %960 = arith.index_cast %959 : i32 to index
    %c0_470 = arith.constant 0 : index
    %961 = vector.load %arg3[%960, %c0_470] : memref<128x8xf32, #tpu.memory_space<vmem>>, vector<1x8xf32>
    %c8_i32_471 = arith.constant 8 : i32
    %962 = arith.muli %c14_i32_468, %c8_i32_471 : i32
    %963 = tpu.assume_multiple %962, 8 : i32
    %964 = arith.index_cast %963 : i32 to index
    %c0_472 = arith.constant 0 : index
    %965 = vector.load %arg3[%964, %c0_472] : memref<128x8xf32, #tpu.memory_space<vmem>>, vector<8x8xf32>
    %966 = vector.broadcast %961 : vector<1x8xf32> to vector<8x8xf32>
    %967 = arith.mulf %966, %965 : vector<8x8xf32>
    %968 = arith.addf %958, %967 : vector<8x8xf32>
    %c15_i32_473 = arith.constant 15 : i32
    %c80_i32_474 = arith.constant 80 : i32
    %969 = arith.addi %c80_i32_474, %c15_i32_473 : i32
    %970 = arith.index_cast %969 : i32 to index
    %c0_475 = arith.constant 0 : index
    %971 = vector.load %arg3[%970, %c0_475] : memref<128x8xf32, #tpu.memory_space<vmem>>, vector<1x8xf32>
    %c8_i32_476 = arith.constant 8 : i32
    %972 = arith.muli %c15_i32_473, %c8_i32_476 : i32
    %973 = tpu.assume_multiple %972, 8 : i32
    %974 = arith.index_cast %973 : i32 to index
    %c0_477 = arith.constant 0 : index
    %975 = vector.load %arg3[%974, %c0_477] : memref<128x8xf32, #tpu.memory_space<vmem>>, vector<8x8xf32>
    %976 = vector.broadcast %971 : vector<1x8xf32> to vector<8x8xf32>
    %977 = arith.mulf %976, %975 : vector<8x8xf32>
    %978 = arith.addf %968, %977 : vector<8x8xf32>
    %c16_i32_478 = arith.constant 16 : i32
    %979 = vector.extract_strided_slice %978 {offsets = [0, 0], sizes = [6, 8], strides = [1, 1]} : vector<8x8xf32> to vector<6x8xf32>
    %c15 = arith.constant 15 : index
    %c0_479 = arith.constant 0 : index
    %980 = vector.load %arg4[%c15, %c0_479] : memref<40x8xf32, #tpu.memory_space<vmem>>, vector<6x8xf32>
    tpu.vector_store %arg4[%c15, %c0_479], %979 {strides = array<i32>} : memref<40x8xf32, #tpu.memory_space<vmem>>, vector<6x8xf32>,
    %cst_480 = arith.constant 0.000000e+00 : f32
    %981 = vector.broadcast %cst_480 : f32 to vector<8x8xf32>
    %c0_i32_481 = arith.constant 0 : i32
    %c96_i32 = arith.constant 96 : i32
    %982 = arith.addi %c96_i32, %c0_i32_481 : i32
    %983 = arith.index_cast %982 : i32 to index
    %c0_482 = arith.constant 0 : index
    %984 = vector.load %arg3[%983, %c0_482] : memref<128x8xf32, #tpu.memory_space<vmem>>, vector<1x8xf32>
    %c8_i32_483 = arith.constant 8 : i32
    %985 = arith.muli %c0_i32_481, %c8_i32_483 : i32
    %986 = tpu.assume_multiple %985, 8 : i32
    %987 = arith.index_cast %986 : i32 to index
    %c0_484 = arith.constant 0 : index
    %988 = vector.load %arg3[%987, %c0_484] : memref<128x8xf32, #tpu.memory_space<vmem>>, vector<8x8xf32>
    %989 = vector.broadcast %984 : vector<1x8xf32> to vector<8x8xf32>
    %990 = arith.mulf %989, %988 : vector<8x8xf32>
    %991 = arith.addf %981, %990 : vector<8x8xf32>
    %c1_i32_485 = arith.constant 1 : i32
    %c96_i32_486 = arith.constant 96 : i32
    %992 = arith.addi %c96_i32_486, %c1_i32_485 : i32
    %993 = arith.index_cast %992 : i32 to index
    %c0_487 = arith.constant 0 : index
    %994 = vector.load %arg3[%993, %c0_487] : memref<128x8xf32, #tpu.memory_space<vmem>>, vector<1x8xf32>
    %c8_i32_488 = arith.constant 8 : i32
    %995 = arith.muli %c1_i32_485, %c8_i32_488 : i32
    %996 = tpu.assume_multiple %995, 8 : i32
    %997 = arith.index_cast %996 : i32 to index
    %c0_489 = arith.constant 0 : index
    %998 = vector.load %arg3[%997, %c0_489] : memref<128x8xf32, #tpu.memory_space<vmem>>, vector<8x8xf32>
    %999 = vector.broadcast %994 : vector<1x8xf32> to vector<8x8xf32>
    %1000 = arith.mulf %999, %998 : vector<8x8xf32>
    %1001 = arith.addf %991, %1000 : vector<8x8xf32>
    %c2_i32_490 = arith.constant 2 : i32
    %c96_i32_491 = arith.constant 96 : i32
    %1002 = arith.addi %c96_i32_491, %c2_i32_490 : i32
    %1003 = arith.index_cast %1002 : i32 to index
    %c0_492 = arith.constant 0 : index
    %1004 = vector.load %arg3[%1003, %c0_492] : memref<128x8xf32, #tpu.memory_space<vmem>>, vector<1x8xf32>
    %c8_i32_493 = arith.constant 8 : i32
    %1005 = arith.muli %c2_i32_490, %c8_i32_493 : i32
    %1006 = tpu.assume_multiple %1005, 8 : i32
    %1007 = arith.index_cast %1006 : i32 to index
    %c0_494 = arith.constant 0 : index
    %1008 = vector.load %arg3[%1007, %c0_494] : memref<128x8xf32, #tpu.memory_space<vmem>>, vector<8x8xf32>
    %1009 = vector.broadcast %1004 : vector<1x8xf32> to vector<8x8xf32>
    %1010 = arith.mulf %1009, %1008 : vector<8x8xf32>
    %1011 = arith.addf %1001, %1010 : vector<8x8xf32>
    %c3_i32_495 = arith.constant 3 : i32
    %c96_i32_496 = arith.constant 96 : i32
    %1012 = arith.addi %c96_i32_496, %c3_i32_495 : i32
    %1013 = arith.index_cast %1012 : i32 to index
    %c0_497 = arith.constant 0 : index
    %1014 = vector.load %arg3[%1013, %c0_497] : memref<128x8xf32, #tpu.memory_space<vmem>>, vector<1x8xf32>
    %c8_i32_498 = arith.constant 8 : i32
    %1015 = arith.muli %c3_i32_495, %c8_i32_498 : i32
    %1016 = tpu.assume_multiple %1015, 8 : i32
    %1017 = arith.index_cast %1016 : i32 to index
    %c0_499 = arith.constant 0 : index
    %1018 = vector.load %arg3[%1017, %c0_499] : memref<128x8xf32, #tpu.memory_space<vmem>>, vector<8x8xf32>
    %1019 = vector.broadcast %1014 : vector<1x8xf32> to vector<8x8xf32>
    %1020 = arith.mulf %1019, %1018 : vector<8x8xf32>
    %1021 = arith.addf %1011, %1020 : vector<8x8xf32>
    %c4_i32_500 = arith.constant 4 : i32
    %c96_i32_501 = arith.constant 96 : i32
    %1022 = arith.addi %c96_i32_501, %c4_i32_500 : i32
    %1023 = arith.index_cast %1022 : i32 to index
    %c0_502 = arith.constant 0 : index
    %1024 = vector.load %arg3[%1023, %c0_502] : memref<128x8xf32, #tpu.memory_space<vmem>>, vector<1x8xf32>
    %c8_i32_503 = arith.constant 8 : i32
    %1025 = arith.muli %c4_i32_500, %c8_i32_503 : i32
    %1026 = tpu.assume_multiple %1025, 8 : i32
    %1027 = arith.index_cast %1026 : i32 to index
    %c0_504 = arith.constant 0 : index
    %1028 = vector.load %arg3[%1027, %c0_504] : memref<128x8xf32, #tpu.memory_space<vmem>>, vector<8x8xf32>
    %1029 = vector.broadcast %1024 : vector<1x8xf32> to vector<8x8xf32>
    %1030 = arith.mulf %1029, %1028 : vector<8x8xf32>
    %1031 = arith.addf %1021, %1030 : vector<8x8xf32>
    %c5_i32_505 = arith.constant 5 : i32
    %c96_i32_506 = arith.constant 96 : i32
    %1032 = arith.addi %c96_i32_506, %c5_i32_505 : i32
    %1033 = arith.index_cast %1032 : i32 to index
    %c0_507 = arith.constant 0 : index
    %1034 = vector.load %arg3[%1033, %c0_507] : memref<128x8xf32, #tpu.memory_space<vmem>>, vector<1x8xf32>
    %c8_i32_508 = arith.constant 8 : i32
    %1035 = arith.muli %c5_i32_505, %c8_i32_508 : i32
    %1036 = tpu.assume_multiple %1035, 8 : i32
    %1037 = arith.index_cast %1036 : i32 to index
    %c0_509 = arith.constant 0 : index
    %1038 = vector.load %arg3[%1037, %c0_509] : memref<128x8xf32, #tpu.memory_space<vmem>>, vector<8x8xf32>
    %1039 = vector.broadcast %1034 : vector<1x8xf32> to vector<8x8xf32>
    %1040 = arith.mulf %1039, %1038 : vector<8x8xf32>
    %1041 = arith.addf %1031, %1040 : vector<8x8xf32>
    %c6_i32_510 = arith.constant 6 : i32
    %c96_i32_511 = arith.constant 96 : i32
    %1042 = arith.addi %c96_i32_511, %c6_i32_510 : i32
    %1043 = arith.index_cast %1042 : i32 to index
    %c0_512 = arith.constant 0 : index
    %1044 = vector.load %arg3[%1043, %c0_512] : memref<128x8xf32, #tpu.memory_space<vmem>>, vector<1x8xf32>
    %c8_i32_513 = arith.constant 8 : i32
    %1045 = arith.muli %c6_i32_510, %c8_i32_513 : i32
    %1046 = tpu.assume_multiple %1045, 8 : i32
    %1047 = arith.index_cast %1046 : i32 to index
    %c0_514 = arith.constant 0 : index
    %1048 = vector.load %arg3[%1047, %c0_514] : memref<128x8xf32, #tpu.memory_space<vmem>>, vector<8x8xf32>
    %1049 = vector.broadcast %1044 : vector<1x8xf32> to vector<8x8xf32>
    %1050 = arith.mulf %1049, %1048 : vector<8x8xf32>
    %1051 = arith.addf %1041, %1050 : vector<8x8xf32>
    %c7_i32_515 = arith.constant 7 : i32
    %c96_i32_516 = arith.constant 96 : i32
    %1052 = arith.addi %c96_i32_516, %c7_i32_515 : i32
    %1053 = arith.index_cast %1052 : i32 to index
    %c0_517 = arith.constant 0 : index
    %1054 = vector.load %arg3[%1053, %c0_517] : memref<128x8xf32, #tpu.memory_space<vmem>>, vector<1x8xf32>
    %c8_i32_518 = arith.constant 8 : i32
    %1055 = arith.muli %c7_i32_515, %c8_i32_518 : i32
    %1056 = tpu.assume_multiple %1055, 8 : i32
    %1057 = arith.index_cast %1056 : i32 to index
    %c0_519 = arith.constant 0 : index
    %1058 = vector.load %arg3[%1057, %c0_519] : memref<128x8xf32, #tpu.memory_space<vmem>>, vector<8x8xf32>
    %1059 = vector.broadcast %1054 : vector<1x8xf32> to vector<8x8xf32>
    %1060 = arith.mulf %1059, %1058 : vector<8x8xf32>
    %1061 = arith.addf %1051, %1060 : vector<8x8xf32>
    %c8_i32_520 = arith.constant 8 : i32
    %c96_i32_521 = arith.constant 96 : i32
    %1062 = arith.addi %c96_i32_521, %c8_i32_520 : i32
    %1063 = arith.index_cast %1062 : i32 to index
    %c0_522 = arith.constant 0 : index
    %1064 = vector.load %arg3[%1063, %c0_522] : memref<128x8xf32, #tpu.memory_space<vmem>>, vector<1x8xf32>
    %c8_i32_523 = arith.constant 8 : i32
    %1065 = arith.muli %c8_i32_520, %c8_i32_523 : i32
    %1066 = tpu.assume_multiple %1065, 8 : i32
    %1067 = arith.index_cast %1066 : i32 to index
    %c0_524 = arith.constant 0 : index
    %1068 = vector.load %arg3[%1067, %c0_524] : memref<128x8xf32, #tpu.memory_space<vmem>>, vector<8x8xf32>
    %1069 = vector.broadcast %1064 : vector<1x8xf32> to vector<8x8xf32>
    %1070 = arith.mulf %1069, %1068 : vector<8x8xf32>
    %1071 = arith.addf %1061, %1070 : vector<8x8xf32>
    %c9_i32_525 = arith.constant 9 : i32
    %c96_i32_526 = arith.constant 96 : i32
    %1072 = arith.addi %c96_i32_526, %c9_i32_525 : i32
    %1073 = arith.index_cast %1072 : i32 to index
    %c0_527 = arith.constant 0 : index
    %1074 = vector.load %arg3[%1073, %c0_527] : memref<128x8xf32, #tpu.memory_space<vmem>>, vector<1x8xf32>
    %c8_i32_528 = arith.constant 8 : i32
    %1075 = arith.muli %c9_i32_525, %c8_i32_528 : i32
    %1076 = tpu.assume_multiple %1075, 8 : i32
    %1077 = arith.index_cast %1076 : i32 to index
    %c0_529 = arith.constant 0 : index
    %1078 = vector.load %arg3[%1077, %c0_529] : memref<128x8xf32, #tpu.memory_space<vmem>>, vector<8x8xf32>
    %1079 = vector.broadcast %1074 : vector<1x8xf32> to vector<8x8xf32>
    %1080 = arith.mulf %1079, %1078 : vector<8x8xf32>
    %1081 = arith.addf %1071, %1080 : vector<8x8xf32>
    %c10_i32_530 = arith.constant 10 : i32
    %c96_i32_531 = arith.constant 96 : i32
    %1082 = arith.addi %c96_i32_531, %c10_i32_530 : i32
    %1083 = arith.index_cast %1082 : i32 to index
    %c0_532 = arith.constant 0 : index
    %1084 = vector.load %arg3[%1083, %c0_532] : memref<128x8xf32, #tpu.memory_space<vmem>>, vector<1x8xf32>
    %c8_i32_533 = arith.constant 8 : i32
    %1085 = arith.muli %c10_i32_530, %c8_i32_533 : i32
    %1086 = tpu.assume_multiple %1085, 8 : i32
    %1087 = arith.index_cast %1086 : i32 to index
    %c0_534 = arith.constant 0 : index
    %1088 = vector.load %arg3[%1087, %c0_534] : memref<128x8xf32, #tpu.memory_space<vmem>>, vector<8x8xf32>
    %1089 = vector.broadcast %1084 : vector<1x8xf32> to vector<8x8xf32>
    %1090 = arith.mulf %1089, %1088 : vector<8x8xf32>
    %1091 = arith.addf %1081, %1090 : vector<8x8xf32>
    %c11_i32_535 = arith.constant 11 : i32
    %c96_i32_536 = arith.constant 96 : i32
    %1092 = arith.addi %c96_i32_536, %c11_i32_535 : i32
    %1093 = arith.index_cast %1092 : i32 to index
    %c0_537 = arith.constant 0 : index
    %1094 = vector.load %arg3[%1093, %c0_537] : memref<128x8xf32, #tpu.memory_space<vmem>>, vector<1x8xf32>
    %c8_i32_538 = arith.constant 8 : i32
    %1095 = arith.muli %c11_i32_535, %c8_i32_538 : i32
    %1096 = tpu.assume_multiple %1095, 8 : i32
    %1097 = arith.index_cast %1096 : i32 to index
    %c0_539 = arith.constant 0 : index
    %1098 = vector.load %arg3[%1097, %c0_539] : memref<128x8xf32, #tpu.memory_space<vmem>>, vector<8x8xf32>
    %1099 = vector.broadcast %1094 : vector<1x8xf32> to vector<8x8xf32>
    %1100 = arith.mulf %1099, %1098 : vector<8x8xf32>
    %1101 = arith.addf %1091, %1100 : vector<8x8xf32>
    %c12_i32_540 = arith.constant 12 : i32
    %c96_i32_541 = arith.constant 96 : i32
    %1102 = arith.addi %c96_i32_541, %c12_i32_540 : i32
    %1103 = arith.index_cast %1102 : i32 to index
    %c0_542 = arith.constant 0 : index
    %1104 = vector.load %arg3[%1103, %c0_542] : memref<128x8xf32, #tpu.memory_space<vmem>>, vector<1x8xf32>
    %c8_i32_543 = arith.constant 8 : i32
    %1105 = arith.muli %c12_i32_540, %c8_i32_543 : i32
    %1106 = tpu.assume_multiple %1105, 8 : i32
    %1107 = arith.index_cast %1106 : i32 to index
    %c0_544 = arith.constant 0 : index
    %1108 = vector.load %arg3[%1107, %c0_544] : memref<128x8xf32, #tpu.memory_space<vmem>>, vector<8x8xf32>
    %1109 = vector.broadcast %1104 : vector<1x8xf32> to vector<8x8xf32>
    %1110 = arith.mulf %1109, %1108 : vector<8x8xf32>
    %1111 = arith.addf %1101, %1110 : vector<8x8xf32>
    %c13_i32_545 = arith.constant 13 : i32
    %c96_i32_546 = arith.constant 96 : i32
    %1112 = arith.addi %c96_i32_546, %c13_i32_545 : i32
    %1113 = arith.index_cast %1112 : i32 to index
    %c0_547 = arith.constant 0 : index
    %1114 = vector.load %arg3[%1113, %c0_547] : memref<128x8xf32, #tpu.memory_space<vmem>>, vector<1x8xf32>
    %c8_i32_548 = arith.constant 8 : i32
    %1115 = arith.muli %c13_i32_545, %c8_i32_548 : i32
    %1116 = tpu.assume_multiple %1115, 8 : i32
    %1117 = arith.index_cast %1116 : i32 to index
    %c0_549 = arith.constant 0 : index
    %1118 = vector.load %arg3[%1117, %c0_549] : memref<128x8xf32, #tpu.memory_space<vmem>>, vector<8x8xf32>
    %1119 = vector.broadcast %1114 : vector<1x8xf32> to vector<8x8xf32>
    %1120 = arith.mulf %1119, %1118 : vector<8x8xf32>
    %1121 = arith.addf %1111, %1120 : vector<8x8xf32>
    %c14_i32_550 = arith.constant 14 : i32
    %c96_i32_551 = arith.constant 96 : i32
    %1122 = arith.addi %c96_i32_551, %c14_i32_550 : i32
    %1123 = arith.index_cast %1122 : i32 to index
    %c0_552 = arith.constant 0 : index
    %1124 = vector.load %arg3[%1123, %c0_552] : memref<128x8xf32, #tpu.memory_space<vmem>>, vector<1x8xf32>
    %c8_i32_553 = arith.constant 8 : i32
    %1125 = arith.muli %c14_i32_550, %c8_i32_553 : i32
    %1126 = tpu.assume_multiple %1125, 8 : i32
    %1127 = arith.index_cast %1126 : i32 to index
    %c0_554 = arith.constant 0 : index
    %1128 = vector.load %arg3[%1127, %c0_554] : memref<128x8xf32, #tpu.memory_space<vmem>>, vector<8x8xf32>
    %1129 = vector.broadcast %1124 : vector<1x8xf32> to vector<8x8xf32>
    %1130 = arith.mulf %1129, %1128 : vector<8x8xf32>
    %1131 = arith.addf %1121, %1130 : vector<8x8xf32>
    %c15_i32_555 = arith.constant 15 : i32
    %c96_i32_556 = arith.constant 96 : i32
    %1132 = arith.addi %c96_i32_556, %c15_i32_555 : i32
    %1133 = arith.index_cast %1132 : i32 to index
    %c0_557 = arith.constant 0 : index
    %1134 = vector.load %arg3[%1133, %c0_557] : memref<128x8xf32, #tpu.memory_space<vmem>>, vector<1x8xf32>
    %c8_i32_558 = arith.constant 8 : i32
    %1135 = arith.muli %c15_i32_555, %c8_i32_558 : i32
    %1136 = tpu.assume_multiple %1135, 8 : i32
    %1137 = arith.index_cast %1136 : i32 to index
    %c0_559 = arith.constant 0 : index
    %1138 = vector.load %arg3[%1137, %c0_559] : memref<128x8xf32, #tpu.memory_space<vmem>>, vector<8x8xf32>
    %1139 = vector.broadcast %1134 : vector<1x8xf32> to vector<8x8xf32>
    %1140 = arith.mulf %1139, %1138 : vector<8x8xf32>
    %1141 = arith.addf %1131, %1140 : vector<8x8xf32>
    %c16_i32_560 = arith.constant 16 : i32
    %1142 = vector.extract_strided_slice %1141 {offsets = [0, 0], sizes = [7, 8], strides = [1, 1]} : vector<8x8xf32> to vector<7x8xf32>
    %c21 = arith.constant 21 : index
    %c0_561 = arith.constant 0 : index
    %1143 = vector.load %arg4[%c21, %c0_561] : memref<40x8xf32, #tpu.memory_space<vmem>>, vector<7x8xf32>
    tpu.vector_store %arg4[%c21, %c0_561], %1142 {strides = array<i32>} : memref<40x8xf32, #tpu.memory_space<vmem>>, vector<7x8xf32>,
    %cst_562 = arith.constant 0.000000e+00 : f32
    %1144 = vector.broadcast %cst_562 : f32 to vector<8x8xf32>
    %c0_i32_563 = arith.constant 0 : i32
    %c112_i32 = arith.constant 112 : i32
    %1145 = arith.addi %c112_i32, %c0_i32_563 : i32
    %1146 = arith.index_cast %1145 : i32 to index
    %c0_564 = arith.constant 0 : index
    %1147 = vector.load %arg3[%1146, %c0_564] : memref<128x8xf32, #tpu.memory_space<vmem>>, vector<1x8xf32>
    %c8_i32_565 = arith.constant 8 : i32
    %1148 = arith.muli %c0_i32_563, %c8_i32_565 : i32
    %1149 = tpu.assume_multiple %1148, 8 : i32
    %1150 = arith.index_cast %1149 : i32 to index
    %c0_566 = arith.constant 0 : index
    %1151 = vector.load %arg3[%1150, %c0_566] : memref<128x8xf32, #tpu.memory_space<vmem>>, vector<8x8xf32>
    %1152 = vector.broadcast %1147 : vector<1x8xf32> to vector<8x8xf32>
    %1153 = arith.mulf %1152, %1151 : vector<8x8xf32>
    %1154 = arith.addf %1144, %1153 : vector<8x8xf32>
    %c1_i32_567 = arith.constant 1 : i32
    %c112_i32_568 = arith.constant 112 : i32
    %1155 = arith.addi %c112_i32_568, %c1_i32_567 : i32
    %1156 = arith.index_cast %1155 : i32 to index
    %c0_569 = arith.constant 0 : index
    %1157 = vector.load %arg3[%1156, %c0_569] : memref<128x8xf32, #tpu.memory_space<vmem>>, vector<1x8xf32>
    %c8_i32_570 = arith.constant 8 : i32
    %1158 = arith.muli %c1_i32_567, %c8_i32_570 : i32
    %1159 = tpu.assume_multiple %1158, 8 : i32
    %1160 = arith.index_cast %1159 : i32 to index
    %c0_571 = arith.constant 0 : index
    %1161 = vector.load %arg3[%1160, %c0_571] : memref<128x8xf32, #tpu.memory_space<vmem>>, vector<8x8xf32>
    %1162 = vector.broadcast %1157 : vector<1x8xf32> to vector<8x8xf32>
    %1163 = arith.mulf %1162, %1161 : vector<8x8xf32>
    %1164 = arith.addf %1154, %1163 : vector<8x8xf32>
    %c2_i32_572 = arith.constant 2 : i32
    %c112_i32_573 = arith.constant 112 : i32
    %1165 = arith.addi %c112_i32_573, %c2_i32_572 : i32
    %1166 = arith.index_cast %1165 : i32 to index
    %c0_574 = arith.constant 0 : index
    %1167 = vector.load %arg3[%1166, %c0_574] : memref<128x8xf32, #tpu.memory_space<vmem>>, vector<1x8xf32>
    %c8_i32_575 = arith.constant 8 : i32
    %1168 = arith.muli %c2_i32_572, %c8_i32_575 : i32
    %1169 = tpu.assume_multiple %1168, 8 : i32
    %1170 = arith.index_cast %1169 : i32 to index
    %c0_576 = arith.constant 0 : index
    %1171 = vector.load %arg3[%1170, %c0_576] : memref<128x8xf32, #tpu.memory_space<vmem>>, vector<8x8xf32>
    %1172 = vector.broadcast %1167 : vector<1x8xf32> to vector<8x8xf32>
    %1173 = arith.mulf %1172, %1171 : vector<8x8xf32>
    %1174 = arith.addf %1164, %1173 : vector<8x8xf32>
    %c3_i32_577 = arith.constant 3 : i32
    %c112_i32_578 = arith.constant 112 : i32
    %1175 = arith.addi %c112_i32_578, %c3_i32_577 : i32
    %1176 = arith.index_cast %1175 : i32 to index
    %c0_579 = arith.constant 0 : index
    %1177 = vector.load %arg3[%1176, %c0_579] : memref<128x8xf32, #tpu.memory_space<vmem>>, vector<1x8xf32>
    %c8_i32_580 = arith.constant 8 : i32
    %1178 = arith.muli %c3_i32_577, %c8_i32_580 : i32
    %1179 = tpu.assume_multiple %1178, 8 : i32
    %1180 = arith.index_cast %1179 : i32 to index
    %c0_581 = arith.constant 0 : index
    %1181 = vector.load %arg3[%1180, %c0_581] : memref<128x8xf32, #tpu.memory_space<vmem>>, vector<8x8xf32>
    %1182 = vector.broadcast %1177 : vector<1x8xf32> to vector<8x8xf32>
    %1183 = arith.mulf %1182, %1181 : vector<8x8xf32>
    %1184 = arith.addf %1174, %1183 : vector<8x8xf32>
    %c4_i32_582 = arith.constant 4 : i32
    %c112_i32_583 = arith.constant 112 : i32
    %1185 = arith.addi %c112_i32_583, %c4_i32_582 : i32
    %1186 = arith.index_cast %1185 : i32 to index
    %c0_584 = arith.constant 0 : index
    %1187 = vector.load %arg3[%1186, %c0_584] : memref<128x8xf32, #tpu.memory_space<vmem>>, vector<1x8xf32>
    %c8_i32_585 = arith.constant 8 : i32
    %1188 = arith.muli %c4_i32_582, %c8_i32_585 : i32
    %1189 = tpu.assume_multiple %1188, 8 : i32
    %1190 = arith.index_cast %1189 : i32 to index
    %c0_586 = arith.constant 0 : index
    %1191 = vector.load %arg3[%1190, %c0_586] : memref<128x8xf32, #tpu.memory_space<vmem>>, vector<8x8xf32>
    %1192 = vector.broadcast %1187 : vector<1x8xf32> to vector<8x8xf32>
    %1193 = arith.mulf %1192, %1191 : vector<8x8xf32>
    %1194 = arith.addf %1184, %1193 : vector<8x8xf32>
    %c5_i32_587 = arith.constant 5 : i32
    %c112_i32_588 = arith.constant 112 : i32
    %1195 = arith.addi %c112_i32_588, %c5_i32_587 : i32
    %1196 = arith.index_cast %1195 : i32 to index
    %c0_589 = arith.constant 0 : index
    %1197 = vector.load %arg3[%1196, %c0_589] : memref<128x8xf32, #tpu.memory_space<vmem>>, vector<1x8xf32>
    %c8_i32_590 = arith.constant 8 : i32
    %1198 = arith.muli %c5_i32_587, %c8_i32_590 : i32
    %1199 = tpu.assume_multiple %1198, 8 : i32
    %1200 = arith.index_cast %1199 : i32 to index
    %c0_591 = arith.constant 0 : index
    %1201 = vector.load %arg3[%1200, %c0_591] : memref<128x8xf32, #tpu.memory_space<vmem>>, vector<8x8xf32>
    %1202 = vector.broadcast %1197 : vector<1x8xf32> to vector<8x8xf32>
    %1203 = arith.mulf %1202, %1201 : vector<8x8xf32>
    %1204 = arith.addf %1194, %1203 : vector<8x8xf32>
    %c6_i32_592 = arith.constant 6 : i32
    %c112_i32_593 = arith.constant 112 : i32
    %1205 = arith.addi %c112_i32_593, %c6_i32_592 : i32
    %1206 = arith.index_cast %1205 : i32 to index
    %c0_594 = arith.constant 0 : index
    %1207 = vector.load %arg3[%1206, %c0_594] : memref<128x8xf32, #tpu.memory_space<vmem>>, vector<1x8xf32>
    %c8_i32_595 = arith.constant 8 : i32
    %1208 = arith.muli %c6_i32_592, %c8_i32_595 : i32
    %1209 = tpu.assume_multiple %1208, 8 : i32
    %1210 = arith.index_cast %1209 : i32 to index
    %c0_596 = arith.constant 0 : index
    %1211 = vector.load %arg3[%1210, %c0_596] : memref<128x8xf32, #tpu.memory_space<vmem>>, vector<8x8xf32>
    %1212 = vector.broadcast %1207 : vector<1x8xf32> to vector<8x8xf32>
    %1213 = arith.mulf %1212, %1211 : vector<8x8xf32>
    %1214 = arith.addf %1204, %1213 : vector<8x8xf32>
    %c7_i32_597 = arith.constant 7 : i32
    %c112_i32_598 = arith.constant 112 : i32
    %1215 = arith.addi %c112_i32_598, %c7_i32_597 : i32
    %1216 = arith.index_cast %1215 : i32 to index
    %c0_599 = arith.constant 0 : index
    %1217 = vector.load %arg3[%1216, %c0_599] : memref<128x8xf32, #tpu.memory_space<vmem>>, vector<1x8xf32>
    %c8_i32_600 = arith.constant 8 : i32
    %1218 = arith.muli %c7_i32_597, %c8_i32_600 : i32
    %1219 = tpu.assume_multiple %1218, 8 : i32
    %1220 = arith.index_cast %1219 : i32 to index
    %c0_601 = arith.constant 0 : index
    %1221 = vector.load %arg3[%1220, %c0_601] : memref<128x8xf32, #tpu.memory_space<vmem>>, vector<8x8xf32>
    %1222 = vector.broadcast %1217 : vector<1x8xf32> to vector<8x8xf32>
    %1223 = arith.mulf %1222, %1221 : vector<8x8xf32>
    %1224 = arith.addf %1214, %1223 : vector<8x8xf32>
    %c8_i32_602 = arith.constant 8 : i32
    %c112_i32_603 = arith.constant 112 : i32
    %1225 = arith.addi %c112_i32_603, %c8_i32_602 : i32
    %1226 = arith.index_cast %1225 : i32 to index
    %c0_604 = arith.constant 0 : index
    %1227 = vector.load %arg3[%1226, %c0_604] : memref<128x8xf32, #tpu.memory_space<vmem>>, vector<1x8xf32>
    %c8_i32_605 = arith.constant 8 : i32
    %1228 = arith.muli %c8_i32_602, %c8_i32_605 : i32
    %1229 = tpu.assume_multiple %1228, 8 : i32
    %1230 = arith.index_cast %1229 : i32 to index
    %c0_606 = arith.constant 0 : index
    %1231 = vector.load %arg3[%1230, %c0_606] : memref<128x8xf32, #tpu.memory_space<vmem>>, vector<8x8xf32>
    %1232 = vector.broadcast %1227 : vector<1x8xf32> to vector<8x8xf32>
    %1233 = arith.mulf %1232, %1231 : vector<8x8xf32>
    %1234 = arith.addf %1224, %1233 : vector<8x8xf32>
    %c9_i32_607 = arith.constant 9 : i32
    %c112_i32_608 = arith.constant 112 : i32
    %1235 = arith.addi %c112_i32_608, %c9_i32_607 : i32
    %1236 = arith.index_cast %1235 : i32 to index
    %c0_609 = arith.constant 0 : index
    %1237 = vector.load %arg3[%1236, %c0_609] : memref<128x8xf32, #tpu.memory_space<vmem>>, vector<1x8xf32>
    %c8_i32_610 = arith.constant 8 : i32
    %1238 = arith.muli %c9_i32_607, %c8_i32_610 : i32
    %1239 = tpu.assume_multiple %1238, 8 : i32
    %1240 = arith.index_cast %1239 : i32 to index
    %c0_611 = arith.constant 0 : index
    %1241 = vector.load %arg3[%1240, %c0_611] : memref<128x8xf32, #tpu.memory_space<vmem>>, vector<8x8xf32>
    %1242 = vector.broadcast %1237 : vector<1x8xf32> to vector<8x8xf32>
    %1243 = arith.mulf %1242, %1241 : vector<8x8xf32>
    %1244 = arith.addf %1234, %1243 : vector<8x8xf32>
    %c10_i32_612 = arith.constant 10 : i32
    %c112_i32_613 = arith.constant 112 : i32
    %1245 = arith.addi %c112_i32_613, %c10_i32_612 : i32
    %1246 = arith.index_cast %1245 : i32 to index
    %c0_614 = arith.constant 0 : index
    %1247 = vector.load %arg3[%1246, %c0_614] : memref<128x8xf32, #tpu.memory_space<vmem>>, vector<1x8xf32>
    %c8_i32_615 = arith.constant 8 : i32
    %1248 = arith.muli %c10_i32_612, %c8_i32_615 : i32
    %1249 = tpu.assume_multiple %1248, 8 : i32
    %1250 = arith.index_cast %1249 : i32 to index
    %c0_616 = arith.constant 0 : index
    %1251 = vector.load %arg3[%1250, %c0_616] : memref<128x8xf32, #tpu.memory_space<vmem>>, vector<8x8xf32>
    %1252 = vector.broadcast %1247 : vector<1x8xf32> to vector<8x8xf32>
    %1253 = arith.mulf %1252, %1251 : vector<8x8xf32>
    %1254 = arith.addf %1244, %1253 : vector<8x8xf32>
    %c11_i32_617 = arith.constant 11 : i32
    %c112_i32_618 = arith.constant 112 : i32
    %1255 = arith.addi %c112_i32_618, %c11_i32_617 : i32
    %1256 = arith.index_cast %1255 : i32 to index
    %c0_619 = arith.constant 0 : index
    %1257 = vector.load %arg3[%1256, %c0_619] : memref<128x8xf32, #tpu.memory_space<vmem>>, vector<1x8xf32>
    %c8_i32_620 = arith.constant 8 : i32
    %1258 = arith.muli %c11_i32_617, %c8_i32_620 : i32
    %1259 = tpu.assume_multiple %1258, 8 : i32
    %1260 = arith.index_cast %1259 : i32 to index
    %c0_621 = arith.constant 0 : index
    %1261 = vector.load %arg3[%1260, %c0_621] : memref<128x8xf32, #tpu.memory_space<vmem>>, vector<8x8xf32>
    %1262 = vector.broadcast %1257 : vector<1x8xf32> to vector<8x8xf32>
    %1263 = arith.mulf %1262, %1261 : vector<8x8xf32>
    %1264 = arith.addf %1254, %1263 : vector<8x8xf32>
    %c12_i32_622 = arith.constant 12 : i32
    %c112_i32_623 = arith.constant 112 : i32
    %1265 = arith.addi %c112_i32_623, %c12_i32_622 : i32
    %1266 = arith.index_cast %1265 : i32 to index
    %c0_624 = arith.constant 0 : index
    %1267 = vector.load %arg3[%1266, %c0_624] : memref<128x8xf32, #tpu.memory_space<vmem>>, vector<1x8xf32>
    %c8_i32_625 = arith.constant 8 : i32
    %1268 = arith.muli %c12_i32_622, %c8_i32_625 : i32
    %1269 = tpu.assume_multiple %1268, 8 : i32
    %1270 = arith.index_cast %1269 : i32 to index
    %c0_626 = arith.constant 0 : index
    %1271 = vector.load %arg3[%1270, %c0_626] : memref<128x8xf32, #tpu.memory_space<vmem>>, vector<8x8xf32>
    %1272 = vector.broadcast %1267 : vector<1x8xf32> to vector<8x8xf32>
    %1273 = arith.mulf %1272, %1271 : vector<8x8xf32>
    %1274 = arith.addf %1264, %1273 : vector<8x8xf32>
    %c13_i32_627 = arith.constant 13 : i32
    %c112_i32_628 = arith.constant 112 : i32
    %1275 = arith.addi %c112_i32_628, %c13_i32_627 : i32
    %1276 = arith.index_cast %1275 : i32 to index
    %c0_629 = arith.constant 0 : index
    %1277 = vector.load %arg3[%1276, %c0_629] : memref<128x8xf32, #tpu.memory_space<vmem>>, vector<1x8xf32>
    %c8_i32_630 = arith.constant 8 : i32
    %1278 = arith.muli %c13_i32_627, %c8_i32_630 : i32
    %1279 = tpu.assume_multiple %1278, 8 : i32
    %1280 = arith.index_cast %1279 : i32 to index
    %c0_631 = arith.constant 0 : index
    %1281 = vector.load %arg3[%1280, %c0_631] : memref<128x8xf32, #tpu.memory_space<vmem>>, vector<8x8xf32>
    %1282 = vector.broadcast %1277 : vector<1x8xf32> to vector<8x8xf32>
    %1283 = arith.mulf %1282, %1281 : vector<8x8xf32>
    %1284 = arith.addf %1274, %1283 : vector<8x8xf32>
    %c14_i32_632 = arith.constant 14 : i32
    %c112_i32_633 = arith.constant 112 : i32
    %1285 = arith.addi %c112_i32_633, %c14_i32_632 : i32
    %1286 = arith.index_cast %1285 : i32 to index
    %c0_634 = arith.constant 0 : index
    %1287 = vector.load %arg3[%1286, %c0_634] : memref<128x8xf32, #tpu.memory_space<vmem>>, vector<1x8xf32>
    %c8_i32_635 = arith.constant 8 : i32
    %1288 = arith.muli %c14_i32_632, %c8_i32_635 : i32
    %1289 = tpu.assume_multiple %1288, 8 : i32
    %1290 = arith.index_cast %1289 : i32 to index
    %c0_636 = arith.constant 0 : index
    %1291 = vector.load %arg3[%1290, %c0_636] : memref<128x8xf32, #tpu.memory_space<vmem>>, vector<8x8xf32>
    %1292 = vector.broadcast %1287 : vector<1x8xf32> to vector<8x8xf32>
    %1293 = arith.mulf %1292, %1291 : vector<8x8xf32>
    %1294 = arith.addf %1284, %1293 : vector<8x8xf32>
    %c15_i32_637 = arith.constant 15 : i32
    %c112_i32_638 = arith.constant 112 : i32
    %1295 = arith.addi %c112_i32_638, %c15_i32_637 : i32
    %1296 = arith.index_cast %1295 : i32 to index
    %c0_639 = arith.constant 0 : index
    %1297 = vector.load %arg3[%1296, %c0_639] : memref<128x8xf32, #tpu.memory_space<vmem>>, vector<1x8xf32>
    %c8_i32_640 = arith.constant 8 : i32
    %1298 = arith.muli %c15_i32_637, %c8_i32_640 : i32
    %1299 = tpu.assume_multiple %1298, 8 : i32
    %1300 = arith.index_cast %1299 : i32 to index
    %c0_641 = arith.constant 0 : index
    %1301 = vector.load %arg3[%1300, %c0_641] : memref<128x8xf32, #tpu.memory_space<vmem>>, vector<8x8xf32>
    %1302 = vector.broadcast %1297 : vector<1x8xf32> to vector<8x8xf32>
    %1303 = arith.mulf %1302, %1301 : vector<8x8xf32>
    %1304 = arith.addf %1294, %1303 : vector<8x8xf32>
    %c16_i32_642 = arith.constant 16 : i32
    %c28 = arith.constant 28 : index
    %c0_643 = arith.constant 0 : index
    %1305 = vector.load %arg4[%c28, %c0_643] : memref<40x8xf32, #tpu.memory_space<vmem>>, vector<8x8xf32>
    tpu.vector_store %arg4[%c28, %c0_643], %1304 {strides = array<i32>} : memref<40x8xf32, #tpu.memory_space<vmem>>, vector<8x8xf32>,
    %c0_644 = arith.constant 0 : index
    %c0_645 = arith.constant 0 : index
    %1306 = vector.load %arg4[%c0_644, %c0_645] : memref<40x8xf32, #tpu.memory_space<vmem>>, vector<40x8xf32>
    %1307 = tpu.transpose %1306, [1, 0] : vector<40x8xf32> -> vector<8x40xf32>
    %1308 = vector.extract_strided_slice %1307 {offsets = [0, 0], sizes = [8, 36], strides = [1, 1]} : vector<8x40xf32> to vector<8x36xf32>
    %c0_646 = arith.constant 0 : index
    %c0_647 = arith.constant 0 : index
    %1309 = vector.load %arg2[%c0_646, %c0_647] : memref<8x36xf32, #tpu.memory_space<vmem>>, vector<8x36xf32>
    tpu.vector_store %arg2[%c0_646, %c0_647], %1308 {strides = array<i32>} : memref<8x36xf32, #tpu.memory_space<vmem>>, vector<8x36xf32>,
    return
  }
  func.func @transform_0(%arg0: i32) -> (i32, i32) {
    %c0_i32 = arith.constant 0 : i32
    %c0_i32_0 = arith.constant 0 : i32
    return %arg0, %c0_i32 : i32, i32
  }
  func.func @transform_1(%arg0: i32) -> (i32, i32) {
    %c0_i32 = arith.constant 0 : i32
    %c0_i32_0 = arith.constant 0 : i32
    return %arg0, %c0_i32 : i32, i32
  }
}

</mosaic_0001>

<bundles_post_ra>
// kernel: tpu_custom_call.1
= control target key start
LH: loop header
LB: loop body
LE: loop exit
PB: predicated region body
PF: predicated region fallthrough
CT: control target
= control target key end

     0   :  { %6 = vsyncpa [#allocation5], 0  ;;  %s1585_s0 = inlined_call_operand.hbm [shape: f32[8,128], index: 0, kind: input, shape index: {}]   ;;  %s1586_s1 = inlined_call_operand.hbm [shape: f32[8,36], index: 1, kind: output, shape index: {}]  }
   0x1   :  { %7 = vsyncpa [#allocation6], 0  ;;  %s1358_s6 = smov [#allocation4]   ;;  %s1310_s10 = scalar_lea.hbm %s1585_s0, 128 }
   0x2   :  { %s14_s7 = sshll.u32 %s1358_s6, 4  ;;  %p1311_p0 = scmp.ne.s32.totalorder %s1585_s0, %s1310_s10  ;;  %s15_s7 = int_to_ptr.vmem [resolvable:$true] %s14_s7 }
   0x3   :  { %p1314_p1 = scmp.lt.u32.totalorder %s1310_s10, %s1585_s0 }
   0x5   :  { %p1316_p2 = pnand %p1314_p1, %p1311_p0 }
   0x7   :  { %1319 = shalt.err (!%p1316_p2)
}
   0x8   :  { %s1320_s15 = scalar_lea.vmem %s15_s7, 128  ;;  %p1325_p4 = scmp.lt.s32.totalorder %s15_s7, %s15_s7 }
   0x9   :  { %p1321_p3 = scmp.ne.s32.totalorder %s15_s7, %s1320_s15  ;;  %p1326_p5 = scmp.lt.s32.totalorder %s1320_s15, %s1320_s15 }
   0xb   :  { %p1327_p6 = por %p1326_p5, %p1325_p4 }
   0xd   :  { %p1328_p7 = pnand %p1327_p6, %p1321_p3 }
   0xf   :  { %1331 = shalt.err (!%p1328_p7)
}
  0x10   :  { %17 = dma.hbm_to_vmem [thread:$0]  %s1585_s0, 128, %s15_s7, [#allocation5]  }
  0x11   :  { %1354 = dma.done.wait [#allocation5], 128  }
  0x12   :  { %1355 = vsyncadd [#allocation5], 4294967168  ;;  %v21_v0 = vld [vmem:[#allocation4] sm:$0xff]  ;;  %vm54_vm0 = vcmask 64512   ;;  %vm214_vm1 = vcmask 57344   ;;  %vm344_vm2 = vcmask 58368  }
  0x13   :  { %22 = vxpose.xlu0.b32.start.end [1/1] (short) %v21_v0, 128  ;;  %vm474_vm3 = vcmask 59392   ;;  %vm604_vm4 = vcmask 60416   ;;  %vm734_vm5 = vcmask 61440   ;;  %vm864_vm6 = vcmask 62464   ;;  %s1359_s0 = smov [#allocation7]  }
  0x14   :  { %vm994_vm7 = vcmask 63488   ;;  %s1170_s18 = sshll.u32 %s1359_s0, 4  ;;  %vm1162_vm8 = vcmask 293888   ;;  %s1171_s18 = int_to_ptr.vmem [resolvable:$true] %s1170_s18 }
  0x15   :  { %s1332_s19 = scalar_lea.vmem %s1171_s18, 128  ;;  %p1337_p9 = scmp.lt.s32.totalorder %s1171_s18, %s1171_s18 }
  0x16   :  { %p1333_p8 = scmp.ne.s32.totalorder %s1171_s18, %s1332_s19  ;;  %p1338_p10 = scmp.lt.s32.totalorder %s1332_s19, %s1332_s19 }
  0x18   :  { %p1339_p11 = por %p1338_p10, %p1337_p9 }
  0x1a   :  { %p1340_p12 = pnand %p1339_p11, %p1333_p8 }
  0x93   :  { %v38_v1 = vpop.trf.xlu0 }
  0x94   :  { %55 = vst.msk [vmem:[#allocation2] sm:$0xff] %vm54_vm0, %v38_v1 }
  0x97   :  { %v39_v2 = vpop.trf.xlu0 }
  0x98   :  { %56 = vst.msk [vmem:[#allocation2 + $0x8] sm:$0xff] %vm54_vm0, %v39_v2 }
  0x9b   :  { %v40_v3 = vpop.trf.xlu0  ;;  %v1387_v9 = vld [vmem:[#allocation2] sm:$0xff] }
  0x9c   :  { %57 = vst.msk [vmem:[#allocation2 + $0x10] sm:$0xff] %vm54_vm0, %v40_v3  ;;  %v1179_v13 = vld [vmem:[#allocation2] ss:$0 sm:$0xff]  ;;  %v1180_v14 = vld [vmem:[#allocation2 + $0x1] ss:$0 sm:$0xff] }
  0x9d   :  { %v1181_v24 = vld [vmem:[#allocation2 + $0x2] ss:$0 sm:$0xff]  ;;  %v77_v28 = vmul.f32 %v1179_v13, %v1387_v9  ;;  %v1182_v32 = vld [vmem:[#allocation2 + $0x3] ss:$0 sm:$0xff]  ;;  %v1183_v42 = vld [vmem:[#allocation2 + $0x4] ss:$0 sm:$0xff] }
  0x9e   :  { %v1184_v46 = vld [vmem:[#allocation2 + $0x5] ss:$0 sm:$0xff]  ;;  %v1185_v62 = vld [vmem:[#allocation2 + $0x6] ss:$0 sm:$0xff] }
  0x9f   :  { %v41_v4 = vpop.trf.xlu0  ;;  %v1389_v10 = vld [vmem:[#allocation2 + $0x8] sm:$0xff] }
  0xa0   :  { %58 = vst.msk [vmem:[#allocation2 + $0x18] sm:$0xff] %vm54_vm0, %v41_v4  ;;  %v86_v19 = vmul.f32 %v1180_v14, %v1389_v10 }
  0xa2   :  { %v87_v37 = vadd.f32 %v86_v19, %v77_v28 }
  0xa3   :  { %v42_v5 = vpop.trf.xlu0  ;;  %v1195_v6 = vld [vmem:[#allocation2 + $0x10] ss:$0 sm:$0xff]  ;;  %v1196_v7 = vld [vmem:[#allocation2 + $0x11] ss:$0 sm:$0xff]  ;;  %v1197_v20 = vld [vmem:[#allocation2 + $0x12] ss:$0 sm:$0xff] }
  0xa4   :  { %59 = vst.msk [vmem:[#allocation2 + $0x20] sm:$0xff] %vm54_vm0, %v42_v5  ;;  %v222_v11 = vmul.f32 %v1195_v6, %v1387_v9  ;;  %v230_v12 = vmul.f32 %v1196_v7, %v1389_v10  ;;  %v1394_v15 = vld [vmem:[#allocation2 + $0x10] sm:$0xff] }
  0xa5   :  { %v95_v29 = vmul.f32 %v1181_v24, %v1394_v15  ;;  %v238_v33 = vmul.f32 %v1197_v20, %v1394_v15  ;;  %v1198_v38 = vld [vmem:[#allocation2 + $0x13] ss:$0 sm:$0xff]  ;;  %v1199_v48 = vld [vmem:[#allocation2 + $0x14] ss:$0 sm:$0xff]  ;;  %v1200_v57 = vld [vmem:[#allocation2 + $0x15] ss:$0 sm:$0xff] }
  0xa6   :  { %v231_v25 = vadd.f32 %v230_v12, %v222_v11  ;;  %v1201_v4 = vld [vmem:[#allocation2 + $0x16] ss:$0 sm:$0xff] }
  0xa7   :  { %v43_v8 = vpop.trf.xlu0  ;;  %v1400_v26 = vld [vmem:[#allocation2 + $0x18] sm:$0xff]  ;;  %v96_v47 = vadd.f32 %v95_v29, %v87_v37  ;;  %v1202_v29 = vld [vmem:[#allocation2 + $0x17] ss:$0 sm:$0xff] }
  0xa8   :  { %60 = vst.msk [vmem:[#allocation2 + $0x28] sm:$0xff] %vm54_vm0, %v43_v8  ;;  %v104_v39 = vmul.f32 %v1182_v32, %v1400_v26  ;;  %v239_v43 = vadd.f32 %v238_v33, %v231_v25  ;;  %v246_v44 = vmul.f32 %v1198_v38, %v1400_v26 }
  0xaa   :  { %v105_v58 = vadd.f32 %v104_v39, %v96_v47  ;;  %v247_v63 = vadd.f32 %v246_v44, %v239_v43  ;;  %v1203_v44 = vld [vmem:[#allocation2 + $0x18] ss:$0 sm:$0xff] }
  0xab   :  { %v1211_v16 = vld [vmem:[#allocation2 + $0x20] ss:$0 sm:$0xff]  ;;  %v1212_v17 = vld [vmem:[#allocation2 + $0x21] ss:$0 sm:$0xff]  ;;  %v44_v18 = vpop.trf.xlu0  ;;  %v1213_v23 = vld [vmem:[#allocation2 + $0x22] ss:$0 sm:$0xff] }
  0xac   :  { %v352_v21 = vmul.f32 %v1211_v16, %v1387_v9  ;;  %v360_v22 = vmul.f32 %v1212_v17, %v1389_v10  ;;  %61 = vst.msk [vmem:[#allocation2 + $0x30] sm:$0xff] %vm54_vm0, %v44_v18  ;;  %v1214_v27 = vld [vmem:[#allocation2 + $0x23] ss:$0 sm:$0xff]  ;;  %v368_v31 = vmul.f32 %v1213_v23, %v1394_v15  ;;  %v1215_v35 = vld [vmem:[#allocation2 + $0x24] ss:$0 sm:$0xff] }
  0xad   :  { %v1406_v34 = vld [vmem:[#allocation2 + $0x20] sm:$0xff]  ;;  %v376_v41 = vmul.f32 %v1214_v27, %v1400_v26 }
  0xae   :  { %v361_v30 = vadd.f32 %v360_v22, %v352_v21  ;;  %v113_v49 = vmul.f32 %v1183_v42, %v1406_v34  ;;  %v384_v51 = vmul.f32 %v1215_v35, %v1406_v34  ;;  %v254_v52 = vmul.f32 %v1199_v48, %v1406_v34  ;;  %v1216_v0 = vld [vmem:[#allocation2 + $0x25] ss:$0 sm:$0xff]  ;;  %v1186_v18 = vld [vmem:[#allocation2 + $0x7] ss:$0 sm:$0xff]  ;;  %v1187_v22 = vld [vmem:[#allocation2 + $0x8] ss:$0 sm:$0xff] }
  0xaf   :  { %v45_v36 = vpop.trf.xlu0  ;;  %v1412_v45 = vld [vmem:[#allocation2 + $0x28] sm:$0xff]  ;;  %v1217_v23 = vld [vmem:[#allocation2 + $0x26] ss:$0 sm:$0xff] }
  0xb0   :  { %v369_v40 = vadd.f32 %v368_v31, %v361_v30  ;;  %62 = vst.msk [vmem:[#allocation2 + $0x38] sm:$0xff] %vm54_vm0, %v45_v36  ;;  %v122_v60 = vmul.f32 %v1184_v46, %v1412_v45  ;;  %v262_v1 = vmul.f32 %v1200_v57, %v1412_v45  ;;  %v114_v5 = vadd.f32 %v113_v49, %v105_v58  ;;  %v1218_v30 = vld [vmem:[#allocation2 + $0x27] ss:$0 sm:$0xff]  ;;  %v1188_v58 = vld [vmem:[#allocation2 + $0x9] ss:$0 sm:$0xff] }
  0xb1   :  { %v392_v6 = vmul.f32 %v1216_v0, %v1412_v45  ;;  %v255_v11 = vadd.f32 %v254_v52, %v247_v63 }
  0xb2   :  { %v377_v50 = vadd.f32 %v376_v41, %v369_v40  ;;  %v123_v19 = vadd.f32 %v122_v60, %v114_v5 }
  0xb3   :  { %v1417_v53 = vld [vmem:[#allocation2 + $0x30] sm:$0xff]  ;;  %v46_v56 = vpop.trf.xlu0  ;;  %v263_v24 = vadd.f32 %v262_v1, %v255_v11 }
  0xb4   :  { %v1227_v54 = vld [vmem:[#allocation2 + $0x30] ss:$0 sm:$0xff]  ;;  %v1228_v55 = vld [vmem:[#allocation2 + $0x31] ss:$0 sm:$0xff]  ;;  %v385_v59 = vadd.f32 %v384_v51, %v377_v50  ;;  %v1229_v61 = vld [vmem:[#allocation2 + $0x32] ss:$0 sm:$0xff]  ;;  %v131_v7 = vmul.f32 %v1185_v62, %v1417_v53  ;;  %v270_v12 = vmul.f32 %v1201_v4, %v1417_v53  ;;  %v400_v32 = vmul.f32 %v1217_v23, %v1417_v53 }
  0xb5   :  { %63 = vst.msk [vmem:[#allocation2 + $0x40] sm:$0xff] %vm54_vm0, %v46_v56  ;;  %v482_v2 = vmul.f32 %v1227_v54, %v1387_v9  ;;  %v490_v3 = vmul.f32 %v1228_v55, %v1389_v10  ;;  %v1230_v8 = vld [vmem:[#allocation2 + $0x33] ss:$0 sm:$0xff]  ;;  %v498_v14 = vmul.f32 %v1229_v61, %v1394_v15  ;;  %v1231_v21 = vld [vmem:[#allocation2 + $0x34] ss:$0 sm:$0xff] }
  0xb6   :  { %v393_v20 = vadd.f32 %v392_v6, %v385_v59  ;;  %v506_v27 = vmul.f32 %v1230_v8, %v1400_v26  ;;  %v1232_v28 = vld [vmem:[#allocation2 + $0x35] ss:$0 sm:$0xff]  ;;  %v132_v31 = vadd.f32 %v131_v7, %v123_v19  ;;  %v1233_v33 = vld [vmem:[#allocation2 + $0x36] ss:$0 sm:$0xff]  ;;  %v271_v36 = vadd.f32 %v270_v12, %v263_v24  ;;  %v1219_v51 = vld [vmem:[#allocation2 + $0x28] ss:$0 sm:$0xff] }
  0xb7   :  { %v491_v13 = vadd.f32 %v490_v3, %v482_v2  ;;  %v1428_v16 = vld [vmem:[#allocation2 + $0x38] sm:$0xff]  ;;  %v47_v17 = vpop.trf.xlu0  ;;  %v514_v38 = vmul.f32 %v1231_v21, %v1406_v34  ;;  %v522_v47 = vmul.f32 %v1232_v28, %v1412_v45  ;;  %v1234_v54 = vld [vmem:[#allocation2 + $0x37] ss:$0 sm:$0xff]  ;;  %v530_v59 = vmul.f32 %v1233_v33, %v1417_v53 }
  0xb8   :  { %64 = vst.msk [vmem:[#allocation2 + $0x48] sm:$0xff] %vm54_vm0, %v47_v17  ;;  %v140_v35 = vmul.f32 %v1186_v18, %v1428_v16  ;;  %v278_v39 = vmul.f32 %v1202_v29, %v1428_v16  ;;  %v401_v46 = vadd.f32 %v400_v32, %v393_v20  ;;  %v408_v48 = vmul.f32 %v1218_v30, %v1428_v16  ;;  %v1235_v62 = vld [vmem:[#allocation2 + $0x38] ss:$0 sm:$0xff]  ;;  %v1189_v18 = vld [vmem:[#allocation2 + $0xa] ss:$0 sm:$0xff] }
  0xb9   :  { %v499_v25 = vadd.f32 %v498_v14, %v491_v13  ;;  %v538_v61 = vmul.f32 %v1234_v54, %v1428_v16  ;;  %v1204_v19 = vld [vmem:[#allocation2 + $0x19] ss:$0 sm:$0xff]  ;;  %v1220_v20 = vld [vmem:[#allocation2 + $0x29] ss:$0 sm:$0xff] }
  0xba   :  { %v141_v60 = vadd.f32 %v140_v35, %v132_v31  ;;  %v279_v2 = vadd.f32 %v278_v39, %v271_v36  ;;  %v409_v11 = vadd.f32 %v408_v48, %v401_v46 }
  0xbb   :  { %v507_v37 = vadd.f32 %v506_v27, %v499_v25  ;;  %v48_v43 = vpop.trf.xlu0  ;;  %v1236_v27 = vld [vmem:[#allocation2 + $0x39] ss:$0 sm:$0xff] }
  0xbc   :  { %v1436_v40 = vld [vmem:[#allocation2 + $0x40] sm:$0xff]  ;;  %65 = vst.msk [vmem:[#allocation2 + $0x50] sm:$0xff] %vm54_vm0, %v48_v43 }
  0xbd   :  { %v1243_v41 = vld [vmem:[#allocation2 + $0x40] ss:$0 sm:$0xff]  ;;  %v1244_v42 = vld [vmem:[#allocation2 + $0x41] ss:$0 sm:$0xff]  ;;  %v149_v49 = vmul.f32 %v1187_v22, %v1436_v40  ;;  %v1245_v50 = vld [vmem:[#allocation2 + $0x42] ss:$0 sm:$0xff]  ;;  %v515_v52 = vadd.f32 %v514_v38, %v507_v37  ;;  %v286_v55 = vmul.f32 %v1203_v44, %v1436_v40  ;;  %v416_v63 = vmul.f32 %v1219_v51, %v1436_v40 }
  0xbe   :  { %v612_v56 = vmul.f32 %v1243_v41, %v1387_v9  ;;  %v620_v57 = vmul.f32 %v1244_v42, %v1389_v10  ;;  %v1246_v0 = vld [vmem:[#allocation2 + $0x43] ss:$0 sm:$0xff]  ;;  %v628_v4 = vmul.f32 %v1245_v50, %v1394_v15  ;;  %v1247_v5 = vld [vmem:[#allocation2 + $0x44] ss:$0 sm:$0xff]  ;;  %v1248_v6 = vld [vmem:[#allocation2 + $0x45] ss:$0 sm:$0xff]  ;;  %v546_v13 = vmul.f32 %v1235_v62, %v1436_v40 }
  0xbf   :  { %v523_v1 = vadd.f32 %v522_v47, %v515_v52  ;;  %v1449_v7 = vld [vmem:[#allocation2 + $0x48] sm:$0xff]  ;;  %v49_v8 = vpop.trf.xlu0  ;;  %v150_v12 = vadd.f32 %v149_v49, %v141_v60  ;;  %v1249_v14 = vld [vmem:[#allocation2 + $0x46] ss:$0 sm:$0xff]  ;;  %v287_v22 = vadd.f32 %v286_v55, %v279_v2  ;;  %v636_v24 = vmul.f32 %v1246_v0, %v1400_v26  ;;  %v1250_v25 = vld [vmem:[#allocation2 + $0x47] ss:$0 sm:$0xff] }
  0xc0   :  { %v621_v3 = vadd.f32 %v620_v57, %v612_v56  ;;  %v158_v17 = vmul.f32 %v1188_v58, %v1449_v7  ;;  %66 = vst.msk [vmem:[#allocation2 + $0x58] sm:$0xff] %vm54_vm0, %v49_v8  ;;  %v417_v28 = vadd.f32 %v416_v63, %v409_v11  ;;  %v644_v29 = vmul.f32 %v1247_v5, %v1406_v34  ;;  %v1251_v32 = vld [vmem:[#allocation2 + $0x48] ss:$0 sm:$0xff]  ;;  %v1252_v33 = vld [vmem:[#allocation2 + $0x49] ss:$0 sm:$0xff] }
  0xc1   :  { %v531_v21 = vadd.f32 %v530_v59, %v523_v1  ;;  %v652_v30 = vmul.f32 %v1248_v6, %v1412_v45  ;;  %v294_v31 = vmul.f32 %v1204_v19, %v1449_v7  ;;  %v660_v37 = vmul.f32 %v1249_v14, %v1417_v53  ;;  %v1205_v44 = vld [vmem:[#allocation2 + $0x1a] ss:$0 sm:$0xff]  ;;  %v1221_v56 = vld [vmem:[#allocation2 + $0x2a] ss:$0 sm:$0xff]  ;;  %v1190_v6 = vld [vmem:[#allocation2 + $0xb] ss:$0 sm:$0xff] }
  0xc2   :  { %v629_v23 = vadd.f32 %v628_v4, %v621_v3  ;;  %v424_v38 = vmul.f32 %v1220_v20, %v1449_v7  ;;  %v668_v46 = vmul.f32 %v1250_v25, %v1428_v16  ;;  %v159_v47 = vadd.f32 %v158_v17, %v150_v12  ;;  %v1237_v57 = vld [vmem:[#allocation2 + $0x3a] ss:$0 sm:$0xff]  ;;  %v1253_v1 = vld [vmem:[#allocation2 + $0x4a] ss:$0 sm:$0xff]  ;;  %v1206_v8 = vld [vmem:[#allocation2 + $0x1b] ss:$0 sm:$0xff] }
  0xc3   :  { %v539_v35 = vadd.f32 %v538_v61, %v531_v21  ;;  %v1460_v39 = vld [vmem:[#allocation2 + $0x50] sm:$0xff]  ;;  %v50_v43 = vpop.trf.xlu0  ;;  %v554_v48 = vmul.f32 %v1236_v27, %v1449_v7  ;;  %v295_v58 = vadd.f32 %v294_v31, %v287_v22  ;;  %v676_v59 = vmul.f32 %v1251_v32, %v1436_v40  ;;  %v1222_v11 = vld [vmem:[#allocation2 + $0x2b] ss:$0 sm:$0xff]  ;;  %v1238_v25 = vld [vmem:[#allocation2 + $0x3b] ss:$0 sm:$0xff] }
  0xc4   :  { %v637_v36 = vadd.f32 %v636_v24, %v629_v23  ;;  %v1259_v41 = vld [vmem:[#allocation2 + $0x50] ss:$0 sm:$0xff]  ;;  %v1260_v42 = vld [vmem:[#allocation2 + $0x51] ss:$0 sm:$0xff]  ;;  %v167_v49 = vmul.f32 %v1189_v18, %v1460_v39  ;;  %67 = vst.msk [vmem:[#allocation2 + $0x60] sm:$0xff] %vm54_vm0, %v50_v43  ;;  %v302_v52 = vmul.f32 %v1205_v44, %v1460_v39  ;;  %v684_v60 = vmul.f32 %v1252_v33, %v1449_v7 }
  0xc5   :  { %v547_v50 = vadd.f32 %v546_v13, %v539_v35  ;;  %v742_v54 = vmul.f32 %v1259_v41, %v1387_v9  ;;  %v1261_v55 = vld [vmem:[#allocation2 + $0x52] ss:$0 sm:$0xff]  ;;  %v750_v61 = vmul.f32 %v1260_v42, %v1389_v10  ;;  %v425_v63 = vadd.f32 %v424_v38, %v417_v28  ;;  %v1262_v3 = vld [vmem:[#allocation2 + $0x53] ss:$0 sm:$0xff]  ;;  %v1263_v21 = vld [vmem:[#allocation2 + $0x54] ss:$0 sm:$0xff] }
  0xc6   :  { %v645_v51 = vadd.f32 %v644_v29, %v637_v36  ;;  %v432_v2 = vmul.f32 %v1221_v56, %v1460_v39  ;;  %v562_v12 = vmul.f32 %v1237_v57, %v1460_v39  ;;  %v692_v13 = vmul.f32 %v1253_v1, %v1460_v39  ;;  %v1264_v22 = vld [vmem:[#allocation2 + $0x55] ss:$0 sm:$0xff]  ;;  %v1265_v23 = vld [vmem:[#allocation2 + $0x56] ss:$0 sm:$0xff]  ;;  %v1266_v29 = vld [vmem:[#allocation2 + $0x57] ss:$0 sm:$0xff] }
  0xc7   :  { %v555_v0 = vadd.f32 %v554_v48, %v547_v50  ;;  %v1472_v4 = vld [vmem:[#allocation2 + $0x58] sm:$0xff]  ;;  %v51_v5 = vpop.trf.xlu0  ;;  %v751_v14 = vadd.f32 %v750_v61, %v742_v54  ;;  %v758_v17 = vmul.f32 %v1261_v55, %v1394_v15  ;;  %v168_v19 = vadd.f32 %v167_v49, %v159_v47  ;;  %v1254_v41 = vld [vmem:[#allocation2 + $0x4b] ss:$0 sm:$0xff]  ;;  %v1191_v56 = vld [vmem:[#allocation2 + $0xc] ss:$0 sm:$0xff] }
  0xc8   :  { %v653_v62 = vadd.f32 %v652_v30, %v645_v51  ;;  %68 = vst.msk [vmem:[#allocation2 + $0x68] sm:$0xff] %vm54_vm0, %v51_v5  ;;  %v303_v20 = vadd.f32 %v302_v52, %v295_v58  ;;  %v176_v24 = vmul.f32 %v1190_v6, %v1472_v4  ;;  %v766_v28 = vmul.f32 %v1262_v3, %v1400_v26  ;;  %v1268_v48 = vld [vmem:[#allocation2 + $0x59] ss:$0 sm:$0xff]  ;;  %v1269_v54 = vld [vmem:[#allocation2 + $0x5a] ss:$0 sm:$0xff] }
  0xc9   :  { %v759_v27 = vadd.f32 %v758_v17, %v751_v14  ;;  %v310_v30 = vmul.f32 %v1206_v8, %v1472_v4  ;;  %v440_v31 = vmul.f32 %v1222_v11, %v1472_v4  ;;  %v433_v33 = vadd.f32 %v432_v2, %v425_v63  ;;  %v1270_v55 = vld [vmem:[#allocation2 + $0x5b] ss:$0 sm:$0xff]  ;;  %v1207_v1 = vld [vmem:[#allocation2 + $0x1c] ss:$0 sm:$0xff]  ;;  %v1223_v8 = vld [vmem:[#allocation2 + $0x2c] ss:$0 sm:$0xff] }
  0xca   :  { %v661_v18 = vadd.f32 %v660_v37, %v653_v62  ;;  %v563_v35 = vadd.f32 %v562_v12, %v555_v0  ;;  %v570_v36 = vmul.f32 %v1238_v25, %v1472_v4  ;;  %v1267_v37 = vld [vmem:[#allocation2 + $0x58] ss:$0 sm:$0xff]  ;;  %v774_v43 = vmul.f32 %v1263_v21, %v1406_v34  ;;  %v1239_v11 = vld [vmem:[#allocation2 + $0x3c] ss:$0 sm:$0xff] }
  0xcb   :  { %v52_v38 = vpop.trf.xlu0  ;;  %v767_v42 = vadd.f32 %v766_v28, %v759_v27  ;;  %v782_v44 = vmul.f32 %v1264_v22, %v1412_v45  ;;  %v790_v47 = vmul.f32 %v1265_v23, %v1417_v53  ;;  %v1486_v49 = vld [vmem:[#allocation2 + $0x60] sm:$0xff]  ;;  %v798_v50 = vmul.f32 %v1266_v29, %v1428_v16  ;;  %v1271_v21 = vld [vmem:[#allocation2 + $0x5c] ss:$0 sm:$0xff]  ;;  %v1192_v27 = vld [vmem:[#allocation2 + $0xd] ss:$0 sm:$0xff] }
  0xcc   :  { %v669_v32 = vadd.f32 %v668_v46, %v661_v18  ;;  %69 = vst.msk [vmem:[#allocation2 + $0x70] sm:$0xff] %vm54_vm0, %v52_v38  ;;  %v177_v51 = vadd.f32 %v176_v24, %v168_v19  ;;  %v700_v52 = vmul.f32 %v1254_v41, %v1472_v4  ;;  %v311_v58 = vadd.f32 %v310_v30, %v303_v20  ;;  %v1275_v63 = vld [vmem:[#allocation2 + $0x60] ss:$0 sm:$0xff]  ;;  %v1276_v0 = vld [vmem:[#allocation2 + $0x61] ss:$0 sm:$0xff] }
  0xcd   :  { %v775_v57 = vadd.f32 %v774_v43, %v767_v42  ;;  %v441_v61 = vadd.f32 %v440_v31, %v433_v33  ;;  %v806_v62 = vmul.f32 %v1267_v37, %v1436_v40  ;;  %v571_v3 = vadd.f32 %v570_v36, %v563_v35  ;;  %v1277_v19 = vld [vmem:[#allocation2 + $0x62] ss:$0 sm:$0xff]  ;;  %v1224_v33 = vld [vmem:[#allocation2 + $0x2d] ss:$0 sm:$0xff]  ;;  %v1279_v41 = vld [vmem:[#allocation2 + $0x64] ss:$0 sm:$0xff] }
  0xce   :  { %v677_v46 = vadd.f32 %v676_v59, %v669_v32  ;;  %v814_v59 = vmul.f32 %v1268_v48, %v1449_v7  ;;  %v185_v5 = vmul.f32 %v1191_v56, %v1486_v49  ;;  %v1495_v14 = vmul.f32 %v1269_v54, %v1460_v39  ;;  %v1278_v32 = vld [vmem:[#allocation2 + $0x63] ss:$0 sm:$0xff]  ;;  %v1240_v42 = vld [vmem:[#allocation2 + $0x3d] ss:$0 sm:$0xff]  ;;  %v1281_v48 = vld [vmem:[#allocation2 + $0x66] ss:$0 sm:$0xff] }
  0xcf   :  { %v53_v6 = vpop.trf.xlu0  ;;  %v783_v12 = vadd.f32 %v782_v44, %v775_v57  ;;  %v1498_v17 = vmul.f32 %v1270_v55, %v1472_v4  ;;  %v318_v18 = vmul.f32 %v1207_v1, %v1486_v49  ;;  %v448_v22 = vmul.f32 %v1223_v8, %v1486_v49  ;;  %v1505_v25 = vld [vmem:[#allocation2 + $0x68] sm:$0xff]  ;;  %v1282_v57 = vld [vmem:[#allocation2 + $0x67] ss:$0 sm:$0xff] }
  0xd0   :  { %v685_v2 = vadd.f32 %v684_v60, %v677_v46  ;;  %70 = vst.msk [vmem:[#allocation2 + $0x78] sm:$0xff] %vm54_vm0, %v53_v6  ;;  %v1255_v60 = vld [vmem:[#allocation2 + $0x4c] ss:$0 sm:$0xff]  ;;  %v872_v23 = vmul.f32 %v1275_v63, %v1387_v9  ;;  %v880_v24 = vmul.f32 %v1276_v0, %v1389_v10  ;;  %v578_v29 = vmul.f32 %v1239_v11, %v1486_v49 }
  0xd1   :  { %v791_v28 = vadd.f32 %v790_v47, %v783_v12  ;;  %v708_v30 = vmul.f32 %v1255_v60, %v1486_v49  ;;  %v1510_v31 = vmul.f32 %v1271_v21, %v1486_v49  ;;  %v186_v36 = vadd.f32 %v185_v5, %v177_v51  ;;  %v1280_v47 = vld [vmem:[#allocation2 + $0x65] ss:$0 sm:$0xff]  ;;  %v1209_v12 = vld [vmem:[#allocation2 + $0x1e] ss:$0 sm:$0xff]  ;;  %v1272_v60 = vld [vmem:[#allocation2 + $0x5d] ss:$0 sm:$0xff] }
  0xd2   :  { %v693_v20 = vadd.f32 %v692_v13, %v685_v2  ;;  %v1208_v13 = vld [vmem:[#allocation2 + $0x1d] ss:$0 sm:$0xff]  ;;  %v881_v37 = vadd.f32 %v880_v24, %v872_v23  ;;  %v888_v38 = vmul.f32 %v1277_v19, %v1394_v15  ;;  %v319_v44 = vadd.f32 %v318_v18, %v311_v58  ;;  %v1193_v58 = vld [vmem:[#allocation2 + $0xe] ss:$0 sm:$0xff]  ;;  %v1256_v18 = vld [vmem:[#allocation2 + $0x4d] ss:$0 sm:$0xff] }
  0xd3   :  { %v799_v43 = vadd.f32 %v798_v50, %v791_v28  ;;  %v194_v46 = vmul.f32 %v1192_v27, %v1505_v25  ;;  %v326_v54 = vmul.f32 %v1208_v13, %v1505_v25  ;;  %v896_v56 = vmul.f32 %v1278_v32, %v1400_v26  ;;  %v1521_v11 = vld [vmem:[#allocation2 + $0x70] sm:$0xff]  ;;  %v1283_v24 = vld [vmem:[#allocation2 + $0x68] ss:$0 sm:$0xff]  ;;  %v1284_v27 = vld [vmem:[#allocation2 + $0x69] ss:$0 sm:$0xff] }
  0xd4   :  { %v701_v35 = vadd.f32 %v700_v52, %v693_v20  ;;  %v889_v55 = vadd.f32 %v888_v38, %v881_v37  ;;  %v456_v52 = vmul.f32 %v1224_v33, %v1505_v25  ;;  %v586_v51 = vmul.f32 %v1240_v42, %v1505_v25  ;;  %v1285_v28 = vld [vmem:[#allocation2 + $0x6a] ss:$0 sm:$0xff]  ;;  %v1292_v42 = vld [vmem:[#allocation2 + $0x71] ss:$0 sm:$0xff] }
  0xd5   :  { %v807_v63 = vadd.f32 %v806_v62, %v799_v43  ;;  %v449_v0 = vadd.f32 %v448_v22, %v441_v61  ;;  %v579_v1 = vadd.f32 %v578_v29, %v571_v3  ;;  %v904_v50 = vmul.f32 %v1279_v41, %v1406_v34  ;;  %v1225_v29 = vld [vmem:[#allocation2 + $0x2e] ss:$0 sm:$0xff]  ;;  %v1291_v41 = vld [vmem:[#allocation2 + $0x70] ss:$0 sm:$0xff] }
  0xd6   :  { %v709_v2 = vadd.f32 %v708_v30, %v701_v35  ;;  %v897_v5 = vadd.f32 %v896_v56, %v889_v55  ;;  %v912_v6 = vmul.f32 %v1280_v47, %v1412_v45  ;;  %v920_v8 = vmul.f32 %v1281_v48, %v1417_v53  ;;  %v1241_v30 = vld [vmem:[#allocation2 + $0x3e] ss:$0 sm:$0xff]  ;;  %v1257_v43 = vld [vmem:[#allocation2 + $0x4e] ss:$0 sm:$0xff] }
  0xd7   :  { %v815_v19 = vadd.f32 %v814_v59, %v807_v63  ;;  %v928_v20 = vmul.f32 %v1282_v57, %v1428_v16  ;;  %v195_v62 = vadd.f32 %v194_v46, %v186_v36  ;;  %v327_v61 = vadd.f32 %v326_v54, %v319_v44  ;;  %v1273_v46 = vld [vmem:[#allocation2 + $0x5e] ss:$0 sm:$0xff] }
  0xd8   :  { %v905_v3 = vadd.f32 %v904_v50, %v897_v5  ;;  %v457_v21 = vadd.f32 %v456_v52, %v449_v0  ;;  %v587_v22 = vadd.f32 %v586_v51, %v579_v1  ;;  %v716_v23 = vmul.f32 %v1256_v18, %v1505_v25  ;;  %v1293_v52 = vld [vmem:[#allocation2 + $0x72] ss:$0 sm:$0xff]  ;;  %v1294_v51 = vld [vmem:[#allocation2 + $0x73] ss:$0 sm:$0xff]  ;;  %v1295_v50 = vld [vmem:[#allocation2 + $0x74] ss:$0 sm:$0xff] }
  0xd9   :  { %v823_v32 = vadd.f32 %v1495_v14, %v815_v19  ;;  %v846_v13 = vmul.f32 %v1272_v60, %v1505_v25  ;;  %v203_v59 = vmul.f32 %v1193_v58, %v1521_v11  ;;  %v334_v33 = vmul.f32 %v1209_v12, %v1521_v11  ;;  %v1540_v58 = vld [vmem:[#allocation2 + $0x78] sm:$0xff]  ;;  %v1194_v12 = vld [vmem:[#allocation2 + $0xf] ss:$0 sm:$0xff] }
  0xda   :  { %v913_v35 = vadd.f32 %v912_v6, %v905_v3  ;;  %v717_v36 = vadd.f32 %v716_v23, %v709_v2  ;;  %v464_v37 = vmul.f32 %v1225_v29, %v1521_v11  ;;  %v594_v38 = vmul.f32 %v1241_v30, %v1521_v11  ;;  %v1210_v18 = vld [vmem:[#allocation2 + $0x1f] ss:$0 sm:$0xff] }
  0xdb   :  { %v831_v14 = vadd.f32 %v1498_v17, %v823_v32  ;;  %v936_v44 = vmul.f32 %v1283_v24, %v1436_v40  ;;  %v944_v47 = vmul.f32 %v1284_v27, %v1449_v7  ;;  %v952_v48 = vmul.f32 %v1285_v28, %v1460_v39  ;;  %v1242_v3 = vld [vmem:[#allocation2 + $0x3f] ss:$0 sm:$0xff] }
  0xdc   :  { %v921_v54 = vadd.f32 %v920_v8, %v913_v35  ;;  %v204_v55 = vadd.f32 %v203_v59, %v195_v62  ;;  %v335_v56 = vadd.f32 %v334_v33, %v327_v61  ;;  %v724_v57 = vmul.f32 %v1257_v43, %v1521_v11  ;;  %v1226_v61 = vld [vmem:[#allocation2 + $0x2f] ss:$0 sm:$0xff] }
  0xdd   :  { %v839_v63 = vadd.f32 %v1510_v31, %v831_v14  ;;  %v854_v0 = vmul.f32 %v1273_v46, %v1521_v11  ;;  %v1002_v17 = vmul.f32 %v1291_v41, %v1387_v9  ;;  %v1010_v1 = vmul.f32 %v1292_v42, %v1389_v10  ;;  %v1297_v42 = vld [vmem:[#allocation2 + $0x76] ss:$0 sm:$0xff]  ;;  %v1288_v14 = vld [vmem:[#allocation2 + $0x6d] ss:$0 sm:$0xff] }
  0xde   :  { %v929_v2 = vadd.f32 %v928_v20, %v921_v54  ;;  %v465_v5 = vadd.f32 %v464_v37, %v457_v21  ;;  %v595_v6 = vadd.f32 %v594_v38, %v587_v22  ;;  %v725_v8 = vadd.f32 %v724_v57, %v717_v36  ;;  %v1258_v21 = vld [vmem:[#allocation2 + $0x4f] ss:$0 sm:$0xff]  ;;  %v1286_v22 = vld [vmem:[#allocation2 + $0x6b] ss:$0 sm:$0xff] }
  0xdf   :  { %v847_v19 = vadd.f32 %v846_v13, %v839_v63  ;;  %v1011_v60 = vadd.f32 %v1010_v1, %v1002_v17  ;;  %v1018_v62 = vmul.f32 %v1293_v52, %v1394_v15  ;;  %v1026_v31 = vmul.f32 %v1294_v51, %v1400_v26  ;;  %v1274_v15 = vld [vmem:[#allocation2 + $0x5f] ss:$0 sm:$0xff]  ;;  %v1296_v26 = vld [vmem:[#allocation2 + $0x75] ss:$0 sm:$0xff]  ;;  %v1299_v63 = vld [vmem:[#allocation2 + $0x78] ss:$0 sm:$0xff] }
  0xe0   :  { %v937_v9 = vadd.f32 %v936_v44, %v929_v2  ;;  %v1034_v10 = vmul.f32 %v1295_v50, %v1406_v34  ;;  %v212_v23 = vmul.f32 %v1194_v12, %v1540_v58  ;;  %v342_v20 = vmul.f32 %v1210_v18, %v1540_v58  ;;  %v1287_v34 = vld [vmem:[#allocation2 + $0x6c] ss:$0 sm:$0xff]  ;;  %v1300_v2 = vld [vmem:[#allocation2 + $0x79] ss:$0 sm:$0xff]  ;;  %v1301_v18 = vld [vmem:[#allocation2 + $0x7a] ss:$0 sm:$0xff] }
  0xe1   :  { %v855_v24 = vadd.f32 %v854_v0, %v847_v19  ;;  %v1019_v27 = vadd.f32 %v1018_v62, %v1011_v60  ;;  %v472_v28 = vmul.f32 %v1226_v61, %v1540_v58  ;;  %v602_v29 = vmul.f32 %v1242_v3, %v1540_v58 }
  0xe2   :  { %v945_v30 = vadd.f32 %v944_v47, %v937_v9  ;;  %v213_v32 = vadd.f32 %v212_v23, %v204_v55  ;;  %v343_v13 = vadd.f32 %v342_v20, %v335_v56  ;;  %v732_v59 = vmul.f32 %v1258_v21, %v1540_v58  ;;  %v1298_v55 = vld [vmem:[#allocation2 + $0x77] ss:$0 sm:$0xff]  ;;  %v1304_v20 = vld [vmem:[#allocation2 + $0x7d] ss:$0 sm:$0xff] }
  0xe3   :  { %v1027_v33 = vadd.f32 %v1026_v31, %v1019_v27  ;;  %v473_v35 = vadd.f32 %v472_v28, %v465_v5  ;;  %v603_v36 = vadd.f32 %v602_v29, %v595_v6  ;;  %v862_v37 = vmul.f32 %v1274_v15, %v1540_v58  ;;  %v1290_v5 = vld [vmem:[#allocation2 + $0x6f] ss:$0 sm:$0xff]  ;;  %v1306_v28 = vld [vmem:[#allocation2 + $0x7f] ss:$0 sm:$0xff] }
  0xe4   :  { %v953_v38 = vadd.f32 %v952_v48, %v945_v30  ;;  %v960_v41 = vmul.f32 %v1286_v22, %v1472_v4  ;;  %v733_v43 = vadd.f32 %v732_v59, %v725_v8  ;;  %215 = vst.msk [vmem:[#allocation3] sm:$0x1] %vm214_vm1, %v213_v32  ;;  %v1042_v47 = vmul.f32 %v1296_v26, %v1412_v45  ;;  %v1289_v45 = vld [vmem:[#allocation2 + $0x6e] ss:$0 sm:$0xff] }
  0xe5   :  { %345 = vst.msk [vmem:[#allocation3 + $0x1] sm:$0x3] %vm344_vm2, %v343_v13  ;;  %v1035_v44 = vadd.f32 %v1034_v10, %v1027_v33  ;;  %v863_v46 = vadd.f32 %v862_v37, %v855_v24  ;;  %v968_v48 = vmul.f32 %v1287_v34, %v1486_v49  ;;  %v1050_v57 = vmul.f32 %v1297_v42, %v1417_v53  ;;  %v1303_v10 = vld [vmem:[#allocation2 + $0x7c] ss:$0 sm:$0xff]  ;;  %v1305_v24 = vld [vmem:[#allocation2 + $0x7e] ss:$0 sm:$0xff] }
  0xe6   :  { %475 = vst.msk [vmem:[#allocation3 + $0x3] sm:$0x7] %vm474_vm3, %v473_v35  ;;  %v961_v54 = vadd.f32 %v960_v41, %v953_v38  ;;  %v976_v51 = vmul.f32 %v1288_v14, %v1505_v25  ;;  %v1058_v17 = vmul.f32 %v1298_v55, %v1428_v16  ;;  %v984_v50 = vmul.f32 %v1289_v45, %v1521_v11  ;;  %v1302_v16 = vld [vmem:[#allocation2 + $0x7b] ss:$0 sm:$0xff] }
  0xe7   :  { %605 = vst.msk [vmem:[#allocation3 + $0x6] sm:$0xf] %vm604_vm4, %v603_v36  ;;  %v1043_v56 = vadd.f32 %v1042_v47, %v1035_v44  ;;  %v1066_v8 = vmul.f32 %v1299_v63, %v1436_v40  ;;  %v992_v53 = vmul.f32 %v1290_v5, %v1540_v58  ;;  %v1074_v62 = vmul.f32 %v1300_v2, %v1449_v7 }
  0xe8   :  { %735 = vst.msk [vmem:[#allocation3 + $0xa] sm:$0x1f] %vm734_vm5, %v733_v43  ;;  %v969_v52 = vadd.f32 %v968_v48, %v961_v54  ;;  %v1082_v9 = vmul.f32 %v1301_v18, %v1460_v39  ;;  %v1090_v40 = vmul.f32 %v1302_v16, %v1472_v4  ;;  %v1098_v22 = vmul.f32 %v1303_v10, %v1486_v49 }
  0xe9   :  { %865 = vst.msk [vmem:[#allocation3 + $0xf] sm:$0x3f] %vm864_vm6, %v863_v46  ;;  %v1051_v0 = vadd.f32 %v1050_v57, %v1043_v56  ;;  %v1106_v27 = vmul.f32 %v1304_v20, %v1505_v25  ;;  %v1114_v15 = vmul.f32 %v1305_v24, %v1521_v11  ;;  %v1122_v26 = vmul.f32 %v1306_v28, %v1540_v58 }
  0xea   :  { %v977_v1 = vadd.f32 %v976_v51, %v969_v52 }
  0xeb   :  { %v1059_v6 = vadd.f32 %v1058_v17, %v1051_v0 }
  0xec   :  { %v985_v12 = vadd.f32 %v984_v50, %v977_v1 }
  0xed   :  { %v1067_v60 = vadd.f32 %v1066_v8, %v1059_v6 }
  0xee   :  { %v1125_v19 = vld [vmem:[#allocation3] sm:$0xff]  ;;  %v993_v31 = vadd.f32 %v992_v53, %v985_v12 }
  0xef   :  { %1130 = vxpose.xlu0.b32.start [1/5] (short) (narrow) %v1125_v19, 8  ;;  %v1075_v3 = vadd.f32 %v1074_v62, %v1067_v60 }
  0xf0   :  { %v1126_v61 = vld [vmem:[#allocation3 + $0x8] sm:$0xff]  ;;  %995 = vst.msk [vmem:[#allocation3 + $0x15] sm:$0x7f] %vm994_vm7, %v993_v31 }
  0xf1   :  { %v1083_v23 = vadd.f32 %v1082_v9, %v1075_v3 }
  0xf3   :  { %1131 = vxpose.xlu0.b32.cont [2/5] (short) (narrow) %v1126_v61, 8  ;;  %v1091_v21 = vadd.f32 %v1090_v40, %v1083_v23 }
  0xf5   :  { %v1099_v7 = vadd.f32 %v1098_v22, %v1091_v21 }
  0xf7   :  { %v1107_v29 = vadd.f32 %v1106_v27, %v1099_v7  ;;  %v1127_v30 = vld [vmem:[#allocation3 + $0x10] sm:$0xff] }
  0xf8   :  { %1132 = vxpose.xlu0.b32.cont [3/5] (short) (narrow) %v1127_v30, 8 }
  0xf9   :  { %v1115_v39 = vadd.f32 %v1114_v15, %v1107_v29 }
  0xfb   :  { %v1123_v32 = vadd.f32 %v1122_v26, %v1115_v39 }
  0xfd   :  { %1124 = vst.msk [vmem:[#allocation3 + $0x1c] sm:$0xff] %vm54_vm0, %v1123_v32 }
 0x104   :  { %v1128_v4 = vld [vmem:[#allocation3 + $0x18] sm:$0xff]  ;;  %v1129_v13 = vld [vmem:[#allocation3 + $0x20] sm:$0xff] }
 0x105   :  { %1133 = vxpose.xlu0.b32.cont [4/5] (short) (narrow) %v1128_v4, 8 }
 0x109   :  { %1134 = vxpose.xlu0.b32.end [5/5] (short) (narrow) %v1129_v13, 8 }
 0x179   :  { %v1146_v49 = vpop.trf.xlu0 }
 0x17a   :  { %1163 = vst.msk [vmem:[#allocation7] sm:$0xff] %vm1162_vm8, %v1146_v49 }
 0x17b   :  { %1343 = shalt.err (!%p1340_p12)
}
 0x17c   :  { %s1344_s22 = scalar_lea.hbm %s1586_s1, 128 }
 0x17d   :  { %p1345_p13 = scmp.ne.s32.totalorder %s1586_s1, %s1344_s22  ;;  %p1348_p0 = scmp.lt.u32.totalorder %s1344_s22, %s1586_s1 }
 0x17f   :  { %p1350_p1 = pnand %p1348_p0, %p1345_p13 }
 0x181   :  { %1353 = shalt.err (!%p1350_p1)
}
 0x182   :  { %1173 = dma.vmem_to_hbm [thread:$0]  %s1171_s18, 128, %s1586_s1, [#allocation6]  }
 0x183   :  { %1356 = dma.done.wait [#allocation6], 128  }
 0x184   :  { %1357 = vsyncadd [#allocation6], 4294967168 }
 0x185   :  { %1177 = vsyncpa [#allocation5], 1 }
 0x186   :  { %1178 = vsyncpa [#allocation6], 1 }

</bundles_post_ra>
